<compile_context>
chip_gen: v5e
topology: v5e:2x2
jax: 0.10.0
libtpu: 0.0.40
codegen_flags: <defaults>
</compile_context>

<pallas_src>
import jax
import jax.numpy as jnp
from jax import lax
from jax.experimental import pallas as pl
from jax.experimental.pallas import tpu as pltpu

# Tap ordering k = dy*3 + dx  <->  weight.reshape(9*C, C) row order (HWIO).
_OFFSETS = tuple((dy - 1, dx - 1) for dy in range(3) for dx in range(3))


def _resblock_kernel(x_ref, w1_ref, s1_ref, t1_ref, alpha_ref,
                     w2_ref, s2_ref, t2_ref, o_ref, patches_ref):
    # x_ref       : (1, H, W, C)   unpadded input tile (one batch element), f32
    # w*_ref      : (9*C, C)       im2col weight matrices, bf16
    # s*/t*_ref   : (1, C)         fused BN scale / shift (conv bias folded in)
    # alpha_ref   : (1, 1)         PReLU slope
    # o_ref       : (1, H, W, C)
    # patches_ref : (H, W, 9*C)    f32 VMEM scratch holding the im2col matrix
    _, H, W, C = x_ref.shape
    HW = H * W

    x = x_ref[0]                                   # (H, W, C) f32

    def zero_halo():
        # Zero only the 1-pixel halo strips of each tap's lane-slot; the
        # interior of every slot is fully overwritten each step.
        zrow = jnp.zeros((1, W, C), jnp.float32)
        zcol = jnp.zeros((H, 1, C), jnp.float32)
        for k, (oy, ox) in enumerate(_OFFSETS):
            c0 = k * C
            if oy == -1:
                patches_ref[0:1, :, c0:c0 + C] = zrow
            elif oy == 1:
                patches_ref[H - 1:H, :, c0:c0 + C] = zrow
            if ox == -1:
                patches_ref[:, 0:1, c0:c0 + C] = zcol
            elif ox == 1:
                patches_ref[:, W - 1:W, c0:c0 + C] = zcol

    def fill_patches(src):
        # src: (H, W, C) value.  Write the valid (shifted) window of each tap.
        for k, (oy, ox) in enumerate(_OFFSETS):
            h0, h1 = max(0, -oy), min(H, H - oy)
            w0, w1 = max(0, -ox), min(W, W - ox)
            c0 = k * C
            patches_ref[h0:h1, w0:w1, c0:c0 + C] = (
                src[h0 + oy:h1 + oy, w0 + ox:w1 + ox, :])

    def conv(w_ref):
        # Single MXU matmul with K = 9*C, bf16 inputs, f32 accumulation.
        p = patches_ref[...].reshape(HW, 9 * C).astype(jnp.bfloat16)
        return jnp.dot(p, w_ref[...], preferred_element_type=jnp.float32)

    zero_halo()

    # ---- conv1 + BN1 (fused scale/shift) + PReLU ----
    fill_patches(x)
    y = conv(w1_ref) * s1_ref[...] + t1_ref[...]
    alpha = alpha_ref[0, 0]
    y = jnp.where(y > 0, y, alpha * y)

    # ---- conv2 + BN2 + residual add ----
    fill_patches(y.reshape(H, W, C))
    y2 = conv(w2_ref) * s2_ref[...] + t2_ref[...]
    out = x.reshape(HW, C) + y2
    o_ref[...] = out.reshape(1, H, W, C).astype(o_ref.dtype)


@jax.jit
def residual_block_pallas(x_nchw, params):
    """Forward pass of ResidualBlock (eval-mode BN).  x_nchw: (N, C, H, W) f32."""
    eps = 1e-5
    N, C, H, W = x_nchw.shape
    x = jnp.transpose(x_nchw, (0, 2, 3, 1))                    # NCHW -> NHWC

    # Fold conv bias + BN (eval mode) into per-channel scale / shift.
    def fuse(bias, gamma, beta, mean, var):
        scale = gamma / jnp.sqrt(var + eps)
        shift = beta + (bias - mean) * scale
        return scale.reshape(1, C), shift.reshape(1, C)

    s1, t1 = fuse(params["b1"], params["gamma1"], params["beta1"],
                  params["mean1"], params["var1"])
    s2, t2 = fuse(params["b2"], params["gamma2"], params["beta2"],
                  params["mean2"], params["var2"])
    alpha = params["alpha"].reshape(1, 1).astype(jnp.float32)

    # im2col weight matrices: HWIO (3,3,C,C) -> (9*C, C), bf16 for the MXU.
    w1m = params["w1"].reshape(9 * C, C).astype(jnp.bfloat16)
    w2m = params["w2"].reshape(9 * C, C).astype(jnp.bfloat16)

    # Scoped-VMEM budget: double-buffered blocks + im2col scratch, 2x headroom.
    est = (4 * H * W * C * 4            # x + out blocks (double-buffered, f32)
           + 4 * 9 * C * C * 2          # w1m + w2m (double-buffered, bf16)
           + H * W * 9 * C * 4          # im2col scratch (f32)
           + 10 * C * 4)                # scale/shift vectors + alpha
    vmem_limit = int(min(64 * 2**20, max(16 * 2**20, 2 * est)))

    full = lambda shape: pl.BlockSpec(shape, lambda n: (0,) * len(shape))
    out = pl.pallas_call(
        _resblock_kernel,
        out_shape=jax.ShapeDtypeStruct((N, H, W, C), x.dtype),
        grid_spec=pltpu.PrefetchScalarGridSpec(
            num_scalar_prefetch=0,
            grid=(N,),
            in_specs=[
                pl.BlockSpec((1, H, W, C), lambda n: (n, 0, 0, 0)),
                full((9 * C, C)),     # w1 (im2col)
                full((1, C)),         # s1
                full((1, C)),         # t1
                full((1, 1)),         # alpha
                full((9 * C, C)),     # w2 (im2col)
                full((1, C)),         # s2
                full((1, C)),         # t2
            ],
            out_specs=pl.BlockSpec((1, H, W, C), lambda n: (n, 0, 0, 0)),
            scratch_shapes=[pltpu.VMEM((H, W, 9 * C), jnp.float32)],
        ),
        compiler_params=pltpu.CompilerParams(
            dimension_semantics=("parallel",),
            vmem_limit_bytes=vmem_limit),
    )(x, w1m, s1, t1, alpha, w2m, s2, t2)

    return jnp.transpose(out, (0, 3, 1, 2))                    # NHWC -> NCHW


def residual_block_ref(x_nchw, params):
    """Pure-JAX f32 reference (same semantics, eval-mode BN)."""
    eps = 1e-5
    x = jnp.transpose(x_nchw, (0, 2, 3, 1))

    def conv(inp, w, b):
        return lax.conv_general_dilated(
            inp, w, (1, 1), "SAME",
            dimension_numbers=("NHWC", "HWIO", "NHWC")) + b

    def bn(inp, gamma, beta, mean, var):
        return (inp - mean) / jnp.sqrt(var + eps) * gamma + beta

    y = conv(x, params["w1"], params["b1"])
    y = bn(y, params["gamma1"], params["beta1"], params["mean1"], params["var1"])
    y = jnp.where(y > 0, y, params["alpha"] * y)
    y = conv(y, params["w2"], params["b2"])
    y = bn(y, params["gamma2"], params["beta2"], params["mean2"], params["var2"])
    return jnp.transpose(x + y, (0, 3, 1, 2))


def make_params(key, C):
    ks = jax.random.split(key, 10)
    f32 = jnp.float32
    return {
        "w1": 0.1 * jax.random.normal(ks[0], (3, 3, C, C), f32),   # HWIO
        "b1": 0.1 * jax.random.normal(ks[1], (C,), f32),
        "gamma1": 1.0 + 0.1 * jax.random.normal(ks[2], (C,), f32),
        "beta1": 0.1 * jax.random.normal(ks[3], (C,), f32),
        "mean1": 0.1 * jax.random.normal(ks[4], (C,), f32),
        "var1": 1.0 + 0.1 * jax.random.uniform(ks[5], (C,), f32),
        "alpha": jnp.array(0.25, f32),                             # PReLU default
        "w2": 0.1 * jax.random.normal(ks[6], (3, 3, C, C), f32),
        "b2": 0.1 * jax.random.normal(ks[7], (C,), f32),
        "gamma2": 1.0 + 0.1 * jax.random.normal(ks[8], (C,), f32),
        "beta2": 0.1 * jax.random.normal(ks[9], (C,), f32),
        "mean2": jnp.zeros((C,), f32),
        "var2": jnp.ones((C,), f32),
    }


if __name__ == "__main__":
    key = jax.random.PRNGKey(0)
    kx, kp = jax.random.split(key)
    N, C, H, W = 2, 4, 16, 16
    x = jax.random.normal(kx, (N, C, H, W), jnp.float32)
    params = make_params(kp, C)

    out = jax.block_until_ready(residual_block_pallas(x, params))
    ref = jax.block_until_ready(residual_block_ref(x, params))

    assert out.shape == (N, C, H, W)
    # bf16 MXU inputs (f32 accumulation) vs. pure-f32 reference -> loosened tol.
    assert jnp.allclose(out, ref, atol=5e-2, rtol=5e-2), "mismatch vs reference"
    print("KERNEL_OK")
</pallas_src>

<mosaic_0001>
module attributes {stable_mosaic.version = 11 : i64} {
  func.func @_resblock_kernel(%arg0: i32, %arg1: memref<1x16x16x4xf32, #tpu.memory_space<vmem>>, %arg2: memref<36x4xbf16, #tpu.memory_space<vmem>>, %arg3: memref<1x4xf32, #tpu.memory_space<vmem>>, %arg4: memref<1x4xf32, #tpu.memory_space<vmem>>, %arg5: memref<1x1xf32, #tpu.memory_space<vmem>>, %arg6: memref<36x4xbf16, #tpu.memory_space<vmem>>, %arg7: memref<1x4xf32, #tpu.memory_space<vmem>>, %arg8: memref<1x4xf32, #tpu.memory_space<vmem>>, %arg9: memref<1x16x16x4xf32, #tpu.memory_space<vmem>>, %arg10: memref<16x16x36xf32, #tpu.memory_space<vmem>>) attributes {dimension_semantics = [#tpu.dimension_semantics<parallel>], iteration_bounds = array<i64: 2>, scalar_prefetch = 0 : i64, scratch_operands = 1 : i64, tpu.core_type = #tpu.core_type<tc>, window_params = [{transform_indices = @transform_0, window_bounds = array<i64: 1, 16, 16, 4>}, {pipeline_mode = #tpu.pipeline_mode<synchronous>, transform_indices = @transform_1, window_bounds = array<i64: 36, 4>}, {pipeline_mode = #tpu.pipeline_mode<synchronous>, transform_indices = @transform_2, window_bounds = array<i64: 1, 4>}, {pipeline_mode = #tpu.pipeline_mode<synchronous>, transform_indices = @transform_3, window_bounds = array<i64: 1, 4>}, {pipeline_mode = #tpu.pipeline_mode<synchronous>, transform_indices = @transform_4, window_bounds = array<i64: 1, 1>}, {pipeline_mode = #tpu.pipeline_mode<synchronous>, transform_indices = @transform_5, window_bounds = array<i64: 36, 4>}, {pipeline_mode = #tpu.pipeline_mode<synchronous>, transform_indices = @transform_6, window_bounds = array<i64: 1, 4>}, {pipeline_mode = #tpu.pipeline_mode<synchronous>, transform_indices = @transform_7, window_bounds = array<i64: 1, 4>}, {transform_indices = @transform_8, window_bounds = array<i64: 1, 16, 16, 4>}]} {
    %c0 = arith.constant 0 : index
    %c0_0 = arith.constant 0 : index
    %c0_1 = arith.constant 0 : index
    %c0_2 = arith.constant 0 : index
    %0 = vector.load %arg1[%c0, %c0_0, %c0_1, %c0_2] : memref<1x16x16x4xf32, #tpu.memory_space<vmem>>, vector<1x16x16x4xf32>
    %1 = vector.shape_cast %0 : vector<1x16x16x4xf32> to vector<16x16x4xf32>
    %cst = arith.constant 0.000000e+00 : f32
    %2 = vector.broadcast %cst : f32 to vector<1x16x4xf32>
    %cst_3 = arith.constant 0.000000e+00 : f32
    %3 = vector.broadcast %cst_3 : f32 to vector<16x1x4xf32>
    %c0_4 = arith.constant 0 : index
    %c0_5 = arith.constant 0 : index
    %c0_6 = arith.constant 0 : index
    %4 = vector.load %arg10[%c0_4, %c0_5, %c0_6] : memref<16x16x36xf32, #tpu.memory_space<vmem>>, vector<1x16x4xf32>
    tpu.vector_store %arg10[%c0_4, %c0_5, %c0_6], %2 {strides = array<i32>} : memref<16x16x36xf32, #tpu.memory_space<vmem>>, vector<1x16x4xf32>,
    %c0_7 = arith.constant 0 : index
    %c0_8 = arith.constant 0 : index
    %c0_9 = arith.constant 0 : index
    %5 = vector.load %arg10[%c0_7, %c0_8, %c0_9] : memref<16x16x36xf32, #tpu.memory_space<vmem>>, vector<16x1x4xf32>
    tpu.vector_store %arg10[%c0_7, %c0_8, %c0_9], %3 {strides = array<i32>} : memref<16x16x36xf32, #tpu.memory_space<vmem>>, vector<16x1x4xf32>,
    %c0_10 = arith.constant 0 : index
    %c0_11 = arith.constant 0 : index
    %c4 = arith.constant 4 : index
    %6 = vector.load %arg10[%c0_10, %c0_11, %c4] : memref<16x16x36xf32, #tpu.memory_space<vmem>>, vector<1x16x4xf32>
    tpu.vector_store %arg10[%c0_10, %c0_11, %c4], %2 {strides = array<i32>} : memref<16x16x36xf32, #tpu.memory_space<vmem>>, vector<1x16x4xf32>,
    %c0_12 = arith.constant 0 : index
    %c0_13 = arith.constant 0 : index
    %c8 = arith.constant 8 : index
    %7 = vector.load %arg10[%c0_12, %c0_13, %c8] : memref<16x16x36xf32, #tpu.memory_space<vmem>>, vector<1x16x4xf32>
    tpu.vector_store %arg10[%c0_12, %c0_13, %c8], %2 {strides = array<i32>} : memref<16x16x36xf32, #tpu.memory_space<vmem>>, vector<1x16x4xf32>,
    %c0_14 = arith.constant 0 : index
    %c15 = arith.constant 15 : index
    %c8_15 = arith.constant 8 : index
    %8 = vector.load %arg10[%c0_14, %c15, %c8_15] : memref<16x16x36xf32, #tpu.memory_space<vmem>>, vector<16x1x4xf32>
    tpu.vector_store %arg10[%c0_14, %c15, %c8_15], %3 {strides = array<i32>} : memref<16x16x36xf32, #tpu.memory_space<vmem>>, vector<16x1x4xf32>,
    %c0_16 = arith.constant 0 : index
    %c0_17 = arith.constant 0 : index
    %c12 = arith.constant 12 : index
    %9 = vector.load %arg10[%c0_16, %c0_17, %c12] : memref<16x16x36xf32, #tpu.memory_space<vmem>>, vector<16x1x4xf32>
    tpu.vector_store %arg10[%c0_16, %c0_17, %c12], %3 {strides = array<i32>} : memref<16x16x36xf32, #tpu.memory_space<vmem>>, vector<16x1x4xf32>,
    %c0_18 = arith.constant 0 : index
    %c15_19 = arith.constant 15 : index
    %c20 = arith.constant 20 : index
    %10 = vector.load %arg10[%c0_18, %c15_19, %c20] : memref<16x16x36xf32, #tpu.memory_space<vmem>>, vector<16x1x4xf32>
    tpu.vector_store %arg10[%c0_18, %c15_19, %c20], %3 {strides = array<i32>} : memref<16x16x36xf32, #tpu.memory_space<vmem>>, vector<16x1x4xf32>,
    %c15_20 = arith.constant 15 : index
    %c0_21 = arith.constant 0 : index
    %c24 = arith.constant 24 : index
    %11 = vector.load %arg10[%c15_20, %c0_21, %c24] : memref<16x16x36xf32, #tpu.memory_space<vmem>>, vector<1x16x4xf32>
    tpu.vector_store %arg10[%c15_20, %c0_21, %c24], %2 {strides = array<i32>} : memref<16x16x36xf32, #tpu.memory_space<vmem>>, vector<1x16x4xf32>,
    %c0_22 = arith.constant 0 : index
    %c0_23 = arith.constant 0 : index
    %c24_24 = arith.constant 24 : index
    %12 = vector.load %arg10[%c0_22, %c0_23, %c24_24] : memref<16x16x36xf32, #tpu.memory_space<vmem>>, vector<16x1x4xf32>
    tpu.vector_store %arg10[%c0_22, %c0_23, %c24_24], %3 {strides = array<i32>} : memref<16x16x36xf32, #tpu.memory_space<vmem>>, vector<16x1x4xf32>,
    %c15_25 = arith.constant 15 : index
    %c0_26 = arith.constant 0 : index
    %c28 = arith.constant 28 : index
    %13 = vector.load %arg10[%c15_25, %c0_26, %c28] : memref<16x16x36xf32, #tpu.memory_space<vmem>>, vector<1x16x4xf32>
    tpu.vector_store %arg10[%c15_25, %c0_26, %c28], %2 {strides = array<i32>} : memref<16x16x36xf32, #tpu.memory_space<vmem>>, vector<1x16x4xf32>,
    %c15_27 = arith.constant 15 : index
    %c0_28 = arith.constant 0 : index
    %c32 = arith.constant 32 : index
    %14 = vector.load %arg10[%c15_27, %c0_28, %c32] : memref<16x16x36xf32, #tpu.memory_space<vmem>>, vector<1x16x4xf32>
    tpu.vector_store %arg10[%c15_27, %c0_28, %c32], %2 {strides = array<i32>} : memref<16x16x36xf32, #tpu.memory_space<vmem>>, vector<1x16x4xf32>,
    %c0_29 = arith.constant 0 : index
    %c15_30 = arith.constant 15 : index
    %c32_31 = arith.constant 32 : index
    %15 = vector.load %arg10[%c0_29, %c15_30, %c32_31] : memref<16x16x36xf32, #tpu.memory_space<vmem>>, vector<16x1x4xf32>
    tpu.vector_store %arg10[%c0_29, %c15_30, %c32_31], %3 {strides = array<i32>} : memref<16x16x36xf32, #tpu.memory_space<vmem>>, vector<16x1x4xf32>,
    %16 = vector.extract_strided_slice %1 {offsets = [0, 0, 0], sizes = [15, 15, 4], strides = [1, 1, 1]} : vector<16x16x4xf32> to vector<15x15x4xf32>
    %c1 = arith.constant 1 : index
    %c1_32 = arith.constant 1 : index
    %c0_33 = arith.constant 0 : index
    %17 = vector.load %arg10[%c1, %c1_32, %c0_33] : memref<16x16x36xf32, #tpu.memory_space<vmem>>, vector<15x15x4xf32>
    tpu.vector_store %arg10[%c1, %c1_32, %c0_33], %16 {strides = array<i32>} : memref<16x16x36xf32, #tpu.memory_space<vmem>>, vector<15x15x4xf32>,
    %18 = vector.extract_strided_slice %1 {offsets = [0, 0, 0], sizes = [15, 16, 4], strides = [1, 1, 1]} : vector<16x16x4xf32> to vector<15x16x4xf32>
    %c1_34 = arith.constant 1 : index
    %c0_35 = arith.constant 0 : index
    %c4_36 = arith.constant 4 : index
    %19 = vector.load %arg10[%c1_34, %c0_35, %c4_36] : memref<16x16x36xf32, #tpu.memory_space<vmem>>, vector<15x16x4xf32>
    tpu.vector_store %arg10[%c1_34, %c0_35, %c4_36], %18 {strides = array<i32>} : memref<16x16x36xf32, #tpu.memory_space<vmem>>, vector<15x16x4xf32>,
    %20 = vector.extract_strided_slice %1 {offsets = [0, 1, 0], sizes = [15, 15, 4], strides = [1, 1, 1]} : vector<16x16x4xf32> to vector<15x15x4xf32>
    %c1_37 = arith.constant 1 : index
    %c0_38 = arith.constant 0 : index
    %c8_39 = arith.constant 8 : index
    %21 = vector.load %arg10[%c1_37, %c0_38, %c8_39] : memref<16x16x36xf32, #tpu.memory_space<vmem>>, vector<15x15x4xf32>
    tpu.vector_store %arg10[%c1_37, %c0_38, %c8_39], %20 {strides = array<i32>} : memref<16x16x36xf32, #tpu.memory_space<vmem>>, vector<15x15x4xf32>,
    %22 = vector.extract_strided_slice %1 {offsets = [0, 0, 0], sizes = [16, 15, 4], strides = [1, 1, 1]} : vector<16x16x4xf32> to vector<16x15x4xf32>
    %c0_40 = arith.constant 0 : index
    %c1_41 = arith.constant 1 : index
    %c12_42 = arith.constant 12 : index
    %23 = vector.load %arg10[%c0_40, %c1_41, %c12_42] : memref<16x16x36xf32, #tpu.memory_space<vmem>>, vector<16x15x4xf32>
    tpu.vector_store %arg10[%c0_40, %c1_41, %c12_42], %22 {strides = array<i32>} : memref<16x16x36xf32, #tpu.memory_space<vmem>>, vector<16x15x4xf32>,
    %c0_43 = arith.constant 0 : index
    %c0_44 = arith.constant 0 : index
    %c16 = arith.constant 16 : index
    %24 = vector.load %arg10[%c0_43, %c0_44, %c16] : memref<16x16x36xf32, #tpu.memory_space<vmem>>, vector<16x16x4xf32>
    tpu.vector_store %arg10[%c0_43, %c0_44, %c16], %1 {strides = array<i32>} : memref<16x16x36xf32, #tpu.memory_space<vmem>>, vector<16x16x4xf32>,
    %25 = vector.extract_strided_slice %1 {offsets = [0, 1, 0], sizes = [16, 15, 4], strides = [1, 1, 1]} : vector<16x16x4xf32> to vector<16x15x4xf32>
    %c0_45 = arith.constant 0 : index
    %c0_46 = arith.constant 0 : index
    %c20_47 = arith.constant 20 : index
    %26 = vector.load %arg10[%c0_45, %c0_46, %c20_47] : memref<16x16x36xf32, #tpu.memory_space<vmem>>, vector<16x15x4xf32>
    tpu.vector_store %arg10[%c0_45, %c0_46, %c20_47], %25 {strides = array<i32>} : memref<16x16x36xf32, #tpu.memory_space<vmem>>, vector<16x15x4xf32>,
    %27 = vector.extract_strided_slice %1 {offsets = [1, 0, 0], sizes = [15, 15, 4], strides = [1, 1, 1]} : vector<16x16x4xf32> to vector<15x15x4xf32>
    %c0_48 = arith.constant 0 : index
    %c1_49 = arith.constant 1 : index
    %c24_50 = arith.constant 24 : index
    %28 = vector.load %arg10[%c0_48, %c1_49, %c24_50] : memref<16x16x36xf32, #tpu.memory_space<vmem>>, vector<15x15x4xf32>
    tpu.vector_store %arg10[%c0_48, %c1_49, %c24_50], %27 {strides = array<i32>} : memref<16x16x36xf32, #tpu.memory_space<vmem>>, vector<15x15x4xf32>,
    %29 = vector.extract_strided_slice %1 {offsets = [1, 0, 0], sizes = [15, 16, 4], strides = [1, 1, 1]} : vector<16x16x4xf32> to vector<15x16x4xf32>
    %c0_51 = arith.constant 0 : index
    %c0_52 = arith.constant 0 : index
    %c28_53 = arith.constant 28 : index
    %30 = vector.load %arg10[%c0_51, %c0_52, %c28_53] : memref<16x16x36xf32, #tpu.memory_space<vmem>>, vector<15x16x4xf32>
    tpu.vector_store %arg10[%c0_51, %c0_52, %c28_53], %29 {strides = array<i32>} : memref<16x16x36xf32, #tpu.memory_space<vmem>>, vector<15x16x4xf32>,
    %31 = vector.extract_strided_slice %1 {offsets = [1, 1, 0], sizes = [15, 15, 4], strides = [1, 1, 1]} : vector<16x16x4xf32> to vector<15x15x4xf32>
    %c0_54 = arith.constant 0 : index
    %c0_55 = arith.constant 0 : index
    %c32_56 = arith.constant 32 : index
    %32 = vector.load %arg10[%c0_54, %c0_55, %c32_56] : memref<16x16x36xf32, #tpu.memory_space<vmem>>, vector<15x15x4xf32>
    tpu.vector_store %arg10[%c0_54, %c0_55, %c32_56], %31 {strides = array<i32>} : memref<16x16x36xf32, #tpu.memory_space<vmem>>, vector<15x15x4xf32>,
    %c0_57 = arith.constant 0 : index
    %c0_58 = arith.constant 0 : index
    %c0_59 = arith.constant 0 : index
    %33 = vector.load %arg10[%c0_57, %c0_58, %c0_59] : memref<16x16x36xf32, #tpu.memory_space<vmem>>, vector<16x16x36xf32>
    %34 = vector.shape_cast %33 : vector<16x16x36xf32> to vector<256x36xf32>
    %35 = arith.truncf %34 : vector<256x36xf32> to vector<256x36xbf16>
    %c0_60 = arith.constant 0 : index
    %c0_61 = arith.constant 0 : index
    %36 = vector.load %arg2[%c0_60, %c0_61] : memref<36x4xbf16, #tpu.memory_space<vmem>>, vector<36x4xbf16>
    %cst_62 = arith.constant dense<0.000000e+00> : vector<256x4xf32>
    %37 = tpu.matmul %35, %36, %cst_62 {dimension_numbers = #tpu.dot_dimension_numbers<[1], [0], [0], [1], [0, 0, 1, 1], [], []>} : vector<256x36xbf16>, vector<36x4xbf16>, vector<256x4xf32> -> vector<256x4xf32>
    %c0_63 = arith.constant 0 : index
    %c0_64 = arith.constant 0 : index
    %38 = vector.load %arg3[%c0_63, %c0_64] : memref<1x4xf32, #tpu.memory_space<vmem>>, vector<1x4xf32>
    %39 = vector.broadcast %38 : vector<1x4xf32> to vector<256x4xf32>
    %40 = arith.mulf %37, %39 : vector<256x4xf32>
    %c0_65 = arith.constant 0 : index
    %c0_66 = arith.constant 0 : index
    %41 = vector.load %arg4[%c0_65, %c0_66] : memref<1x4xf32, #tpu.memory_space<vmem>>, vector<1x4xf32>
    %42 = vector.broadcast %41 : vector<1x4xf32> to vector<256x4xf32>
    %43 = arith.addf %40, %42 : vector<256x4xf32>
    %c0_67 = arith.constant 0 : index
    %c0_68 = arith.constant 0 : index
    %44 = vector.load %arg5[%c0_67, %c0_68] : memref<1x1xf32, #tpu.memory_space<vmem>>, vector<1x1xf32>
    %45 = vector.extract %44[0, 0] : f32 from vector<1x1xf32>
    %cst_69 = arith.constant 0.000000e+00 : f32
    %46 = vector.broadcast %cst_69 : f32 to vector<256x4xf32>
    %47 = arith.cmpf ogt, %43, %46 : vector<256x4xf32>
    %48 = vector.broadcast %45 : f32 to vector<256x4xf32>
    %49 = arith.mulf %48, %43 : vector<256x4xf32>
    %50 = arith.select %47, %43, %49 : vector<256x4xi1>, vector<256x4xf32>
    %51 = vector.shape_cast %50 : vector<256x4xf32> to vector<16x16x4xf32>
    %52 = vector.extract_strided_slice %51 {offsets = [0, 0, 0], sizes = [15, 15, 4], strides = [1, 1, 1]} : vector<16x16x4xf32> to vector<15x15x4xf32>
    %c1_70 = arith.constant 1 : index
    %c1_71 = arith.constant 1 : index
    %c0_72 = arith.constant 0 : index
    %53 = vector.load %arg10[%c1_70, %c1_71, %c0_72] : memref<16x16x36xf32, #tpu.memory_space<vmem>>, vector<15x15x4xf32>
    tpu.vector_store %arg10[%c1_70, %c1_71, %c0_72], %52 {strides = array<i32>} : memref<16x16x36xf32, #tpu.memory_space<vmem>>, vector<15x15x4xf32>,
    %54 = vector.extract_strided_slice %51 {offsets = [0, 0, 0], sizes = [15, 16, 4], strides = [1, 1, 1]} : vector<16x16x4xf32> to vector<15x16x4xf32>
    %c1_73 = arith.constant 1 : index
    %c0_74 = arith.constant 0 : index
    %c4_75 = arith.constant 4 : index
    %55 = vector.load %arg10[%c1_73, %c0_74, %c4_75] : memref<16x16x36xf32, #tpu.memory_space<vmem>>, vector<15x16x4xf32>
    tpu.vector_store %arg10[%c1_73, %c0_74, %c4_75], %54 {strides = array<i32>} : memref<16x16x36xf32, #tpu.memory_space<vmem>>, vector<15x16x4xf32>,
    %56 = vector.extract_strided_slice %51 {offsets = [0, 1, 0], sizes = [15, 15, 4], strides = [1, 1, 1]} : vector<16x16x4xf32> to vector<15x15x4xf32>
    %c1_76 = arith.constant 1 : index
    %c0_77 = arith.constant 0 : index
    %c8_78 = arith.constant 8 : index
    %57 = vector.load %arg10[%c1_76, %c0_77, %c8_78] : memref<16x16x36xf32, #tpu.memory_space<vmem>>, vector<15x15x4xf32>
    tpu.vector_store %arg10[%c1_76, %c0_77, %c8_78], %56 {strides = array<i32>} : memref<16x16x36xf32, #tpu.memory_space<vmem>>, vector<15x15x4xf32>,
    %58 = vector.extract_strided_slice %51 {offsets = [0, 0, 0], sizes = [16, 15, 4], strides = [1, 1, 1]} : vector<16x16x4xf32> to vector<16x15x4xf32>
    %c0_79 = arith.constant 0 : index
    %c1_80 = arith.constant 1 : index
    %c12_81 = arith.constant 12 : index
    %59 = vector.load %arg10[%c0_79, %c1_80, %c12_81] : memref<16x16x36xf32, #tpu.memory_space<vmem>>, vector<16x15x4xf32>
    tpu.vector_store %arg10[%c0_79, %c1_80, %c12_81], %58 {strides = array<i32>} : memref<16x16x36xf32, #tpu.memory_space<vmem>>, vector<16x15x4xf32>,
    %c0_82 = arith.constant 0 : index
    %c0_83 = arith.constant 0 : index
    %c16_84 = arith.constant 16 : index
    %60 = vector.load %arg10[%c0_82, %c0_83, %c16_84] : memref<16x16x36xf32, #tpu.memory_space<vmem>>, vector<16x16x4xf32>
    tpu.vector_store %arg10[%c0_82, %c0_83, %c16_84], %51 {strides = array<i32>} : memref<16x16x36xf32, #tpu.memory_space<vmem>>, vector<16x16x4xf32>,
    %61 = vector.extract_strided_slice %51 {offsets = [0, 1, 0], sizes = [16, 15, 4], strides = [1, 1, 1]} : vector<16x16x4xf32> to vector<16x15x4xf32>
    %c0_85 = arith.constant 0 : index
    %c0_86 = arith.constant 0 : index
    %c20_87 = arith.constant 20 : index
    %62 = vector.load %arg10[%c0_85, %c0_86, %c20_87] : memref<16x16x36xf32, #tpu.memory_space<vmem>>, vector<16x15x4xf32>
    tpu.vector_store %arg10[%c0_85, %c0_86, %c20_87], %61 {strides = array<i32>} : memref<16x16x36xf32, #tpu.memory_space<vmem>>, vector<16x15x4xf32>,
    %63 = vector.extract_strided_slice %51 {offsets = [1, 0, 0], sizes = [15, 15, 4], strides = [1, 1, 1]} : vector<16x16x4xf32> to vector<15x15x4xf32>
    %c0_88 = arith.constant 0 : index
    %c1_89 = arith.constant 1 : index
    %c24_90 = arith.constant 24 : index
    %64 = vector.load %arg10[%c0_88, %c1_89, %c24_90] : memref<16x16x36xf32, #tpu.memory_space<vmem>>, vector<15x15x4xf32>
    tpu.vector_store %arg10[%c0_88, %c1_89, %c24_90], %63 {strides = array<i32>} : memref<16x16x36xf32, #tpu.memory_space<vmem>>, vector<15x15x4xf32>,
    %65 = vector.extract_strided_slice %51 {offsets = [1, 0, 0], sizes = [15, 16, 4], strides = [1, 1, 1]} : vector<16x16x4xf32> to vector<15x16x4xf32>
    %c0_91 = arith.constant 0 : index
    %c0_92 = arith.constant 0 : index
    %c28_93 = arith.constant 28 : index
    %66 = vector.load %arg10[%c0_91, %c0_92, %c28_93] : memref<16x16x36xf32, #tpu.memory_space<vmem>>, vector<15x16x4xf32>
    tpu.vector_store %arg10[%c0_91, %c0_92, %c28_93], %65 {strides = array<i32>} : memref<16x16x36xf32, #tpu.memory_space<vmem>>, vector<15x16x4xf32>,
    %67 = vector.extract_strided_slice %51 {offsets = [1, 1, 0], sizes = [15, 15, 4], strides = [1, 1, 1]} : vector<16x16x4xf32> to vector<15x15x4xf32>
    %c0_94 = arith.constant 0 : index
    %c0_95 = arith.constant 0 : index
    %c32_96 = arith.constant 32 : index
    %68 = vector.load %arg10[%c0_94, %c0_95, %c32_96] : memref<16x16x36xf32, #tpu.memory_space<vmem>>, vector<15x15x4xf32>
    tpu.vector_store %arg10[%c0_94, %c0_95, %c32_96], %67 {strides = array<i32>} : memref<16x16x36xf32, #tpu.memory_space<vmem>>, vector<15x15x4xf32>,
    %c0_97 = arith.constant 0 : index
    %c0_98 = arith.constant 0 : index
    %c0_99 = arith.constant 0 : index
    %69 = vector.load %arg10[%c0_97, %c0_98, %c0_99] : memref<16x16x36xf32, #tpu.memory_space<vmem>>, vector<16x16x36xf32>
    %70 = vector.shape_cast %69 : vector<16x16x36xf32> to vector<256x36xf32>
    %71 = arith.truncf %70 : vector<256x36xf32> to vector<256x36xbf16>
    %c0_100 = arith.constant 0 : index
    %c0_101 = arith.constant 0 : index
    %72 = vector.load %arg6[%c0_100, %c0_101] : memref<36x4xbf16, #tpu.memory_space<vmem>>, vector<36x4xbf16>
    %cst_102 = arith.constant dense<0.000000e+00> : vector<256x4xf32>
    %73 = tpu.matmul %71, %72, %cst_102 {dimension_numbers = #tpu.dot_dimension_numbers<[1], [0], [0], [1], [0, 0, 1, 1], [], []>} : vector<256x36xbf16>, vector<36x4xbf16>, vector<256x4xf32> -> vector<256x4xf32>
    %c0_103 = arith.constant 0 : index
    %c0_104 = arith.constant 0 : index
    %74 = vector.load %arg7[%c0_103, %c0_104] : memref<1x4xf32, #tpu.memory_space<vmem>>, vector<1x4xf32>
    %75 = vector.broadcast %74 : vector<1x4xf32> to vector<256x4xf32>
    %76 = arith.mulf %73, %75 : vector<256x4xf32>
    %c0_105 = arith.constant 0 : index
    %c0_106 = arith.constant 0 : index
    %77 = vector.load %arg8[%c0_105, %c0_106] : memref<1x4xf32, #tpu.memory_space<vmem>>, vector<1x4xf32>
    %78 = vector.broadcast %77 : vector<1x4xf32> to vector<256x4xf32>
    %79 = arith.addf %76, %78 : vector<256x4xf32>
    %80 = vector.shape_cast %1 : vector<16x16x4xf32> to vector<256x4xf32>
    %81 = arith.addf %80, %79 : vector<256x4xf32>
    %82 = vector.shape_cast %81 : vector<256x4xf32> to vector<1x16x16x4xf32>
    %c0_107 = arith.constant 0 : index
    %c0_108 = arith.constant 0 : index
    %c0_109 = arith.constant 0 : index
    %c0_110 = arith.constant 0 : index
    %83 = vector.load %arg9[%c0_107, %c0_108, %c0_109, %c0_110] : memref<1x16x16x4xf32, #tpu.memory_space<vmem>>, vector<1x16x16x4xf32>
    tpu.vector_store %arg9[%c0_107, %c0_108, %c0_109, %c0_110], %82 {strides = array<i32>} : memref<1x16x16x4xf32, #tpu.memory_space<vmem>>, vector<1x16x16x4xf32>,
    return
  }
  func.func @transform_0(%arg0: i32) -> (i32, i32, i32, i32) {
    %c0_i32 = arith.constant 0 : i32
    %c0_i32_0 = arith.constant 0 : i32
    %c0_i32_1 = arith.constant 0 : i32
    %c0_i32_2 = arith.constant 0 : i32
    return %arg0, %c0_i32, %c0_i32_0, %c0_i32_1 : i32, i32, i32, i32
  }
  func.func @transform_1(%arg0: i32) -> (i32, i32) {
    %c0_i32 = arith.constant 0 : i32
    %c0_i32_0 = arith.constant 0 : i32
    %c0_i32_1 = arith.constant 0 : i32
    return %c0_i32, %c0_i32_0 : i32, i32
  }
  func.func @transform_2(%arg0: i32) -> (i32, i32) {
    %c0_i32 = arith.constant 0 : i32
    %c0_i32_0 = arith.constant 0 : i32
    %c0_i32_1 = arith.constant 0 : i32
    return %c0_i32, %c0_i32_0 : i32, i32
  }
  func.func @transform_3(%arg0: i32) -> (i32, i32) {
    %c0_i32 = arith.constant 0 : i32
    %c0_i32_0 = arith.constant 0 : i32
    %c0_i32_1 = arith.constant 0 : i32
    return %c0_i32, %c0_i32_0 : i32, i32
  }
  func.func @transform_4(%arg0: i32) -> (i32, i32) {
    %c0_i32 = arith.constant 0 : i32
    %c0_i32_0 = arith.constant 0 : i32
    %c0_i32_1 = arith.constant 0 : i32
    return %c0_i32, %c0_i32_0 : i32, i32
  }
  func.func @transform_5(%arg0: i32) -> (i32, i32) {
    %c0_i32 = arith.constant 0 : i32
    %c0_i32_0 = arith.constant 0 : i32
    %c0_i32_1 = arith.constant 0 : i32
    return %c0_i32, %c0_i32_0 : i32, i32
  }
  func.func @transform_6(%arg0: i32) -> (i32, i32) {
    %c0_i32 = arith.constant 0 : i32
    %c0_i32_0 = arith.constant 0 : i32
    %c0_i32_1 = arith.constant 0 : i32
    return %c0_i32, %c0_i32_0 : i32, i32
  }
  func.func @transform_7(%arg0: i32) -> (i32, i32) {
    %c0_i32 = arith.constant 0 : i32
    %c0_i32_0 = arith.constant 0 : i32
    %c0_i32_1 = arith.constant 0 : i32
    return %c0_i32, %c0_i32_0 : i32, i32
  }
  func.func @transform_8(%arg0: i32) -> (i32, i32, i32, i32) {
    %c0_i32 = arith.constant 0 : i32
    %c0_i32_0 = arith.constant 0 : i32
    %c0_i32_1 = arith.constant 0 : i32
    %c0_i32_2 = arith.constant 0 : i32
    return %arg0, %c0_i32, %c0_i32_0, %c0_i32_1 : i32, i32, i32, i32
  }
}

</mosaic_0001>

<bundles_post_ra>
// kernel: residual_block_pallas.1
= control target key start
LH: loop header
LB: loop body
LE: loop exit
PB: predicated region body
PF: predicated region fallthrough
CT: control target
= control target key end

     0   :  { %s3505_s29 = smov 0   ;;  %s5844_s0 = inlined_call_operand.vmem [shape: f32[2,16,16,4], index: 0, kind: input, shape index: {}]   ;;  %s5845_s1 = inlined_call_operand.vmem [shape: bf16[36,4], index: 1, kind: input, shape index: {}]   ;;  %s5846_s2 = inlined_call_operand.vmem [shape: f32[1,4], index: 2, kind: input, shape index: {}]   ;;  %s5847_s3 = inlined_call_operand.vmem [shape: f32[1,4], index: 3, kind: input, shape index: {}]   ;;  %s5848_s4 = inlined_call_operand.<no memory space> [shape: f32[1,1], index: 4, kind: input, shape index: {}]   ;;  %s5849_s5 = inlined_call_operand.vmem [shape: bf16[36,4], index: 5, kind: input, shape index: {}]   ;;  %s5850_s6 = inlined_call_operand.vmem [shape: f32[1,4], index: 6, kind: input, shape index: {}]   ;;  %s5851_s7 = inlined_call_operand.vmem [shape: f32[1,4], index: 7, kind: input, shape index: {}]   ;;  %s5852_s8 = inlined_call_operand.vmem [shape: f32[2,16,16,4], index: 8, kind: output, shape index: {}]  }
   0x1   :  { %v13_v0 = vstv %s5848_s4 }
   0x2   :  { %14 = vst [vmem:[#allocation3] sm:$0x1] %v13_v0 }
   0x3 LB: > { %s3344_s30 = sadd.s32 4294967295, %s3446_s29   ;;  %p3348_p0 = scmp.ge.s32.totalorder %s3446_s29, 1  ;;  %s3446_s29 = sphi %s3505_s29, %s20_s29  }
   0x4   : > { %p264_p1 = scmp.lt.s32.totalorder %s3446_s29, 3 }
   0x6   : > { %p265_p2 = pnand %p3348_p0, %p264_p1 }
   0x8   : > { %268 = sbr.rel (%p265_p2) target bundleno = 1872 (0x750), region = 52 }
   0xd   : > { %p298_p3 = scmp.lt.s32.totalorder %s3344_s30, 1  ;;  %s3448_s12 = smov 4   ;;  %vm344_vm0 = vcmask 24576   ;;  %v3449_v25 = vmov 0.0   ;;  %vm384_vm1 = vcmask 122976   ;;  %vm422_vm2 = vcmask 221376  }
   0xe   : > { %348 = vst.msk [vmem:[#allocation2 + $0x30] sm:$0x1] %vm344_vm0, %v3449_v25  ;;  %vm341_vm3 = vcmask 31744   ;;  %s3450_s13 = smov 8   ;;  %vm361_vm4 = vcmask 64544   ;;  %vm367_vm5 = vcmask 90176  }
   0xf   : > { %s5923_s30 = smov (!%p298_p3, %s3344_s30), 1  ;;  %388 = vst.msk [vmem:[#allocation2 + $0x30] sm:$0x1] %vm384_vm1, %v3449_v25  ;;  %vm401_vm6 = vcmask 188576   ;;  %vm445_vm7 = vcmask 286976   ;;  %vm464_vm8 = vcmask 30720  }
  0x10   : > { %s3403_s4 = sshll.u32 %s5923_s30, 8  ;;  %426 = vst.msk [vmem:[#allocation2 + $0x30] sm:$0x1] %vm422_vm2, %v3449_v25  ;;  %s3451_s14 = smov 12   ;;  %vm419_vm9 = vcmask 228544   ;;  %vm439_vm10 = vcmask 261344  }
  0x11   : > { %s3521_s11 = scalar_lea.vmem %s5844_s0, %s3403_s4  ;;  %342 = vst.msk [vmem:[#allocation2] sm:$0xff] %vm341_vm3, %v3449_v25  ;;  %vm5855_vm11 = vcmask 294144   ;;  %vm734_vm12 = vcmask 97345   ;;  %vm364_vm13 = vcmask 97344   ;;  %s3452_s15 = smov 16   ;;  %vm863_vm14 = vcmask 130144  }
  0x12   : > { %v3524_v1 = vld [vmem:[%s3521_s11 + $0x20] sm:$0xff]  ;;  %v3527_v2 = vld [vmem:[%s3521_s11 + $0x10] sm:$0xff]  ;;  %v3539_v4 = vld [vmem:[%s3521_s11 + $0x28] sm:$0xff]  ;;  %343 = vst.msk [vmem:[#allocation2 + $0x8] sm:$0xff] %vm341_vm3, %v3449_v25  ;;  %vm865_vm15 = vcmask 129120   ;;  %s3453_s16 = smov 20  }
  0x13   : > { %v3530_v3 = vld [vmem:[%s3521_s11] sm:$0xff]  ;;  %532 = vrot.lane.b32.xlu2 %v3524_v1, %s3448_s12  ;;  %528 = vrot.lane.b32.xlu1 %v3527_v2, %s3448_s12  ;;  %v3542_v5 = vld [vmem:[%s3521_s11 + $0x18] sm:$0xff]  ;;  %468 = vst.msk [vmem:[#allocation2 + $0x31] sm:$0xff] %vm341_vm3, %v3524_v1  ;;  %s3454_s17 = smov 24   ;;  %s3455_s18 = smov 28  }
  0x14   : > { %524 = vrot.lane.b32.xlu0 %v3530_v3, %s3448_s12  ;;  %v3545_v6 = vld [vmem:[%s3521_s11 + $0x8] sm:$0xff]  ;;  %v3554_v7 = vld [vmem:[%s3521_s11 + $0x40] sm:$0xff]  ;;  %v3557_v8 = vld [vmem:[%s3521_s11 + $0x38] sm:$0xff]  ;;  %346 = vst.msk [vmem:[#allocation2 + $0x10] sm:$0x1] %vm344_vm0, %v3449_v25  ;;  %s3456_s19 = smov 32  }
  0x15   : > { %v3560_v9 = vld [vmem:[%s3521_s11 + $0x30] sm:$0xff]  ;;  %v3569_v10 = vld [vmem:[%s3521_s11 + $0x58] sm:$0xff]  ;;  %v3575_v12 = vld [vmem:[%s3521_s11 + $0x48] sm:$0xff]  ;;  %347 = vst.msk [vmem:[#allocation2 + $0x20] sm:$0x1] %vm344_vm0, %v3449_v25 }
  0x16   : > { %5864 = vst [vmem:[#allocation4_spill] sm:$0xff] %v3569_v10  ;;  %v3572_v11 = vld [vmem:[%s3521_s11 + $0x50] sm:$0xff]  ;;  %v3587_v14 = vld [vmem:[%s3521_s11 + $0x68] sm:$0xff]  ;;  %v3590_v15 = vld [vmem:[%s3521_s11 + $0x60] sm:$0xff] }
  0x17   : > { %5865 = vst [vmem:[#allocation5_spill] sm:$0xff] %v3572_v11  ;;  %v3584_v13 = vld [vmem:[%s3521_s11 + $0x70] sm:$0xff]  ;;  %v3599_v16 = vld [vmem:[%s3521_s11 + $0x88] sm:$0xff]  ;;  %v3602_v17 = vld [vmem:[%s3521_s11 + $0x80] sm:$0xff] }
  0x18   : > { %5866 = vst [vmem:[#allocation6_spill] sm:$0xff] %v3584_v13  ;;  %v3605_v18 = vld [vmem:[%s3521_s11 + $0x78] sm:$0xff]  ;;  %v3614_v19 = vld [vmem:[%s3521_s11 + $0xa0] sm:$0xff]  ;;  %v3620_v21 = vld [vmem:[%s3521_s11 + $0x90] sm:$0xff] }
  0x19   : > { %5867 = vst [vmem:[#allocation7_spill] sm:$0xff] %v3587_v14  ;;  %v3617_v20 = vld [vmem:[%s3521_s11 + $0x98] sm:$0xff]  ;;  %v3632_v23 = vld [vmem:[%s3521_s11 + $0xb0] sm:$0xff]  ;;  %v3635_v24 = vld [vmem:[%s3521_s11 + $0xa8] sm:$0xff] }
  0x1a   : > { %5868 = vst [vmem:[#allocation8_spill] sm:$0xff] %v3590_v15  ;;  %v3629_v22 = vld [vmem:[%s3521_s11 + $0xb8] sm:$0xff]  ;;  %v3650_v26 = vld [vmem:[%s3521_s11 + $0xd0] sm:$0xff]  ;;  %v3653_v27 = vld [vmem:[%s3521_s11 + $0xc8] sm:$0xff] }
  0x1b   : > { %534 = vrot.lane.b32.xlu2 %v3539_v4, %s3448_s12  ;;  %530 = vrot.lane.b32.xlu1 %v3542_v5, %s3448_s12  ;;  %5869 = vst [vmem:[#allocation9_spill] sm:$0xff] %v3605_v18  ;;  %v3658_v28 = vld [vmem:[%s3521_s11 + $0xc0] sm:$0xff]  ;;  %v3681_v29 = vld [vmem:[%s3521_s11 + $0xe8] sm:$0xff] }
  0x1c   : > { %526 = vrot.lane.b32.xlu0 %v3545_v6, %s3448_s12  ;;  %349 = vst.msk [vmem:[#allocation2 + $0x40] sm:$0x1] %vm344_vm0, %v3449_v25  ;;  %v3684_v30 = vld [vmem:[%s3521_s11 + $0xe0] sm:$0xff]  ;;  %v3689_v31 = vld [vmem:[%s3521_s11 + $0xd8] sm:$0xff] }
  0x1d   : > { %350 = vst.msk [vmem:[#allocation2 + $0x50] sm:$0x1] %vm344_vm0, %v3449_v25 }
  0x1e   : > { %351 = vst.msk [vmem:[#allocation2 + $0x60] sm:$0x1] %vm344_vm0, %v3449_v25 }
  0x1f   : > { %5870 = vst [vmem:[#allocation10_spill] sm:$0xff] %v3681_v29 }
  0x20   : > { %5871 = vst [vmem:[#allocation11_spill] sm:$0xff] %v3684_v30 }
  0x21   : > { %352 = vst.msk [vmem:[#allocation2 + $0x70] sm:$0x1] %vm344_vm0, %v3449_v25 }
  0x22   : > { %353 = vst.msk [vmem:[#allocation2 + $0x80] sm:$0x1] %vm344_vm0, %v3449_v25 }
  0x23   : > { %540 = vrot.lane.b32.xlu2 %v3554_v7, %s3448_s12  ;;  %538 = vrot.lane.b32.xlu1 %v3557_v8, %s3448_s12  ;;  %354 = vst.msk [vmem:[#allocation2 + $0x90] sm:$0x1] %vm344_vm0, %v3449_v25 }
  0x24   : > { %536 = vrot.lane.b32.xlu0 %v3560_v9, %s3448_s12  ;;  %355 = vst.msk [vmem:[#allocation2 + $0xa0] sm:$0x1] %vm344_vm0, %v3449_v25 }
  0x25   : > { %356 = vst.msk [vmem:[#allocation2 + $0xb0] sm:$0x1] %vm344_vm0, %v3449_v25 }
  0x26   : > { %357 = vst.msk [vmem:[#allocation2 + $0xc0] sm:$0x1] %vm344_vm0, %v3449_v25 }
  0x27   : > { %358 = vst.msk [vmem:[#allocation2 + $0xd0] sm:$0x1] %vm344_vm0, %v3449_v25 }
  0x28   : > { %359 = vst.msk [vmem:[#allocation2 + $0xe0] sm:$0x1] %vm344_vm0, %v3449_v25 }
  0x29   : > { %360 = vst.msk [vmem:[#allocation2 + $0xf0] sm:$0x1] %vm344_vm0, %v3449_v25 }
  0x2a   : > { %463 = vst.msk [vmem:[#allocation2 + $0x11] sm:$0xff] %vm341_vm3, %v3530_v3 }
  0x2b   : > { %546 = vrot.lane.b32.xlu2 %v3569_v10, %s3448_s12  ;;  %544 = vrot.lane.b32.xlu1 %v3572_v11, %s3448_s12  ;;  %466 = vst.msk [vmem:[#allocation2 + $0x21] sm:$0xff] %vm341_vm3, %v3527_v2 }
  0x2c   : > { %542 = vrot.lane.b32.xlu0 %v3575_v12, %s3448_s12  ;;  %470 = vst.msk [vmem:[#allocation2 + $0x41] sm:$0xff] %vm341_vm3, %v3560_v9 }
  0x2d   : > { %472 = vst.msk [vmem:[#allocation2 + $0x51] sm:$0xff] %vm341_vm3, %v3554_v7 }
  0x2e   : > { %474 = vst.msk [vmem:[#allocation2 + $0x61] sm:$0xff] %vm341_vm3, %v3572_v11 }
  0x2f   : > { %476 = vst.msk [vmem:[#allocation2 + $0x71] sm:$0xff] %vm341_vm3, %v3590_v15 }
  0x30   : > { %478 = vst.msk [vmem:[#allocation2 + $0x81] sm:$0xff] %vm341_vm3, %v3584_v13 }
  0x31   : > { %480 = vst.msk [vmem:[#allocation2 + $0x91] sm:$0xff] %vm341_vm3, %v3602_v17 }
  0x32   : > { %482 = vst.msk [vmem:[#allocation2 + $0xa1] sm:$0xff] %vm341_vm3, %v3620_v21 }
  0x33   : > { %552 = vrot.lane.b32.xlu2 %v3584_v13, %s3448_s12  ;;  %550 = vrot.lane.b32.xlu1 %v3587_v14, %s3448_s12  ;;  %484 = vst.msk [vmem:[#allocation2 + $0xb1] sm:$0xff] %vm341_vm3, %v3614_v19 }
  0x34   : > { %548 = vrot.lane.b32.xlu0 %v3590_v15, %s3448_s12  ;;  %486 = vst.msk [vmem:[#allocation2 + $0xc1] sm:$0xff] %vm341_vm3, %v3632_v23 }
  0x35   : > { %488 = vst.msk [vmem:[#allocation2 + $0xd1] sm:$0xff] %vm341_vm3, %v3658_v28 }
  0x36   : > { %490 = vst.msk [vmem:[#allocation2 + $0xe1] sm:$0xff] %vm341_vm3, %v3650_v26 }
  0x37   : > { %345 = vst.msk [vmem:[#allocation2] sm:$0x1] %vm344_vm0, %v3449_v25  ;;  %vm993_vm0 = vcmask 162944  }
  0x38   : > { %363 = vst.msk [vmem:[#allocation2 + $0x8] sm:$0xff] %vm361_vm4, %v3449_v25 }
  0x39   : > { %386 = vst.msk [vmem:[#allocation2 + $0x10] sm:$0x1] %vm384_vm1, %v3449_v25 }
  0x3a   : > { %387 = vst.msk [vmem:[#allocation2 + $0x20] sm:$0x1] %vm384_vm1, %v3449_v25 }
  0x3b   : > { %558 = vrot.lane.b32.xlu2 %v3599_v16, %s3448_s12  ;;  %556 = vrot.lane.b32.xlu1 %v3602_v17, %s3448_s12  ;;  %389 = vst.msk [vmem:[#allocation2 + $0x40] sm:$0x1] %vm384_vm1, %v3449_v25 }
  0x3c   : > { %554 = vrot.lane.b32.xlu0 %v3605_v18, %s3448_s12  ;;  %390 = vst.msk [vmem:[#allocation2 + $0x50] sm:$0x1] %vm384_vm1, %v3449_v25 }
  0x3d   : > { %391 = vst.msk [vmem:[#allocation2 + $0x60] sm:$0x1] %vm384_vm1, %v3449_v25 }
  0x3e   : > { %392 = vst.msk [vmem:[#allocation2 + $0x70] sm:$0x1] %vm384_vm1, %v3449_v25 }
  0x3f   : > { %393 = vst.msk [vmem:[#allocation2 + $0x80] sm:$0x1] %vm384_vm1, %v3449_v25 }
  0x40   : > { %394 = vst.msk [vmem:[#allocation2 + $0x90] sm:$0x1] %vm384_vm1, %v3449_v25 }
  0x41   : > { %395 = vst.msk [vmem:[#allocation2 + $0xa0] sm:$0x1] %vm384_vm1, %v3449_v25 }
  0x42   : > { %396 = vst.msk [vmem:[#allocation2 + $0xb0] sm:$0x1] %vm384_vm1, %v3449_v25 }
  0x43   : > { %564 = vrot.lane.b32.xlu2 %v3614_v19, %s3448_s12  ;;  %562 = vrot.lane.b32.xlu1 %v3617_v20, %s3448_s12  ;;  %397 = vst.msk [vmem:[#allocation2 + $0xc0] sm:$0x1] %vm384_vm1, %v3449_v25 }
  0x44   : > { %560 = vrot.lane.b32.xlu0 %v3620_v21, %s3448_s12  ;;  %398 = vst.msk [vmem:[#allocation2 + $0xd0] sm:$0x1] %vm384_vm1, %v3449_v25 }
  0x45   : > { %399 = vst.msk [vmem:[#allocation2 + $0xe0] sm:$0x1] %vm384_vm1, %v3449_v25 }
  0x46   : > { %400 = vst.msk [vmem:[#allocation2 + $0xf0] sm:$0x1] %vm384_vm1, %v3449_v25 }
  0x47   : > { %362 = vst.msk [vmem:[#allocation2] sm:$0xff] %vm361_vm4, %v3449_v25 }
  0x48   : > { %424 = vst.msk [vmem:[#allocation2 + $0x10] sm:$0x1] %vm422_vm2, %v3449_v25 }
  0x49   : > { %425 = vst.msk [vmem:[#allocation2 + $0x20] sm:$0x1] %vm422_vm2, %v3449_v25 }
  0x4a   : > { %427 = vst.msk [vmem:[#allocation2 + $0x40] sm:$0x1] %vm422_vm2, %v3449_v25 }
  0x4b   : > { %570 = vrot.lane.b32.xlu2 %v3629_v22, %s3448_s12  ;;  %568 = vrot.lane.b32.xlu1 %v3632_v23, %s3448_s12  ;;  %428 = vst.msk [vmem:[#allocation2 + $0x50] sm:$0x1] %vm422_vm2, %v3449_v25 }
  0x4c   : > { %566 = vrot.lane.b32.xlu0 %v3635_v24, %s3448_s12  ;;  %429 = vst.msk [vmem:[#allocation2 + $0x60] sm:$0x1] %vm422_vm2, %v3449_v25 }
  0x4d   : > { %430 = vst.msk [vmem:[#allocation2 + $0x70] sm:$0x1] %vm422_vm2, %v3449_v25 }
  0x4e   : > { %431 = vst.msk [vmem:[#allocation2 + $0x80] sm:$0x1] %vm422_vm2, %v3449_v25 }
  0x4f   : > { %432 = vst.msk [vmem:[#allocation2 + $0x90] sm:$0x1] %vm422_vm2, %v3449_v25 }
  0x50   : > { %433 = vst.msk [vmem:[#allocation2 + $0xa0] sm:$0x1] %vm422_vm2, %v3449_v25 }
  0x51   : > { %434 = vst.msk [vmem:[#allocation2 + $0xb0] sm:$0x1] %vm422_vm2, %v3449_v25 }
  0x52   : > { %435 = vst.msk [vmem:[#allocation2 + $0xc0] sm:$0x1] %vm422_vm2, %v3449_v25 }
  0x53   : > { %576 = vrot.lane.b32.xlu2 %v3650_v26, %s3448_s12  ;;  %574 = vrot.lane.b32.xlu1 %v3653_v27, %s3448_s12  ;;  %436 = vst.msk [vmem:[#allocation2 + $0xd0] sm:$0x1] %vm422_vm2, %v3449_v25 }
  0x54   : > { %572 = vrot.lane.b32.xlu0 %v3658_v28, %s3448_s12  ;;  %437 = vst.msk [vmem:[#allocation2 + $0xe0] sm:$0x1] %vm422_vm2, %v3449_v25 }
  0x55   : > { %371 = vst.msk [vmem:[#allocation2 + $0x3f] sm:$0x1] %vm367_vm5, %v3449_v25 }
  0x56   : > { %405 = vst.msk [vmem:[#allocation2 + $0x3f] sm:$0x1] %vm401_vm6, %v3449_v25 }
  0x57   : > { %449 = vst.msk [vmem:[#allocation2 + $0x3f] sm:$0x1] %vm445_vm7, %v3449_v25 }
  0x58   : > { %469 = vst.msk [vmem:[#allocation2 + $0x39] sm:$0x7f] %vm464_vm8, %v3539_v4 }
  0x59   : > { %369 = vst.msk [vmem:[#allocation2 + $0x1f] sm:$0x1] %vm367_vm5, %v3449_v25 }
  0x5a   : > { %370 = vst.msk [vmem:[#allocation2 + $0x2f] sm:$0x1] %vm367_vm5, %v3449_v25 }
  0x5b   : > { %582 = vrot.lane.b32.xlu2 %v3681_v29, %s3448_s12  ;;  %580 = vrot.lane.b32.xlu1 %v3684_v30, %s3448_s12  ;;  %372 = vst.msk [vmem:[#allocation2 + $0x4f] sm:$0x1] %vm367_vm5, %v3449_v25 }
  0x5c   : > { %578 = vrot.lane.b32.xlu0 %v3689_v31, %s3448_s12  ;;  %373 = vst.msk [vmem:[#allocation2 + $0x5f] sm:$0x1] %vm367_vm5, %v3449_v25 }
  0x5d   : > { %374 = vst.msk [vmem:[#allocation2 + $0x6f] sm:$0x1] %vm367_vm5, %v3449_v25 }
  0x5e   : > { %375 = vst.msk [vmem:[#allocation2 + $0x7f] sm:$0x1] %vm367_vm5, %v3449_v25 }
  0x5f   : > { %376 = vst.msk [vmem:[#allocation2 + $0x8f] sm:$0x1] %vm367_vm5, %v3449_v25 }
  0x60   : > { %377 = vst.msk [vmem:[#allocation2 + $0x9f] sm:$0x1] %vm367_vm5, %v3449_v25 }
  0x61   : > { %378 = vst.msk [vmem:[#allocation2 + $0xaf] sm:$0x1] %vm367_vm5, %v3449_v25 }
  0x62   : > { %379 = vst.msk [vmem:[#allocation2 + $0xbf] sm:$0x1] %vm367_vm5, %v3449_v25 }
  0x63   : > { %648 = vrot.lane.b32.xlu2 %v3527_v2, %s3450_s13  ;;  %646 = vrot.lane.b32.xlu1 %v3545_v6, %s3450_s13  ;;  %380 = vst.msk [vmem:[#allocation2 + $0xcf] sm:$0x1] %vm367_vm5, %v3449_v25 }
  0x64   : > { %644 = vrot.lane.b32.xlu0 %v3530_v3, %s3450_s13  ;;  %381 = vst.msk [vmem:[#allocation2 + $0xdf] sm:$0x1] %vm367_vm5, %v3449_v25 }
  0x65   : > { %382 = vst.msk [vmem:[#allocation2 + $0xef] sm:$0x1] %vm367_vm5, %v3449_v25 }
  0x66   : > { %383 = vst.msk [vmem:[#allocation2 + $0xff] sm:$0x1] %vm367_vm5, %v3449_v25 }
  0x67   : > { %403 = vst.msk [vmem:[#allocation2 + $0x1f] sm:$0x1] %vm401_vm6, %v3449_v25 }
  0x68   : > { %404 = vst.msk [vmem:[#allocation2 + $0x2f] sm:$0x1] %vm401_vm6, %v3449_v25 }
  0x69   : > { %406 = vst.msk [vmem:[#allocation2 + $0x4f] sm:$0x1] %vm401_vm6, %v3449_v25 }
  0x6a   : > { %407 = vst.msk [vmem:[#allocation2 + $0x5f] sm:$0x1] %vm401_vm6, %v3449_v25 }
  0x6b   : > { %654 = vrot.lane.b32.xlu2 %v3539_v4, %s3450_s13  ;;  %652 = vrot.lane.b32.xlu1 %v3524_v1, %s3450_s13  ;;  %408 = vst.msk [vmem:[#allocation2 + $0x6f] sm:$0x1] %vm401_vm6, %v3449_v25 }
  0x6c   : > { %650 = vrot.lane.b32.xlu0 %v3542_v5, %s3450_s13  ;;  %409 = vst.msk [vmem:[#allocation2 + $0x7f] sm:$0x1] %vm401_vm6, %v3449_v25 }
  0x6d   : > { %v533_v32 = vpop.permute.xlu2 %532  ;;  %410 = vst.msk [vmem:[#allocation2 + $0x8f] sm:$0x1] %vm401_vm6, %v3449_v25 }
  0x6e   : > { %618 = vst.msk [vmem:[#allocation2 + $0x30] sm:$0xff] %vm361_vm4, %v533_v32 }
  0x6f   : > { %411 = vst.msk [vmem:[#allocation2 + $0x9f] sm:$0x1] %vm401_vm6, %v3449_v25 }
  0x70   : > { %412 = vst.msk [vmem:[#allocation2 + $0xaf] sm:$0x1] %vm401_vm6, %v3449_v25 }
  0x71   : > { %413 = vst.msk [vmem:[#allocation2 + $0xbf] sm:$0x1] %vm401_vm6, %v3449_v25 }
  0x72   : > { %414 = vst.msk [vmem:[#allocation2 + $0xcf] sm:$0x1] %vm401_vm6, %v3449_v25 }
  0x73   : > { %660 = vrot.lane.b32.xlu2 %v3554_v7, %s3450_s13  ;;  %658 = vrot.lane.b32.xlu1 %v3557_v8, %s3450_s13  ;;  %415 = vst.msk [vmem:[#allocation2 + $0xdf] sm:$0x1] %vm401_vm6, %v3449_v25 }
  0x74   : > { %656 = vrot.lane.b32.xlu0 %v3560_v9, %s3450_s13  ;;  %416 = vst.msk [vmem:[#allocation2 + $0xef] sm:$0x1] %vm401_vm6, %v3449_v25 }
  0x75   : > { %v535_v33 = vpop.permute.xlu2 %534  ;;  %417 = vst.msk [vmem:[#allocation2 + $0xff] sm:$0x1] %vm401_vm6, %v3449_v25 }
  0x76   : > { %619 = vst.msk [vmem:[#allocation2 + $0x38] sm:$0xff] %vm361_vm4, %v535_v33 }
  0x77   : > { %447 = vst.msk [vmem:[#allocation2 + $0x1f] sm:$0x1] %vm445_vm7, %v3449_v25 }
  0x78   : > { %448 = vst.msk [vmem:[#allocation2 + $0x2f] sm:$0x1] %vm445_vm7, %v3449_v25 }
  0x79   : > { %450 = vst.msk [vmem:[#allocation2 + $0x4f] sm:$0x1] %vm445_vm7, %v3449_v25 }
  0x7a   : > { %451 = vst.msk [vmem:[#allocation2 + $0x5f] sm:$0x1] %vm445_vm7, %v3449_v25 }
  0x7b   : > { %666 = vrot.lane.b32.xlu2 %v3569_v10, %s3450_s13  ;;  %664 = vrot.lane.b32.xlu1 %v3572_v11, %s3450_s13  ;;  %452 = vst.msk [vmem:[#allocation2 + $0x6f] sm:$0x1] %vm445_vm7, %v3449_v25 }
  0x7c   : > { %662 = vrot.lane.b32.xlu0 %v3575_v12, %s3450_s13  ;;  %453 = vst.msk [vmem:[#allocation2 + $0x7f] sm:$0x1] %vm445_vm7, %v3449_v25 }
  0x7d   : > { %v3863_v34 = vpop.permute.xlu2 %540  ;;  %454 = vst.msk [vmem:[#allocation2 + $0x8f] sm:$0x1] %vm445_vm7, %v3449_v25 }
  0x7e   : > { %455 = vst.msk [vmem:[#allocation2 + $0x9f] sm:$0x1] %vm445_vm7, %v3449_v25 }
  0x7f   : > { %456 = vst.msk [vmem:[#allocation2 + $0xaf] sm:$0x1] %vm445_vm7, %v3449_v25 }
  0x80   : > { %457 = vst.msk [vmem:[#allocation2 + $0xbf] sm:$0x1] %vm445_vm7, %v3449_v25 }
  0x81   : > { %458 = vst.msk [vmem:[#allocation2 + $0xcf] sm:$0x1] %vm445_vm7, %v3449_v25 }
  0x82   : > { %459 = vst.msk [vmem:[#allocation2 + $0xdf] sm:$0x1] %vm445_vm7, %v3449_v25 }
  0x83   : > { %672 = vrot.lane.b32.xlu2 %v3584_v13, %s3450_s13  ;;  %670 = vrot.lane.b32.xlu1 %v3587_v14, %s3450_s13  ;;  %460 = vst.msk [vmem:[#allocation2 + $0xef] sm:$0x1] %vm445_vm7, %v3449_v25 }
  0x84   : > { %668 = vrot.lane.b32.xlu0 %v3590_v15, %s3450_s13  ;;  %465 = vst.msk [vmem:[#allocation2 + $0x19] sm:$0x7f] %vm464_vm8, %v3545_v6 }
  0x85   : > { %v3891_v35 = vpop.permute.xlu2 %546  ;;  %v3895_v36 = vpop.permute.xlu1 %528  ;;  %467 = vst.msk [vmem:[#allocation2 + $0x29] sm:$0x7f] %vm464_vm8, %v3542_v5 }
  0x86   : > { %v525_v37 = vpop.permute.xlu0 %524  ;;  %471 = vst.msk [vmem:[#allocation2 + $0x49] sm:$0x7f] %vm464_vm8, %v3557_v8 }
  0x87   : > { %473 = vst.msk [vmem:[#allocation2 + $0x59] sm:$0x7f] %vm464_vm8, %v3575_v12 }
  0x88   : > { %475 = vst.msk [vmem:[#allocation2 + $0x69] sm:$0x7f] %vm464_vm8, %v3569_v10 }
  0x89   : > { %477 = vst.msk [vmem:[#allocation2 + $0x79] sm:$0x7f] %vm464_vm8, %v3587_v14 }
  0x8a   : > { %479 = vst.msk [vmem:[#allocation2 + $0x89] sm:$0x7f] %vm464_vm8, %v3605_v18 }
  0x8b   : > { %678 = vrot.lane.b32.xlu2 %v3599_v16, %s3450_s13  ;;  %676 = vrot.lane.b32.xlu1 %v3602_v17, %s3450_s13  ;;  %481 = vst.msk [vmem:[#allocation2 + $0x99] sm:$0x7f] %vm464_vm8, %v3599_v16 }
  0x8c   : > { %674 = vrot.lane.b32.xlu0 %v3605_v18, %s3450_s13  ;;  %483 = vst.msk [vmem:[#allocation2 + $0xa9] sm:$0x7f] %vm464_vm8, %v3617_v20 }
  0x8d   : > { %v553_v38 = vpop.permute.xlu2 %552  ;;  %v531_v39 = vpop.permute.xlu1 %530  ;;  %485 = vst.msk [vmem:[#allocation2 + $0xb9] sm:$0x7f] %vm464_vm8, %v3635_v24 }
  0x8e   : > { %v527_v40 = vpop.permute.xlu0 %526  ;;  %487 = vst.msk [vmem:[#allocation2 + $0xc9] sm:$0x7f] %vm464_vm8, %v3629_v22 }
  0x8f   : > { %489 = vst.msk [vmem:[#allocation2 + $0xd9] sm:$0x7f] %vm464_vm8, %v3653_v27 }
  0x90   : > { %491 = vst.msk [vmem:[#allocation2 + $0xe9] sm:$0x7f] %vm464_vm8, %v3689_v31 }
  0x91   : > { %622 = vst.msk [vmem:[#allocation2 + $0x50] sm:$0xff] %vm361_vm4, %v3863_v34 }
  0x92   : > { %625 = vst.msk [vmem:[#allocation2 + $0x68] sm:$0xff] %vm361_vm4, %v3891_v35 }
  0x93   : > { %684 = vrot.lane.b32.xlu2 %v3614_v19, %s3450_s13  ;;  %682 = vrot.lane.b32.xlu1 %v3617_v20, %s3450_s13  ;;  %616 = vst.msk [vmem:[#allocation2 + $0x20] sm:$0xff] %vm361_vm4, %v3895_v36 }
  0x94   : > { %680 = vrot.lane.b32.xlu0 %v3620_v21, %s3450_s13  ;;  %614 = vst.msk [vmem:[#allocation2 + $0x10] sm:$0xff] %vm361_vm4, %v525_v37  ;;  %v4118_v37 = vld [vmem:[%s3521_s11 + $0xf8] sm:$0xff] }
  0x95   : > { %v559_v41 = vpop.permute.xlu2 %558  ;;  %v539_v42 = vpop.permute.xlu1 %538  ;;  %628 = vst.msk [vmem:[#allocation2 + $0x80] sm:$0xff] %vm361_vm4, %v553_v38  ;;  %v4121_v38 = vld [vmem:[%s3521_s11 + $0xf0] sm:$0xff] }
  0x96   : > { %v537_v43 = vpop.permute.xlu0 %536  ;;  %617 = vst.msk [vmem:[#allocation2 + $0x28] sm:$0xff] %vm361_vm4, %v531_v39 }
  0x97   : > { %615 = vst.msk [vmem:[#allocation2 + $0x18] sm:$0xff] %vm361_vm4, %v527_v40 }
  0x98   : > { %631 = vst.msk [vmem:[#allocation2 + $0x98] sm:$0xff] %vm361_vm4, %v559_v41 }
  0x99   : > { %621 = vst.msk [vmem:[#allocation2 + $0x48] sm:$0xff] %vm361_vm4, %v539_v42 }
  0x9a   : > { %620 = vst.msk [vmem:[#allocation2 + $0x40] sm:$0xff] %vm361_vm4, %v537_v43 }
  0x9b   : > { %690 = vrot.lane.b32.xlu2 %v3629_v22, %s3450_s13  ;;  %688 = vrot.lane.b32.xlu1 %v3632_v23, %s3450_s13  ;;  %420 = vst.msk [vmem:[#allocation2 + $0xf0] sm:$0xff] %vm419_vm9, %v3449_v25 }
  0x9c   : > { %686 = vrot.lane.b32.xlu0 %v3635_v24, %s3450_s13  ;;  %421 = vst.msk [vmem:[#allocation2 + $0xf8] sm:$0xff] %vm419_vm9, %v3449_v25 }
  0x9d   : > { %v565_v44 = vpop.permute.xlu2 %564  ;;  %v545_v45 = vpop.permute.xlu1 %544  ;;  %438 = vst.msk [vmem:[#allocation2 + $0xf0] sm:$0x1] %vm422_vm2, %v3449_v25 }
  0x9e   : > { %v543_v46 = vpop.permute.xlu0 %542  ;;  %634 = vst.msk [vmem:[#allocation2 + $0xb0] sm:$0xff] %vm361_vm4, %v565_v44 }
  0x9f   : > { %624 = vst.msk [vmem:[#allocation2 + $0x60] sm:$0xff] %vm361_vm4, %v545_v45 }
  0xa0   : > { %623 = vst.msk [vmem:[#allocation2 + $0x58] sm:$0xff] %vm361_vm4, %v543_v46 }
  0xa1   : > { %440 = vst.msk [vmem:[#allocation2 + $0xf0] sm:$0xff] %vm439_vm10, %v3449_v25 }
  0xa2   : > { %441 = vst.msk [vmem:[#allocation2 + $0xf8] sm:$0xff] %vm439_vm10, %v3449_v25 }
  0xa3   : > { %696 = vrot.lane.b32.xlu2 %v3650_v26, %s3450_s13  ;;  %694 = vrot.lane.b32.xlu1 %v3653_v27, %s3450_s13  ;;  %443 = vst.msk [vmem:[#allocation2 + $0xf0] sm:$0xff] %vm5855_vm11, %v3449_v25 }
  0xa4   : > { %692 = vrot.lane.b32.xlu0 %v3658_v28, %s3450_s13  ;;  %444 = vst.msk [vmem:[#allocation2 + $0xf8] sm:$0xff] %vm5855_vm11, %v3449_v25 }
  0xa5   : > { %v571_v47 = vpop.permute.xlu2 %570  ;;  %v551_v48 = vpop.permute.xlu1 %550  ;;  %461 = vst.msk [vmem:[#allocation2 + $0xff] sm:$0x1] %vm445_vm7, %v3449_v25 }
  0xa6   : > { %v549_v49 = vpop.permute.xlu0 %548  ;;  %637 = vst.msk [vmem:[#allocation2 + $0xc8] sm:$0xff] %vm361_vm4, %v571_v47 }
  0xa7   : > { %627 = vst.msk [vmem:[#allocation2 + $0x78] sm:$0xff] %vm361_vm4, %v551_v48 }
  0xa8   : > { %626 = vst.msk [vmem:[#allocation2 + $0x70] sm:$0xff] %vm361_vm4, %v549_v49 }
  0xa9   : > { %492 = vst.msk [vmem:[#allocation2 + $0xf1] sm:$0xff] %vm341_vm3, %v3684_v30 }
  0xaa   : > { %493 = vst.msk [vmem:[#allocation2 + $0xf9] sm:$0x7f] %vm464_vm8, %v3681_v29 }
  0xab   : > { %702 = vrot.lane.b32.xlu2 %v3681_v29, %s3450_s13  ;;  %700 = vrot.lane.b32.xlu1 %v3684_v30, %s3450_s13  ;;  %365 = vst.msk [vmem:[#allocation2] sm:$0xff] %vm364_vm13, %v3449_v25 }
  0xac   : > { %698 = vrot.lane.b32.xlu0 %v3689_v31, %s3450_s13  ;;  %366 = vst.msk [vmem:[#allocation2 + $0x8] sm:$0xff] %vm364_vm13, %v3449_v25 }
  0xad   : > { %v577_v50 = vpop.permute.xlu2 %576  ;;  %v557_v51 = vpop.permute.xlu1 %556  ;;  %368 = vst.msk [vmem:[#allocation2 + $0xf] sm:$0x1] %vm367_vm5, %v3449_v25  ;;  %vm5853_vm5 = vcmask 227520  }
  0xae   : > { %v555_v52 = vpop.permute.xlu0 %554  ;;  %640 = vst.msk [vmem:[#allocation2 + $0xe0] sm:$0xff] %vm361_vm4, %v577_v50 }
  0xaf   : > { %630 = vst.msk [vmem:[#allocation2 + $0x90] sm:$0xff] %vm361_vm4, %v557_v51 }
  0xb0   : > { %629 = vst.msk [vmem:[#allocation2 + $0x88] sm:$0xff] %vm361_vm4, %v555_v52 }
  0xb1   : > { %385 = vst.msk [vmem:[#allocation2] sm:$0x1] %vm384_vm1, %v3449_v25  ;;  %vm1124_vm1 = vcmask 195744  }
  0xb2   : > { %402 = vst.msk [vmem:[#allocation2 + $0xf] sm:$0x1] %vm401_vm6, %v3449_v25  ;;  %vm1635_vm6 = vcmask 1041408  }
  0xb3   : > { %771 = vrot.lane.b32.xlu2 %v3527_v2, %s3451_s14  ;;  %769 = vrot.lane.b32.xlu1 %v3545_v6, %s3451_s14  ;;  %423 = vst.msk [vmem:[#allocation2] sm:$0x1] %vm422_vm2, %v3449_v25  ;;  %vm1122_vm2 = vcmask 195745  }
  0xb4   : > { %767 = vrot.lane.b32.xlu0 %v3530_v3, %s3451_s14  ;;  %446 = vst.msk [vmem:[#allocation2 + $0xf] sm:$0x1] %vm445_vm7, %v3449_v25  ;;  %vm5854_vm7 = vcmask 294145  }
  0xb5   : > { %v583_v53 = vpop.permute.xlu2 %582  ;;  %v563_v54 = vpop.permute.xlu1 %562 }
  0xb6   : > { %v561_v55 = vpop.permute.xlu0 %560  ;;  %643 = vst.msk [vmem:[#allocation2 + $0xf8] sm:$0xff] %vm361_vm4, %v583_v53 }
  0xb7   : > { %633 = vst.msk [vmem:[#allocation2 + $0xa8] sm:$0xff] %vm361_vm4, %v563_v54 }
  0xb8   : > { %632 = vst.msk [vmem:[#allocation2 + $0xa0] sm:$0xff] %vm361_vm4, %v561_v55 }
  0xbb   : > { %777 = vrot.lane.b32.xlu2 %v3539_v4, %s3451_s14  ;;  %775 = vrot.lane.b32.xlu1 %v3524_v1, %s3451_s14 }
  0xbc   : > { %773 = vrot.lane.b32.xlu0 %v3542_v5, %s3451_s14 }
  0xbd   : > { %v649_v56 = vpop.permute.xlu2 %648  ;;  %v569_v57 = vpop.permute.xlu1 %568 }
  0xbe   : > { %v567_v58 = vpop.permute.xlu0 %566  ;;  %737 = vst.msk [vmem:[#allocation2 + $0x1f] sm:$0xfe] %vm734_vm12, %v649_v56 }
  0xbf   : > { %636 = vst.msk [vmem:[#allocation2 + $0xc0] sm:$0xff] %vm361_vm4, %v569_v57 }
  0xc0   : > { %635 = vst.msk [vmem:[#allocation2 + $0xb8] sm:$0xff] %vm361_vm4, %v567_v58 }
  0xc3   : > { %783 = vrot.lane.b32.xlu2 %v3554_v7, %s3451_s14  ;;  %781 = vrot.lane.b32.xlu1 %v3557_v8, %s3451_s14 }
  0xc4   : > { %779 = vrot.lane.b32.xlu0 %v3560_v9, %s3451_s14 }
  0xc5   : > { %v655_v59 = vpop.permute.xlu2 %654  ;;  %v575_v60 = vpop.permute.xlu1 %574 }
  0xc6   : > { %v573_v61 = vpop.permute.xlu0 %572  ;;  %740 = vst.msk [vmem:[#allocation2 + $0x37] sm:$0xff] %vm364_vm13, %v655_v59 }
  0xc7   : > { %639 = vst.msk [vmem:[#allocation2 + $0xd8] sm:$0xff] %vm361_vm4, %v575_v60 }
  0xc8   : > { %638 = vst.msk [vmem:[#allocation2 + $0xd0] sm:$0xff] %vm361_vm4, %v573_v61 }
  0xcb   : > { %789 = vrot.lane.b32.xlu2 %v3569_v10, %s3451_s14  ;;  %787 = vrot.lane.b32.xlu1 %v3572_v11, %s3451_s14 }
  0xcc   : > { %785 = vrot.lane.b32.xlu0 %v3575_v12, %s3451_s14 }
  0xcd   : > { %v661_v62 = vpop.permute.xlu2 %660  ;;  %v581_v63 = vpop.permute.xlu1 %580 }
  0xce   : > { %v579_v0 = vpop.permute.xlu0 %578  ;;  %743 = vst.msk [vmem:[#allocation2 + $0x4f] sm:$0xfe] %vm734_vm12, %v661_v62 }
  0xcf   : > { %642 = vst.msk [vmem:[#allocation2 + $0xf0] sm:$0xff] %vm361_vm4, %v581_v63 }
  0xd0   : > { %641 = vst.msk [vmem:[#allocation2 + $0xe8] sm:$0xff] %vm361_vm4, %v579_v0 }
  0xd3   : > { %795 = vrot.lane.b32.xlu2 %v3584_v13, %s3451_s14  ;;  %793 = vrot.lane.b32.xlu1 %v3587_v14, %s3451_s14 }
  0xd4   : > { %791 = vrot.lane.b32.xlu0 %v3590_v15, %s3451_s14 }
  0xd5   : > { %v667_v32 = vpop.permute.xlu2 %666  ;;  %v647_v33 = vpop.permute.xlu1 %646 }
  0xd6   : > { %746 = vst.msk [vmem:[#allocation2 + $0x67] sm:$0xff] %vm364_vm13, %v667_v32  ;;  %v645_v34 = vpop.permute.xlu0 %644 }
  0xd7   : > { %736 = vst.msk [vmem:[#allocation2 + $0x17] sm:$0xff] %vm364_vm13, %v647_v33 }
  0xd8   : > { %735 = vst.msk [vmem:[#allocation2 + $0xf] sm:$0xfe] %vm734_vm12, %v645_v34 }
  0xdb   : > { %801 = vrot.lane.b32.xlu2 %v3599_v16, %s3451_s14  ;;  %799 = vrot.lane.b32.xlu1 %v3602_v17, %s3451_s14 }
  0xdc   : > { %797 = vrot.lane.b32.xlu0 %v3605_v18, %s3451_s14 }
  0xdd   : > { %v673_v25 = vpop.permute.xlu2 %672  ;;  %v653_v35 = vpop.permute.xlu1 %652 }
  0xde   : > { %749 = vst.msk [vmem:[#allocation2 + $0x7f] sm:$0xfe] %vm734_vm12, %v673_v25  ;;  %v651_v36 = vpop.permute.xlu0 %650 }
  0xdf   : > { %739 = vst.msk [vmem:[#allocation2 + $0x2f] sm:$0xfe] %vm734_vm12, %v653_v35 }
  0xe0   : > { %738 = vst.msk [vmem:[#allocation2 + $0x27] sm:$0xff] %vm364_vm13, %v651_v36 }
  0xe3   : > { %807 = vrot.lane.b32.xlu2 %v3614_v19, %s3451_s14  ;;  %805 = vrot.lane.b32.xlu1 %v3617_v20, %s3451_s14 }
  0xe4   : > { %803 = vrot.lane.b32.xlu0 %v3620_v21, %s3451_s14 }
  0xe5   : > { %v679_v39 = vpop.permute.xlu2 %678  ;;  %v659_v40 = vpop.permute.xlu1 %658 }
  0xe6   : > { %752 = vst.msk [vmem:[#allocation2 + $0x97] sm:$0xff] %vm364_vm13, %v679_v39  ;;  %v657_v41 = vpop.permute.xlu0 %656 }
  0xe7   : > { %742 = vst.msk [vmem:[#allocation2 + $0x47] sm:$0xff] %vm364_vm13, %v659_v40 }
  0xe8   : > { %741 = vst.msk [vmem:[#allocation2 + $0x3f] sm:$0xfe] %vm734_vm12, %v657_v41 }
  0xeb   : > { %813 = vrot.lane.b32.xlu2 %v3629_v22, %s3451_s14  ;;  %811 = vrot.lane.b32.xlu1 %v3632_v23, %s3451_s14 }
  0xec   : > { %809 = vrot.lane.b32.xlu0 %v3635_v24, %s3451_s14 }
  0xed   : > { %v685_v42 = vpop.permute.xlu2 %684  ;;  %v665_v43 = vpop.permute.xlu1 %664 }
  0xee   : > { %755 = vst.msk [vmem:[#allocation2 + $0xaf] sm:$0xfe] %vm734_vm12, %v685_v42  ;;  %v663_v44 = vpop.permute.xlu0 %662 }
  0xef   : > { %745 = vst.msk [vmem:[#allocation2 + $0x5f] sm:$0xfe] %vm734_vm12, %v665_v43 }
  0xf0   : > { %744 = vst.msk [vmem:[#allocation2 + $0x57] sm:$0xff] %vm364_vm13, %v663_v44 }
  0xf3   : > { %819 = vrot.lane.b32.xlu2 %v3650_v26, %s3451_s14  ;;  %817 = vrot.lane.b32.xlu1 %v3653_v27, %s3451_s14 }
  0xf4   : > { %815 = vrot.lane.b32.xlu0 %v3658_v28, %s3451_s14 }
  0xf5   : > { %v691_v45 = vpop.permute.xlu2 %690  ;;  %v671_v46 = vpop.permute.xlu1 %670 }
  0xf6   : > { %758 = vst.msk [vmem:[#allocation2 + $0xc7] sm:$0xff] %vm364_vm13, %v691_v45  ;;  %v669_v47 = vpop.permute.xlu0 %668 }
  0xf7   : > { %748 = vst.msk [vmem:[#allocation2 + $0x77] sm:$0xff] %vm364_vm13, %v671_v46 }
  0xf8   : > { %747 = vst.msk [vmem:[#allocation2 + $0x6f] sm:$0xfe] %vm734_vm12, %v669_v47 }
  0xfb   : > { %825 = vrot.lane.b32.xlu2 %v3681_v29, %s3451_s14  ;;  %823 = vrot.lane.b32.xlu1 %v3684_v30, %s3451_s14 }
  0xfc   : > { %821 = vrot.lane.b32.xlu0 %v3689_v31, %s3451_s14 }
  0xfd   : > { %v697_v48 = vpop.permute.xlu2 %696  ;;  %v677_v49 = vpop.permute.xlu1 %676 }
  0xfe   : > { %761 = vst.msk [vmem:[#allocation2 + $0xdf] sm:$0xfe] %vm734_vm12, %v697_v48  ;;  %v675_v50 = vpop.permute.xlu0 %674 }
  0xff   : > { %751 = vst.msk [vmem:[#allocation2 + $0x8f] sm:$0xfe] %vm734_vm12, %v677_v49 }
 0x100   : > { %750 = vst.msk [vmem:[#allocation2 + $0x87] sm:$0xff] %vm364_vm13, %v675_v50 }
 0x103   : > { %829 = vrot.lane.b32.xlu1 %v4118_v37, %s3451_s14  ;;  %897 = vrot.lane.b32.xlu2 %v3530_v3, %s3452_s15 }
 0x104   : > { %827 = vrot.lane.b32.xlu0 %v4121_v38, %s3451_s14 }
 0x105   : > { %v703_v51 = vpop.permute.xlu2 %702  ;;  %v683_v52 = vpop.permute.xlu1 %682 }
 0x106   : > { %764 = vst.msk [vmem:[#allocation2 + $0xf7] sm:$0xff] %vm364_vm13, %v703_v51  ;;  %v681_v53 = vpop.permute.xlu0 %680 }
 0x107   : > { %754 = vst.msk [vmem:[#allocation2 + $0xa7] sm:$0xff] %vm364_vm13, %v683_v52 }
 0x108   : > { %753 = vst.msk [vmem:[#allocation2 + $0x9f] sm:$0xfe] %vm734_vm12, %v681_v53 }
 0x10b   : > { %901 = vrot.lane.b32.xlu1 %v3527_v2, %s3452_s15  ;;  %903 = vrot.lane.b32.xlu2 %v3542_v5, %s3452_s15 }
 0x10c   : > { %899 = vrot.lane.b32.xlu0 %v3545_v6, %s3452_s15 }
 0x10d   : > { %v772_v54 = vpop.permute.xlu2 %771  ;;  %v689_v55 = vpop.permute.xlu1 %688 }
 0x10e   : > { %867 = vst.msk [vmem:[#allocation2 + $0x11] sm:$0xff] %vm863_vm14, %v772_v54  ;;  %v687_v56 = vpop.permute.xlu0 %686 }
 0x10f   : > { %757 = vst.msk [vmem:[#allocation2 + $0xbf] sm:$0xfe] %vm734_vm12, %v689_v55 }
 0x110   : > { %756 = vst.msk [vmem:[#allocation2 + $0xb7] sm:$0xff] %vm364_vm13, %v687_v56 }
 0x113   : > { %907 = vrot.lane.b32.xlu1 %v3539_v4, %s3452_s15  ;;  %909 = vrot.lane.b32.xlu2 %v3560_v9, %s3452_s15 }
 0x114   : > { %905 = vrot.lane.b32.xlu0 %v3524_v1, %s3452_s15 }
 0x115   : > { %v778_v57 = vpop.permute.xlu2 %777  ;;  %v695_v58 = vpop.permute.xlu1 %694 }
 0x116   : > { %870 = vst.msk [vmem:[#allocation2 + $0x29] sm:$0x7f] %vm865_vm15, %v778_v57  ;;  %v693_v59 = vpop.permute.xlu0 %692 }
 0x117   : > { %760 = vst.msk [vmem:[#allocation2 + $0xd7] sm:$0xff] %vm364_vm13, %v695_v58 }
 0x118   : > { %759 = vst.msk [vmem:[#allocation2 + $0xcf] sm:$0xfe] %vm734_vm12, %v693_v59 }
 0x11b   : > { %913 = vrot.lane.b32.xlu1 %v3554_v7, %s3452_s15  ;;  %915 = vrot.lane.b32.xlu2 %v3575_v12, %s3452_s15 }
 0x11c   : > { %911 = vrot.lane.b32.xlu0 %v3557_v8, %s3452_s15 }
 0x11d   : > { %v784_v60 = vpop.permute.xlu2 %783  ;;  %v701_v61 = vpop.permute.xlu1 %700 }
 0x11e   : > { %873 = vst.msk [vmem:[#allocation2 + $0x41] sm:$0xff] %vm863_vm14, %v784_v60  ;;  %v699_v62 = vpop.permute.xlu0 %698 }
 0x11f   : > { %763 = vst.msk [vmem:[#allocation2 + $0xef] sm:$0xfe] %vm734_vm12, %v701_v61 }
 0x120   : > { %762 = vst.msk [vmem:[#allocation2 + $0xe7] sm:$0xff] %vm364_vm13, %v699_v62 }
 0x123   : > { %919 = vrot.lane.b32.xlu1 %v3569_v10, %s3452_s15  ;;  %921 = vrot.lane.b32.xlu2 %v3590_v15, %s3452_s15 }
 0x124   : > { %917 = vrot.lane.b32.xlu0 %v3572_v11, %s3452_s15 }
 0x125   : > { %v790_v63 = vpop.permute.xlu2 %789  ;;  %v770_v0 = vpop.permute.xlu1 %769 }
 0x126   : > { %876 = vst.msk [vmem:[#allocation2 + $0x59] sm:$0x7f] %vm865_vm15, %v790_v63  ;;  %v768_v32 = vpop.permute.xlu0 %767 }
 0x127   : > { %866 = vst.msk [vmem:[#allocation2 + $0x9] sm:$0x7f] %vm865_vm15, %v770_v0 }
 0x128   : > { %864 = vst.msk [vmem:[#allocation2 + $0x1] sm:$0xff] %vm863_vm14, %v768_v32 }
 0x12b   : > { %925 = vrot.lane.b32.xlu1 %v3584_v13, %s3452_s15  ;;  %927 = vrot.lane.b32.xlu2 %v3605_v18, %s3452_s15 }
 0x12c   : > { %923 = vrot.lane.b32.xlu0 %v3587_v14, %s3452_s15 }
 0x12d   : > { %v796_v33 = vpop.permute.xlu2 %795  ;;  %v776_v34 = vpop.permute.xlu1 %775 }
 0x12e   : > { %879 = vst.msk [vmem:[#allocation2 + $0x71] sm:$0xff] %vm863_vm14, %v796_v33  ;;  %v774_v25 = vpop.permute.xlu0 %773 }
 0x12f   : > { %869 = vst.msk [vmem:[#allocation2 + $0x21] sm:$0xff] %vm863_vm14, %v776_v34 }
 0x130   : > { %868 = vst.msk [vmem:[#allocation2 + $0x19] sm:$0x7f] %vm865_vm15, %v774_v25 }
 0x133   : > { %931 = vrot.lane.b32.xlu1 %v3599_v16, %s3452_s15  ;;  %933 = vrot.lane.b32.xlu2 %v3620_v21, %s3452_s15 }
 0x134   : > { %929 = vrot.lane.b32.xlu0 %v3602_v17, %s3452_s15 }
 0x135   : > { %v802_v35 = vpop.permute.xlu2 %801  ;;  %v782_v36 = vpop.permute.xlu1 %781 }
 0x136   : > { %882 = vst.msk [vmem:[#allocation2 + $0x89] sm:$0x7f] %vm865_vm15, %v802_v35  ;;  %v780_v39 = vpop.permute.xlu0 %779 }
 0x137   : > { %872 = vst.msk [vmem:[#allocation2 + $0x39] sm:$0x7f] %vm865_vm15, %v782_v36 }
 0x138   : > { %871 = vst.msk [vmem:[#allocation2 + $0x31] sm:$0xff] %vm863_vm14, %v780_v39 }
 0x13b   : > { %937 = vrot.lane.b32.xlu1 %v3614_v19, %s3452_s15  ;;  %939 = vrot.lane.b32.xlu2 %v3635_v24, %s3452_s15 }
 0x13c   : > { %935 = vrot.lane.b32.xlu0 %v3617_v20, %s3452_s15 }
 0x13d   : > { %v808_v40 = vpop.permute.xlu2 %807  ;;  %v788_v41 = vpop.permute.xlu1 %787 }
 0x13e   : > { %885 = vst.msk [vmem:[#allocation2 + $0xa1] sm:$0xff] %vm863_vm14, %v808_v40  ;;  %v786_v42 = vpop.permute.xlu0 %785 }
 0x13f   : > { %875 = vst.msk [vmem:[#allocation2 + $0x51] sm:$0xff] %vm863_vm14, %v788_v41 }
 0x140   : > { %874 = vst.msk [vmem:[#allocation2 + $0x49] sm:$0x7f] %vm865_vm15, %v786_v42 }
 0x143   : > { %943 = vrot.lane.b32.xlu1 %v3629_v22, %s3452_s15  ;;  %945 = vrot.lane.b32.xlu2 %v3658_v28, %s3452_s15 }
 0x144   : > { %941 = vrot.lane.b32.xlu0 %v3632_v23, %s3452_s15 }
 0x145   : > { %v814_v43 = vpop.permute.xlu2 %813  ;;  %v794_v44 = vpop.permute.xlu1 %793 }
 0x146   : > { %888 = vst.msk [vmem:[#allocation2 + $0xb9] sm:$0x7f] %vm865_vm15, %v814_v43  ;;  %v792_v45 = vpop.permute.xlu0 %791 }
 0x147   : > { %878 = vst.msk [vmem:[#allocation2 + $0x69] sm:$0x7f] %vm865_vm15, %v794_v44 }
 0x148   : > { %877 = vst.msk [vmem:[#allocation2 + $0x61] sm:$0xff] %vm863_vm14, %v792_v45 }
 0x14b   : > { %949 = vrot.lane.b32.xlu1 %v3650_v26, %s3452_s15  ;;  %951 = vrot.lane.b32.xlu2 %v3689_v31, %s3452_s15 }
 0x14c   : > { %947 = vrot.lane.b32.xlu0 %v3653_v27, %s3452_s15 }
 0x14d   : > { %v820_v46 = vpop.permute.xlu2 %819  ;;  %v800_v47 = vpop.permute.xlu1 %799 }
 0x14e   : > { %891 = vst.msk [vmem:[#allocation2 + $0xd1] sm:$0xff] %vm863_vm14, %v820_v46  ;;  %v798_v48 = vpop.permute.xlu0 %797 }
 0x14f   : > { %881 = vst.msk [vmem:[#allocation2 + $0x81] sm:$0xff] %vm863_vm14, %v800_v47 }
 0x150   : > { %880 = vst.msk [vmem:[#allocation2 + $0x79] sm:$0x7f] %vm865_vm15, %v798_v48 }
 0x153   : > { %955 = vrot.lane.b32.xlu1 %v3681_v29, %s3452_s15  ;;  %957 = vrot.lane.b32.xlu2 %v4121_v38, %s3452_s15 }
 0x154   : > { %953 = vrot.lane.b32.xlu0 %v3684_v30, %s3452_s15 }
 0x155   : > { %v826_v49 = vpop.permute.xlu2 %825  ;;  %v806_v50 = vpop.permute.xlu1 %805 }
 0x156   : > { %894 = vst.msk [vmem:[#allocation2 + $0xe9] sm:$0x7f] %vm865_vm15, %v826_v49  ;;  %v804_v51 = vpop.permute.xlu0 %803 }
 0x157   : > { %884 = vst.msk [vmem:[#allocation2 + $0x99] sm:$0x7f] %vm865_vm15, %v806_v50 }
 0x158   : > { %883 = vst.msk [vmem:[#allocation2 + $0x91] sm:$0xff] %vm863_vm14, %v804_v51 }
 0x15b   : > { %1026 = vrot.lane.b32.xlu1 %v3530_v3, %s3453_s16  ;;  %1028 = vrot.lane.b32.xlu2 %v3545_v6, %s3453_s16 }
 0x15c   : > { %959 = vrot.lane.b32.xlu0 %v4118_v37, %s3452_s15 }
 0x15d   : > { %v898_v52 = vpop.permute.xlu2 %897  ;;  %v812_v53 = vpop.permute.xlu1 %811 }
 0x15e   : > { %994 = vst.msk [vmem:[#allocation2] sm:$0xff] %vm993_vm0, %v898_v52  ;;  %v810_v54 = vpop.permute.xlu0 %809 }
 0x15f   : > { %887 = vst.msk [vmem:[#allocation2 + $0xb1] sm:$0xff] %vm863_vm14, %v812_v53 }
 0x160   : > { %886 = vst.msk [vmem:[#allocation2 + $0xa9] sm:$0x7f] %vm865_vm15, %v810_v54 }
 0x163   : > { %1032 = vrot.lane.b32.xlu1 %v3542_v5, %s3453_s16  ;;  %1034 = vrot.lane.b32.xlu2 %v3524_v1, %s3453_s16 }
 0x164   : > { %1030 = vrot.lane.b32.xlu0 %v3527_v2, %s3453_s16 }
 0x165   : > { %v904_v55 = vpop.permute.xlu2 %903  ;;  %v818_v56 = vpop.permute.xlu1 %817 }
 0x166   : > { %997 = vst.msk [vmem:[#allocation2 + $0x18] sm:$0xff] %vm993_vm0, %v904_v55  ;;  %v816_v57 = vpop.permute.xlu0 %815 }
 0x167   : > { %890 = vst.msk [vmem:[#allocation2 + $0xc9] sm:$0x7f] %vm865_vm15, %v818_v56 }
 0x168   : > { %889 = vst.msk [vmem:[#allocation2 + $0xc1] sm:$0xff] %vm863_vm14, %v816_v57 }
 0x16b   : > { %1038 = vrot.lane.b32.xlu1 %v3560_v9, %s3453_s16  ;;  %1040 = vrot.lane.b32.xlu2 %v3557_v8, %s3453_s16 }
 0x16c   : > { %1036 = vrot.lane.b32.xlu0 %v3539_v4, %s3453_s16 }
 0x16d   : > { %v910_v58 = vpop.permute.xlu2 %909  ;;  %v824_v59 = vpop.permute.xlu1 %823 }
 0x16e   : > { %1000 = vst.msk [vmem:[#allocation2 + $0x30] sm:$0xff] %vm993_vm0, %v910_v58  ;;  %v822_v60 = vpop.permute.xlu0 %821 }
 0x16f   : > { %893 = vst.msk [vmem:[#allocation2 + $0xe1] sm:$0xff] %vm863_vm14, %v824_v59 }
 0x170   : > { %892 = vst.msk [vmem:[#allocation2 + $0xd9] sm:$0x7f] %vm865_vm15, %v822_v60 }
 0x173   : > { %1044 = vrot.lane.b32.xlu1 %v3575_v12, %s3453_s16  ;;  %1046 = vrot.lane.b32.xlu2 %v3572_v11, %s3453_s16 }
 0x174   : > { %1042 = vrot.lane.b32.xlu0 %v3554_v7, %s3453_s16 }
 0x175   : > { %v916_v61 = vpop.permute.xlu2 %915  ;;  %v830_v62 = vpop.permute.xlu1 %829 }
 0x176   : > { %1003 = vst.msk [vmem:[#allocation2 + $0x48] sm:$0xff] %vm993_vm0, %v916_v61  ;;  %v828_v63 = vpop.permute.xlu0 %827 }
 0x177   : > { %896 = vst.msk [vmem:[#allocation2 + $0xf9] sm:$0x7f] %vm865_vm15, %v830_v62 }
 0x178   : > { %895 = vst.msk [vmem:[#allocation2 + $0xf1] sm:$0xff] %vm863_vm14, %v828_v63 }
 0x17b   : > { %1050 = vrot.lane.b32.xlu1 %v3590_v15, %s3453_s16  ;;  %1052 = vrot.lane.b32.xlu2 %v3587_v14, %s3453_s16 }
 0x17c   : > { %1048 = vrot.lane.b32.xlu0 %v3569_v10, %s3453_s16 }
 0x17d   : > { %v922_v0 = vpop.permute.xlu2 %921  ;;  %v902_v32 = vpop.permute.xlu1 %901 }
 0x17e   : > { %1006 = vst.msk [vmem:[#allocation2 + $0x60] sm:$0xff] %vm993_vm0, %v922_v0  ;;  %v900_v33 = vpop.permute.xlu0 %899 }
 0x17f   : > { %996 = vst.msk [vmem:[#allocation2 + $0x10] sm:$0xff] %vm993_vm0, %v902_v32 }
 0x180   : > { %995 = vst.msk [vmem:[#allocation2 + $0x8] sm:$0xff] %vm993_vm0, %v900_v33 }
 0x183   : > { %1056 = vrot.lane.b32.xlu1 %v3605_v18, %s3453_s16  ;;  %1058 = vrot.lane.b32.xlu2 %v3602_v17, %s3453_s16 }
 0x184   : > { %1054 = vrot.lane.b32.xlu0 %v3584_v13, %s3453_s16 }
 0x185   : > { %v928_v34 = vpop.permute.xlu2 %927  ;;  %v908_v25 = vpop.permute.xlu1 %907 }
 0x186   : > { %1009 = vst.msk [vmem:[#allocation2 + $0x78] sm:$0xff] %vm993_vm0, %v928_v34  ;;  %v906_v35 = vpop.permute.xlu0 %905 }
 0x187   : > { %999 = vst.msk [vmem:[#allocation2 + $0x28] sm:$0xff] %vm993_vm0, %v908_v25 }
 0x188   : > { %998 = vst.msk [vmem:[#allocation2 + $0x20] sm:$0xff] %vm993_vm0, %v906_v35 }
 0x18b   : > { %1062 = vrot.lane.b32.xlu1 %v3620_v21, %s3453_s16  ;;  %1064 = vrot.lane.b32.xlu2 %v3617_v20, %s3453_s16 }
 0x18c   : > { %1060 = vrot.lane.b32.xlu0 %v3599_v16, %s3453_s16 }
 0x18d   : > { %v934_v36 = vpop.permute.xlu2 %933  ;;  %v914_v39 = vpop.permute.xlu1 %913 }
 0x18e   : > { %1012 = vst.msk [vmem:[#allocation2 + $0x90] sm:$0xff] %vm993_vm0, %v934_v36  ;;  %v912_v40 = vpop.permute.xlu0 %911 }
 0x18f   : > { %1002 = vst.msk [vmem:[#allocation2 + $0x40] sm:$0xff] %vm993_vm0, %v914_v39 }
 0x190   : > { %1001 = vst.msk [vmem:[#allocation2 + $0x38] sm:$0xff] %vm993_vm0, %v912_v40 }
 0x193   : > { %1068 = vrot.lane.b32.xlu1 %v3635_v24, %s3453_s16  ;;  %1070 = vrot.lane.b32.xlu2 %v3632_v23, %s3453_s16 }
 0x194   : > { %1066 = vrot.lane.b32.xlu0 %v3614_v19, %s3453_s16 }
 0x195   : > { %v940_v41 = vpop.permute.xlu2 %939  ;;  %v920_v42 = vpop.permute.xlu1 %919 }
 0x196   : > { %1015 = vst.msk [vmem:[#allocation2 + $0xa8] sm:$0xff] %vm993_vm0, %v940_v41  ;;  %v918_v43 = vpop.permute.xlu0 %917 }
 0x197   : > { %1005 = vst.msk [vmem:[#allocation2 + $0x58] sm:$0xff] %vm993_vm0, %v920_v42 }
 0x198   : > { %1004 = vst.msk [vmem:[#allocation2 + $0x50] sm:$0xff] %vm993_vm0, %v918_v43 }
 0x19b   : > { %1074 = vrot.lane.b32.xlu1 %v3658_v28, %s3453_s16  ;;  %1076 = vrot.lane.b32.xlu2 %v3653_v27, %s3453_s16 }
 0x19c   : > { %1072 = vrot.lane.b32.xlu0 %v3629_v22, %s3453_s16 }
 0x19d   : > { %v946_v44 = vpop.permute.xlu2 %945  ;;  %v926_v45 = vpop.permute.xlu1 %925 }
 0x19e   : > { %1018 = vst.msk [vmem:[#allocation2 + $0xc0] sm:$0xff] %vm993_vm0, %v946_v44  ;;  %v924_v46 = vpop.permute.xlu0 %923 }
 0x19f   : > { %1008 = vst.msk [vmem:[#allocation2 + $0x70] sm:$0xff] %vm993_vm0, %v926_v45 }
 0x1a0   : > { %1007 = vst.msk [vmem:[#allocation2 + $0x68] sm:$0xff] %vm993_vm0, %v924_v46 }
 0x1a3   : > { %1080 = vrot.lane.b32.xlu1 %v3689_v31, %s3453_s16  ;;  %1082 = vrot.lane.b32.xlu2 %v3684_v30, %s3453_s16 }
 0x1a4   : > { %1078 = vrot.lane.b32.xlu0 %v3650_v26, %s3453_s16 }
 0x1a5   : > { %v952_v47 = vpop.permute.xlu2 %951  ;;  %v932_v48 = vpop.permute.xlu1 %931 }
 0x1a6   : > { %1021 = vst.msk [vmem:[#allocation2 + $0xd8] sm:$0xff] %vm993_vm0, %v952_v47  ;;  %v930_v49 = vpop.permute.xlu0 %929 }
 0x1a7   : > { %1011 = vst.msk [vmem:[#allocation2 + $0x88] sm:$0xff] %vm993_vm0, %v932_v48 }
 0x1a8   : > { %1010 = vst.msk [vmem:[#allocation2 + $0x80] sm:$0xff] %vm993_vm0, %v930_v49 }
 0x1ab   : > { %1086 = vrot.lane.b32.xlu1 %v4121_v38, %s3453_s16  ;;  %1088 = vrot.lane.b32.xlu2 %v4118_v37, %s3453_s16 }
 0x1ac   : > { %1084 = vrot.lane.b32.xlu0 %v3681_v29, %s3453_s16 }
 0x1ad   : > { %v958_v50 = vpop.permute.xlu2 %957  ;;  %v938_v51 = vpop.permute.xlu1 %937 }
 0x1ae   : > { %1024 = vst.msk [vmem:[#allocation2 + $0xf0] sm:$0xff] %vm993_vm0, %v958_v50  ;;  %v936_v52 = vpop.permute.xlu0 %935 }
 0x1af   : > { %1014 = vst.msk [vmem:[#allocation2 + $0xa0] sm:$0xff] %vm993_vm0, %v938_v51 }
 0x1b0   : > { %1013 = vst.msk [vmem:[#allocation2 + $0x98] sm:$0xff] %vm993_vm0, %v936_v52 }
 0x1b3   : > { %1158 = vrot.lane.b32.xlu1 %v3542_v5, %s3454_s17  ;;  %1160 = vrot.lane.b32.xlu2 %v3524_v1, %s3454_s17 }
 0x1b4   : > { %1156 = vrot.lane.b32.xlu0 %v3527_v2, %s3454_s17 }
 0x1b5   : > { %v1029_v53 = vpop.permute.xlu2 %1028  ;;  %v944_v54 = vpop.permute.xlu1 %943 }
 0x1b6   : > { %1125 = vst.msk [vmem:[#allocation2 + $0x7] sm:$0xff] %vm1124_vm1, %v1029_v53  ;;  %v942_v55 = vpop.permute.xlu0 %941 }
 0x1b7   : > { %1017 = vst.msk [vmem:[#allocation2 + $0xb8] sm:$0xff] %vm993_vm0, %v944_v54 }
 0x1b8   : > { %1016 = vst.msk [vmem:[#allocation2 + $0xb0] sm:$0xff] %vm993_vm0, %v942_v55 }
 0x1bb   : > { %1164 = vrot.lane.b32.xlu1 %v3560_v9, %s3454_s17  ;;  %1166 = vrot.lane.b32.xlu2 %v3557_v8, %s3454_s17 }
 0x1bc   : > { %1162 = vrot.lane.b32.xlu0 %v3539_v4, %s3454_s17 }
 0x1bd   : > { %v1035_v56 = vpop.permute.xlu2 %1034  ;;  %v950_v57 = vpop.permute.xlu1 %949 }
 0x1be   : > { %1128 = vst.msk [vmem:[#allocation2 + $0x1f] sm:$0xfe] %vm1122_vm2, %v1035_v56  ;;  %v948_v58 = vpop.permute.xlu0 %947 }
 0x1bf   : > { %1020 = vst.msk [vmem:[#allocation2 + $0xd0] sm:$0xff] %vm993_vm0, %v950_v57 }
 0x1c0   : > { %1019 = vst.msk [vmem:[#allocation2 + $0xc8] sm:$0xff] %vm993_vm0, %v948_v58 }
 0x1c3   : > { %1170 = vrot.lane.b32.xlu1 %v3575_v12, %s3454_s17  ;;  %1172 = vrot.lane.b32.xlu2 %v3572_v11, %s3454_s17 }
 0x1c4   : > { %1168 = vrot.lane.b32.xlu0 %v3554_v7, %s3454_s17 }
 0x1c5   : > { %v1041_v59 = vpop.permute.xlu2 %1040  ;;  %v956_v60 = vpop.permute.xlu1 %955 }
 0x1c6   : > { %1131 = vst.msk [vmem:[#allocation2 + $0x37] sm:$0xff] %vm1124_vm1, %v1041_v59  ;;  %v954_v61 = vpop.permute.xlu0 %953 }
 0x1c7   : > { %1023 = vst.msk [vmem:[#allocation2 + $0xe8] sm:$0xff] %vm993_vm0, %v956_v60 }
 0x1c8   : > { %1022 = vst.msk [vmem:[#allocation2 + $0xe0] sm:$0xff] %vm993_vm0, %v954_v61 }
 0x1cb   : > { %1176 = vrot.lane.b32.xlu1 %v3590_v15, %s3454_s17  ;;  %1178 = vrot.lane.b32.xlu2 %v3587_v14, %s3454_s17 }
 0x1cc   : > { %1174 = vrot.lane.b32.xlu0 %v3569_v10, %s3454_s17 }
 0x1cd   : > { %v1047_v62 = vpop.permute.xlu2 %1046  ;;  %v1027_v63 = vpop.permute.xlu1 %1026 }
 0x1ce   : > { %1134 = vst.msk [vmem:[#allocation2 + $0x4f] sm:$0xfe] %vm1122_vm2, %v1047_v62  ;;  %v960_v0 = vpop.permute.xlu0 %959 }
 0x1cf   : > { %1123 = vst.msk [vmem:[#allocation2 - $0x1] sm:$0xfe] %vm1122_vm2, %v1027_v63 }
 0x1d0   : > { %1025 = vst.msk [vmem:[#allocation2 + $0xf8] sm:$0xff] %vm993_vm0, %v960_v0 }
 0x1d3   : > { %1182 = vrot.lane.b32.xlu1 %v3605_v18, %s3454_s17  ;;  %1184 = vrot.lane.b32.xlu2 %v3602_v17, %s3454_s17 }
 0x1d4   : > { %1180 = vrot.lane.b32.xlu0 %v3584_v13, %s3454_s17 }
 0x1d5   : > { %v1053_v32 = vpop.permute.xlu2 %1052  ;;  %v1033_v33 = vpop.permute.xlu1 %1032 }
 0x1d6   : > { %1137 = vst.msk [vmem:[#allocation2 + $0x67] sm:$0xff] %vm1124_vm1, %v1053_v32  ;;  %v1031_v34 = vpop.permute.xlu0 %1030 }
 0x1d7   : > { %1127 = vst.msk [vmem:[#allocation2 + $0x17] sm:$0xff] %vm1124_vm1, %v1033_v33 }
 0x1d8   : > { %1126 = vst.msk [vmem:[#allocation2 + $0xf] sm:$0xfe] %vm1122_vm2, %v1031_v34 }
 0x1db   : > { %1188 = vrot.lane.b32.xlu1 %v3620_v21, %s3454_s17  ;;  %1190 = vrot.lane.b32.xlu2 %v3617_v20, %s3454_s17 }
 0x1dc   : > { %1186 = vrot.lane.b32.xlu0 %v3599_v16, %s3454_s17 }
 0x1dd   : > { %v1059_v25 = vpop.permute.xlu2 %1058  ;;  %v1039_v35 = vpop.permute.xlu1 %1038 }
 0x1de   : > { %1140 = vst.msk [vmem:[#allocation2 + $0x7f] sm:$0xfe] %vm1122_vm2, %v1059_v25  ;;  %v1037_v36 = vpop.permute.xlu0 %1036 }
 0x1df   : > { %1130 = vst.msk [vmem:[#allocation2 + $0x2f] sm:$0xfe] %vm1122_vm2, %v1039_v35 }
 0x1e0   : > { %1129 = vst.msk [vmem:[#allocation2 + $0x27] sm:$0xff] %vm1124_vm1, %v1037_v36 }
 0x1e3   : > { %1194 = vrot.lane.b32.xlu1 %v3635_v24, %s3454_s17  ;;  %1196 = vrot.lane.b32.xlu2 %v3632_v23, %s3454_s17 }
 0x1e4   : > { %1192 = vrot.lane.b32.xlu0 %v3614_v19, %s3454_s17 }
 0x1e5   : > { %v1065_v39 = vpop.permute.xlu2 %1064  ;;  %v1045_v40 = vpop.permute.xlu1 %1044 }
 0x1e6   : > { %1143 = vst.msk [vmem:[#allocation2 + $0x97] sm:$0xff] %vm1124_vm1, %v1065_v39  ;;  %v1043_v41 = vpop.permute.xlu0 %1042 }
 0x1e7   : > { %1133 = vst.msk [vmem:[#allocation2 + $0x47] sm:$0xff] %vm1124_vm1, %v1045_v40 }
 0x1e8   : > { %1132 = vst.msk [vmem:[#allocation2 + $0x3f] sm:$0xfe] %vm1122_vm2, %v1043_v41 }
 0x1eb   : > { %1200 = vrot.lane.b32.xlu1 %v3658_v28, %s3454_s17  ;;  %1202 = vrot.lane.b32.xlu2 %v3653_v27, %s3454_s17 }
 0x1ec   : > { %1198 = vrot.lane.b32.xlu0 %v3629_v22, %s3454_s17 }
 0x1ed   : > { %v1071_v42 = vpop.permute.xlu2 %1070  ;;  %v1051_v43 = vpop.permute.xlu1 %1050 }
 0x1ee   : > { %1146 = vst.msk [vmem:[#allocation2 + $0xaf] sm:$0xfe] %vm1122_vm2, %v1071_v42  ;;  %v1049_v44 = vpop.permute.xlu0 %1048 }
 0x1ef   : > { %1136 = vst.msk [vmem:[#allocation2 + $0x5f] sm:$0xfe] %vm1122_vm2, %v1051_v43 }
 0x1f0   : > { %1135 = vst.msk [vmem:[#allocation2 + $0x57] sm:$0xff] %vm1124_vm1, %v1049_v44 }
 0x1f3   : > { %1206 = vrot.lane.b32.xlu1 %v3689_v31, %s3454_s17  ;;  %1208 = vrot.lane.b32.xlu2 %v3684_v30, %s3454_s17 }
 0x1f4   : > { %1204 = vrot.lane.b32.xlu0 %v3650_v26, %s3454_s17 }
 0x1f5   : > { %v1077_v45 = vpop.permute.xlu2 %1076  ;;  %v1057_v46 = vpop.permute.xlu1 %1056 }
 0x1f6   : > { %1149 = vst.msk [vmem:[#allocation2 + $0xc7] sm:$0xff] %vm1124_vm1, %v1077_v45  ;;  %v1055_v47 = vpop.permute.xlu0 %1054 }
 0x1f7   : > { %1139 = vst.msk [vmem:[#allocation2 + $0x77] sm:$0xff] %vm1124_vm1, %v1057_v46 }
 0x1f8   : > { %1138 = vst.msk [vmem:[#allocation2 + $0x6f] sm:$0xfe] %vm1122_vm2, %v1055_v47 }
 0x1fb   : > { %1212 = vrot.lane.b32.xlu1 %v4121_v38, %s3454_s17  ;;  %1214 = vrot.lane.b32.xlu2 %v4118_v37, %s3454_s17 }
 0x1fc   : > { %1210 = vrot.lane.b32.xlu0 %v3681_v29, %s3454_s17 }
 0x1fd   : > { %v1083_v48 = vpop.permute.xlu2 %1082  ;;  %v1063_v49 = vpop.permute.xlu1 %1062 }
 0x1fe   : > { %1152 = vst.msk [vmem:[#allocation2 + $0xdf] sm:$0xfe] %vm1122_vm2, %v1083_v48  ;;  %v1061_v50 = vpop.permute.xlu0 %1060 }
 0x1ff   : > { %1142 = vst.msk [vmem:[#allocation2 + $0x8f] sm:$0xfe] %vm1122_vm2, %v1063_v49 }
 0x200   : > { %1141 = vst.msk [vmem:[#allocation2 + $0x87] sm:$0xff] %vm1124_vm1, %v1061_v50 }
 0x203   : > { %1279 = vrot.lane.b32.xlu1 %v3542_v5, %s3455_s18  ;;  %1281 = vrot.lane.b32.xlu2 %v3524_v1, %s3455_s18 }
 0x204   : > { %1277 = vrot.lane.b32.xlu0 %v3527_v2, %s3455_s18 }
 0x205   : > { %v1089_v51 = vpop.permute.xlu2 %1088  ;;  %v1069_v52 = vpop.permute.xlu1 %1068 }
 0x206   : > { %1155 = vst.msk [vmem:[#allocation2 + $0xf7] sm:$0xff] %vm1124_vm1, %v1089_v51  ;;  %v1067_v53 = vpop.permute.xlu0 %1066 }
 0x207   : > { %1145 = vst.msk [vmem:[#allocation2 + $0xa7] sm:$0xff] %vm1124_vm1, %v1069_v52 }
 0x208   : > { %1144 = vst.msk [vmem:[#allocation2 + $0x9f] sm:$0xfe] %vm1122_vm2, %v1067_v53 }
 0x20b   : > { %1285 = vrot.lane.b32.xlu1 %v3560_v9, %s3455_s18  ;;  %1287 = vrot.lane.b32.xlu2 %v3557_v8, %s3455_s18 }
 0x20c   : > { %1283 = vrot.lane.b32.xlu0 %v3539_v4, %s3455_s18 }
 0x20d   : > { %v1161_v54 = vpop.permute.xlu2 %1160  ;;  %v1075_v55 = vpop.permute.xlu1 %1074 }
 0x20e   : > { %1249 = vst.msk [vmem:[#allocation2 + $0x11] sm:$0xff] %vm419_vm9, %v1161_v54  ;;  %v1073_v56 = vpop.permute.xlu0 %1072 }
 0x20f   : > { %1148 = vst.msk [vmem:[#allocation2 + $0xbf] sm:$0xfe] %vm1122_vm2, %v1075_v55 }
 0x210   : > { %1147 = vst.msk [vmem:[#allocation2 + $0xb7] sm:$0xff] %vm1124_vm1, %v1073_v56 }
 0x213   : > { %1291 = vrot.lane.b32.xlu1 %v3575_v12, %s3455_s18  ;;  %1293 = vrot.lane.b32.xlu2 %v3572_v11, %s3455_s18 }
 0x214   : > { %1289 = vrot.lane.b32.xlu0 %v3554_v7, %s3455_s18 }
 0x215   : > { %v1167_v57 = vpop.permute.xlu2 %1166  ;;  %v1081_v58 = vpop.permute.xlu1 %1080 }
 0x216   : > { %1252 = vst.msk [vmem:[#allocation2 + $0x29] sm:$0x7f] %vm5853_vm5, %v1167_v57  ;;  %v1079_v59 = vpop.permute.xlu0 %1078 }
 0x217   : > { %1151 = vst.msk [vmem:[#allocation2 + $0xd7] sm:$0xff] %vm1124_vm1, %v1081_v58 }
 0x218   : > { %1150 = vst.msk [vmem:[#allocation2 + $0xcf] sm:$0xfe] %vm1122_vm2, %v1079_v59 }
 0x21b   : > { %1297 = vrot.lane.b32.xlu1 %v3590_v15, %s3455_s18  ;;  %1299 = vrot.lane.b32.xlu2 %v3587_v14, %s3455_s18 }
 0x21c   : > { %1295 = vrot.lane.b32.xlu0 %v3569_v10, %s3455_s18 }
 0x21d   : > { %v1173_v60 = vpop.permute.xlu2 %1172  ;;  %v1087_v61 = vpop.permute.xlu1 %1086 }
 0x21e   : > { %1255 = vst.msk [vmem:[#allocation2 + $0x41] sm:$0xff] %vm419_vm9, %v1173_v60  ;;  %v1085_v62 = vpop.permute.xlu0 %1084 }
 0x21f   : > { %1154 = vst.msk [vmem:[#allocation2 + $0xef] sm:$0xfe] %vm1122_vm2, %v1087_v61 }
 0x220   : > { %1153 = vst.msk [vmem:[#allocation2 + $0xe7] sm:$0xff] %vm1124_vm1, %v1085_v62 }
 0x223   : > { %1303 = vrot.lane.b32.xlu1 %v3605_v18, %s3455_s18  ;;  %1305 = vrot.lane.b32.xlu2 %v3602_v17, %s3455_s18 }
 0x224   : > { %1301 = vrot.lane.b32.xlu0 %v3584_v13, %s3455_s18 }
 0x225   : > { %v1179_v63 = vpop.permute.xlu2 %1178  ;;  %v1159_v0 = vpop.permute.xlu1 %1158 }
 0x226   : > { %1258 = vst.msk [vmem:[#allocation2 + $0x59] sm:$0x7f] %vm5853_vm5, %v1179_v63  ;;  %v1157_v32 = vpop.permute.xlu0 %1156 }
 0x227   : > { %1248 = vst.msk [vmem:[#allocation2 + $0x9] sm:$0x7f] %vm5853_vm5, %v1159_v0 }
 0x228   : > { %1246 = vst.msk [vmem:[#allocation2 + $0x1] sm:$0xff] %vm419_vm9, %v1157_v32 }
 0x22b   : > { %1309 = vrot.lane.b32.xlu1 %v3620_v21, %s3455_s18  ;;  %1311 = vrot.lane.b32.xlu2 %v3617_v20, %s3455_s18 }
 0x22c   : > { %1307 = vrot.lane.b32.xlu0 %v3599_v16, %s3455_s18 }
 0x22d   : > { %v1185_v33 = vpop.permute.xlu2 %1184  ;;  %v1165_v34 = vpop.permute.xlu1 %1164 }
 0x22e   : > { %1261 = vst.msk [vmem:[#allocation2 + $0x71] sm:$0xff] %vm419_vm9, %v1185_v33  ;;  %v1163_v25 = vpop.permute.xlu0 %1162 }
 0x22f   : > { %1251 = vst.msk [vmem:[#allocation2 + $0x21] sm:$0xff] %vm419_vm9, %v1165_v34 }
 0x230   : > { %1250 = vst.msk [vmem:[#allocation2 + $0x19] sm:$0x7f] %vm5853_vm5, %v1163_v25 }
 0x233   : > { %1315 = vrot.lane.b32.xlu1 %v3635_v24, %s3455_s18  ;;  %1317 = vrot.lane.b32.xlu2 %v3632_v23, %s3455_s18 }
 0x234   : > { %1313 = vrot.lane.b32.xlu0 %v3614_v19, %s3455_s18 }
 0x235   : > { %v1191_v35 = vpop.permute.xlu2 %1190  ;;  %v1171_v36 = vpop.permute.xlu1 %1170 }
 0x236   : > { %1264 = vst.msk [vmem:[#allocation2 + $0x89] sm:$0x7f] %vm5853_vm5, %v1191_v35  ;;  %v1169_v39 = vpop.permute.xlu0 %1168 }
 0x237   : > { %1254 = vst.msk [vmem:[#allocation2 + $0x39] sm:$0x7f] %vm5853_vm5, %v1171_v36 }
 0x238   : > { %1253 = vst.msk [vmem:[#allocation2 + $0x31] sm:$0xff] %vm419_vm9, %v1169_v39 }
 0x23b   : > { %1321 = vrot.lane.b32.xlu1 %v3658_v28, %s3455_s18  ;;  %1323 = vrot.lane.b32.xlu2 %v3653_v27, %s3455_s18 }
 0x23c   : > { %1319 = vrot.lane.b32.xlu0 %v3629_v22, %s3455_s18 }
 0x23d   : > { %v1197_v40 = vpop.permute.xlu2 %1196  ;;  %v1177_v41 = vpop.permute.xlu1 %1176 }
 0x23e   : > { %1267 = vst.msk [vmem:[#allocation2 + $0xa1] sm:$0xff] %vm419_vm9, %v1197_v40  ;;  %v1175_v42 = vpop.permute.xlu0 %1174 }
 0x23f   : > { %1257 = vst.msk [vmem:[#allocation2 + $0x51] sm:$0xff] %vm419_vm9, %v1177_v41 }
 0x240   : > { %1256 = vst.msk [vmem:[#allocation2 + $0x49] sm:$0x7f] %vm5853_vm5, %v1175_v42 }
 0x243   : > { %1327 = vrot.lane.b32.xlu1 %v3689_v31, %s3455_s18  ;;  %1329 = vrot.lane.b32.xlu2 %v3684_v30, %s3455_s18 }
 0x244   : > { %1325 = vrot.lane.b32.xlu0 %v3650_v26, %s3455_s18 }
 0x245   : > { %v1203_v43 = vpop.permute.xlu2 %1202  ;;  %v1183_v44 = vpop.permute.xlu1 %1182 }
 0x246   : > { %1270 = vst.msk [vmem:[#allocation2 + $0xb9] sm:$0x7f] %vm5853_vm5, %v1203_v43  ;;  %v1181_v45 = vpop.permute.xlu0 %1180 }
 0x247   : > { %1260 = vst.msk [vmem:[#allocation2 + $0x69] sm:$0x7f] %vm5853_vm5, %v1183_v44 }
 0x248   : > { %1259 = vst.msk [vmem:[#allocation2 + $0x61] sm:$0xff] %vm419_vm9, %v1181_v45  ;;  %v1570_v45 = vld [vmem:[%s5845_s1 + $0x10] sm:$0x3] }
 0x24b   : > { %1333 = vrot.lane.b32.xlu1 %v4121_v38, %s3455_s18  ;;  %1335 = vrot.lane.b32.xlu2 %v4118_v37, %s3455_s18 }
 0x24c   : > { %1331 = vrot.lane.b32.xlu0 %v3681_v29, %s3455_s18 }
 0x24d   : > { %v1209_v46 = vpop.permute.xlu2 %1208  ;;  %v1189_v47 = vpop.permute.xlu1 %1188 }
 0x24e   : > { %1273 = vst.msk [vmem:[#allocation2 + $0xd1] sm:$0xff] %vm419_vm9, %v1209_v46  ;;  %v1187_v48 = vpop.permute.xlu0 %1186 }
 0x24f   : > { %1263 = vst.msk [vmem:[#allocation2 + $0x81] sm:$0xff] %vm419_vm9, %v1189_v47  ;;  %v1580_v47 = vunpack.c.l.b16 %v1570_v45 }
 0x250   : > { %1262 = vst.msk [vmem:[#allocation2 + $0x79] sm:$0x7f] %vm5853_vm5, %v1187_v48 }
 0x253   : > { %1399 = vrot.lane.b32.xlu1 %v3542_v5, %s3456_s19  ;;  %1401 = vrot.lane.b32.xlu2 %v3524_v1, %s3456_s19 }
 0x254   : > { %1397 = vrot.lane.b32.xlu0 %v3527_v2, %s3456_s19 }
 0x255   : > { %v1215_v49 = vpop.permute.xlu2 %1214  ;;  %v1195_v50 = vpop.permute.xlu1 %1194 }
 0x256   : > { %1276 = vst.msk [vmem:[#allocation2 + $0xe9] sm:$0x7f] %vm5853_vm5, %v1215_v49  ;;  %v1193_v51 = vpop.permute.xlu0 %1192  ;;  %v1583_v49 = vpack.c.b16 %v1580_v47, %v1580_v47 }
 0x257   : > { %1266 = vst.msk [vmem:[#allocation2 + $0x99] sm:$0x7f] %vm5853_vm5, %v1195_v50 }
 0x258   : > { %1265 = vst.msk [vmem:[#allocation2 + $0x91] sm:$0xff] %vm419_vm9, %v1193_v51  ;;  %v1637_v50 = vsel %vm1635_vm6, %v1583_v49, 0 }
 0x259   : > { %1644 = vmatpush.bf16.msra.mxu0 %v1637_v50  ;;  %3409 = vmatpush.bf16.msra.mxu2 %v1637_v50 }
 0x25b   : > { %1405 = vrot.lane.b32.xlu1 %v3560_v9, %s3456_s19  ;;  %1407 = vrot.lane.b32.xlu2 %v3557_v8, %s3456_s19 }
 0x25c   : > { %1403 = vrot.lane.b32.xlu0 %v3539_v4, %s3456_s19 }
 0x25d   : > { %v1282_v52 = vpop.permute.xlu2 %1281  ;;  %v1201_v53 = vpop.permute.xlu1 %1200 }
 0x25e   : > { %1369 = vst.msk [vmem:[#allocation2 + $0x10] sm:$0xff] %vm439_vm10, %v1282_v52  ;;  %v1199_v54 = vpop.permute.xlu0 %1198  ;;  %v3406_v52 = vld [vmem:[%s5845_s1 + $0x8] sm:$0xff] }
 0x25f   : > { %1269 = vst.msk [vmem:[#allocation2 + $0xb1] sm:$0xff] %vm419_vm9, %v1201_v53  ;;  %1645 = vmatpush.bf16.msra.mxu0 %v3406_v52  ;;  %3410 = vmatpush.bf16.msra.mxu2 %v3406_v52 }
 0x260   : > { %1268 = vst.msk [vmem:[#allocation2 + $0xa9] sm:$0x7f] %vm5853_vm5, %v1199_v54 }
 0x263   : > { %1411 = vrot.lane.b32.xlu1 %v3575_v12, %s3456_s19  ;;  %1413 = vrot.lane.b32.xlu2 %v3572_v11, %s3456_s19 }
 0x264   : > { %1409 = vrot.lane.b32.xlu0 %v3554_v7, %s3456_s19 }
 0x265   : > { %v1288_v55 = vpop.permute.xlu2 %1287  ;;  %v1207_v56 = vpop.permute.xlu1 %1206 }
 0x266   : > { %1372 = vst.msk [vmem:[#allocation2 + $0x28] sm:$0xff] %vm439_vm10, %v1288_v55  ;;  %v1205_v57 = vpop.permute.xlu0 %1204  ;;  %v3405_v55 = vld [vmem:[%s5845_s1] sm:$0xff] }
 0x267   : > { %1272 = vst.msk [vmem:[#allocation2 + $0xc9] sm:$0x7f] %vm5853_vm5, %v1207_v56  ;;  %1646 = vmatpush.bf16.msra.mxu0 %v3405_v55  ;;  %3411 = vmatpush.bf16.msra.mxu2 %v3405_v55 }
 0x268   : > { %1271 = vst.msk [vmem:[#allocation2 + $0xc1] sm:$0xff] %vm419_vm9, %v1205_v57 }
 0x26b   : > { %1417 = vrot.lane.b32.xlu1 %v3590_v15, %s3456_s19  ;;  %1419 = vrot.lane.b32.xlu2 %v3587_v14, %s3456_s19 }
 0x26c   : > { %1415 = vrot.lane.b32.xlu0 %v3569_v10, %s3456_s19 }
 0x26d   : > { %v1294_v58 = vpop.permute.xlu2 %1293  ;;  %v1213_v59 = vpop.permute.xlu1 %1212 }
 0x26e   : > { %1375 = vst.msk [vmem:[#allocation2 + $0x40] sm:$0xff] %vm439_vm10, %v1294_v58  ;;  %v1211_v60 = vpop.permute.xlu0 %1210 }
 0x26f   : > { %1275 = vst.msk [vmem:[#allocation2 + $0xe1] sm:$0xff] %vm419_vm9, %v1213_v59 }
 0x270   : > { %1274 = vst.msk [vmem:[#allocation2 + $0xd9] sm:$0x7f] %vm5853_vm5, %v1211_v60  ;;  %vm1586_vm5 = vcmask 293888  }
 0x273   : > { %1423 = vrot.lane.b32.xlu1 %v3605_v18, %s3456_s19  ;;  %1425 = vrot.lane.b32.xlu2 %v3602_v17, %s3456_s19 }
 0x274   : > { %1421 = vrot.lane.b32.xlu0 %v3584_v13, %s3456_s19 }
 0x275   : > { %v1300_v61 = vpop.permute.xlu2 %1299  ;;  %v1280_v62 = vpop.permute.xlu1 %1279 }
 0x276   : > { %1378 = vst.msk [vmem:[#allocation2 + $0x58] sm:$0xff] %vm439_vm10, %v1300_v61  ;;  %v1278_v63 = vpop.permute.xlu0 %1277 }
 0x277   : > { %1368 = vst.msk [vmem:[#allocation2 + $0x8] sm:$0xff] %vm439_vm10, %v1280_v62 }
 0x278   : > { %1367 = vst.msk [vmem:[#allocation2] sm:$0xff] %vm439_vm10, %v1278_v63 }
 0x27b   : > { %1429 = vrot.lane.b32.xlu1 %v3620_v21, %s3456_s19  ;;  %1431 = vrot.lane.b32.xlu2 %v3617_v20, %s3456_s19 }
 0x27c   : > { %1427 = vrot.lane.b32.xlu0 %v3599_v16, %s3456_s19 }
 0x27d   : > { %v1306_v0 = vpop.permute.xlu2 %1305  ;;  %v1286_v32 = vpop.permute.xlu1 %1285 }
 0x27e   : > { %1381 = vst.msk [vmem:[#allocation2 + $0x70] sm:$0xff] %vm439_vm10, %v1306_v0  ;;  %v1284_v33 = vpop.permute.xlu0 %1283 }
 0x27f   : > { %1371 = vst.msk [vmem:[#allocation2 + $0x20] sm:$0xff] %vm439_vm10, %v1286_v32 }
 0x280   : > { %1370 = vst.msk [vmem:[#allocation2 + $0x18] sm:$0xff] %vm439_vm10, %v1284_v33 }
 0x283   : > { %1435 = vrot.lane.b32.xlu1 %v3635_v24, %s3456_s19  ;;  %1437 = vrot.lane.b32.xlu2 %v3632_v23, %s3456_s19 }
 0x284   : > { %1433 = vrot.lane.b32.xlu0 %v3614_v19, %s3456_s19 }
 0x285   : > { %v1312_v34 = vpop.permute.xlu2 %1311  ;;  %v1292_v25 = vpop.permute.xlu1 %1291 }
 0x286   : > { %1384 = vst.msk [vmem:[#allocation2 + $0x88] sm:$0xff] %vm439_vm10, %v1312_v34 }
 0x287   : > { %1374 = vst.msk [vmem:[#allocation2 + $0x38] sm:$0xff] %vm439_vm10, %v1292_v25 }
 0x28b   : > { %1441 = vrot.lane.b32.xlu1 %v3658_v28, %s3456_s19  ;;  %1443 = vrot.lane.b32.xlu2 %v3653_v27, %s3456_s19 }
 0x28c   : > { %1439 = vrot.lane.b32.xlu0 %v3629_v22, %s3456_s19 }
 0x28d   : > { %v1298_v35 = vpop.permute.xlu1 %1297 }
 0x28e   : > { %1377 = vst.msk [vmem:[#allocation2 + $0x50] sm:$0xff] %vm439_vm10, %v1298_v35 }
 0x293   : > { %1447 = vrot.lane.b32.xlu1 %v3689_v31, %s3456_s19  ;;  %1449 = vrot.lane.b32.xlu2 %v3684_v30, %s3456_s19 }
 0x294   : > { %1445 = vrot.lane.b32.xlu0 %v3650_v26, %s3456_s19 }
 0x295   : > { %v1304_v40 = vpop.permute.xlu1 %1303 }
 0x296   : > { %1380 = vst.msk [vmem:[#allocation2 + $0x68] sm:$0xff] %vm439_vm10, %v1304_v40 }
 0x29b   : > { %1453 = vrot.lane.b32.xlu1 %v4121_v38, %s3456_s19  ;;  %1455 = vrot.lane.b32.xlu2 %v4118_v37, %s3456_s19  ;;  %v1290_v38 = vpop.permute.xlu0 %1289  ;;  %v1318_v37 = vpop.permute.xlu2 %1317 }
 0x29c   : > { %1451 = vrot.lane.b32.xlu0 %v3681_v29, %s3456_s19  ;;  %1373 = vst.msk [vmem:[#allocation2 + $0x30] sm:$0xff] %vm439_vm10, %v1290_v38 }
 0x29d   : > { %1387 = vst.msk [vmem:[#allocation2 + $0xa0] sm:$0xff] %vm439_vm10, %v1318_v37  ;;  %v1310_v43 = vpop.permute.xlu1 %1309 }
 0x29e   : > { %1383 = vst.msk [vmem:[#allocation2 + $0x80] sm:$0xff] %vm439_vm10, %v1310_v43 }
 0x2a3   : > { %v1296_v36 = vpop.permute.xlu0 %1295  ;;  %v1324_v39 = vpop.permute.xlu2 %1323 }
 0x2a4   : > { %1376 = vst.msk [vmem:[#allocation2 + $0x48] sm:$0xff] %vm439_vm10, %v1296_v36 }
 0x2a5   : > { %1390 = vst.msk [vmem:[#allocation2 + $0xb8] sm:$0xff] %vm439_vm10, %v1324_v39  ;;  %v1316_v48 = vpop.permute.xlu1 %1315 }
 0x2a6   : > { %1386 = vst.msk [vmem:[#allocation2 + $0x98] sm:$0xff] %vm439_vm10, %v1316_v48 }
 0x2ab   : > { %v1302_v41 = vpop.permute.xlu0 %1301  ;;  %v1330_v42 = vpop.permute.xlu2 %1329 }
 0x2ac   : > { %1379 = vst.msk [vmem:[#allocation2 + $0x60] sm:$0xff] %vm439_vm10, %v1302_v41 }
 0x2ad   : > { %1393 = vst.msk [vmem:[#allocation2 + $0xd0] sm:$0xff] %vm439_vm10, %v1330_v42  ;;  %v1322_v54 = vpop.permute.xlu1 %1321 }
 0x2ae   : > { %1389 = vst.msk [vmem:[#allocation2 + $0xb0] sm:$0xff] %vm439_vm10, %v1322_v54 }
 0x2b3   : > { %v1308_v44 = vpop.permute.xlu0 %1307  ;;  %v1336_v46 = vpop.permute.xlu2 %1335 }
 0x2b4   : > { %1382 = vst.msk [vmem:[#allocation2 + $0x78] sm:$0xff] %vm439_vm10, %v1308_v44 }
 0x2b5   : > { %1396 = vst.msk [vmem:[#allocation2 + $0xe8] sm:$0xff] %vm439_vm10, %v1336_v46  ;;  %v1328_v58 = vpop.permute.xlu1 %1327 }
 0x2b6   : > { %1392 = vst.msk [vmem:[#allocation2 + $0xc8] sm:$0xff] %vm439_vm10, %v1328_v58 }
 0x2bb   : > { %v1314_v51 = vpop.permute.xlu0 %1313  ;;  %v1402_v53 = vpop.permute.xlu2 %1401 }
 0x2bc   : > { %1385 = vst.msk [vmem:[#allocation2 + $0x90] sm:$0xff] %vm439_vm10, %v1314_v51 }
 0x2bd   : > { %1490 = vst.msk [vmem:[#allocation2 + $0xf] sm:$0xfe] %vm5854_vm7, %v1402_v53  ;;  %v1334_v61 = vpop.permute.xlu1 %1333 }
 0x2be   : > { %1395 = vst.msk [vmem:[#allocation2 + $0xe0] sm:$0xff] %vm439_vm10, %v1334_v61  ;;  %v1800_v61 = vld [vmem:[#allocation3] sm:$0x1] }
 0x2bf   : > { %3415 = vpush %v1800_v61 }
 0x2c3   : > { %v1320_v56 = vpop.permute.xlu0 %1319  ;;  %v1408_v57 = vpop.permute.xlu2 %1407 }
 0x2c4   : > { %1388 = vst.msk [vmem:[#allocation2 + $0xa8] sm:$0xff] %vm439_vm10, %v1320_v56 }
 0x2c5   : > { %1493 = vst.msk [vmem:[#allocation2 + $0x27] sm:$0xff] %vm5855_vm11, %v1408_v57  ;;  %v1400_v0 = vpop.permute.xlu1 %1399 }
 0x2c6   : > { %1489 = vst.msk [vmem:[#allocation2 + $0x7] sm:$0xff] %vm5855_vm11, %v1400_v0 }
 0x2cb   : > { %v1326_v59 = vpop.permute.xlu0 %1325  ;;  %v1414_v60 = vpop.permute.xlu2 %1413 }
 0x2cc   : > { %1391 = vst.msk [vmem:[#allocation2 + $0xc0] sm:$0xff] %vm439_vm10, %v1326_v59  ;;  %v1523_v54 = vld [vmem:[#allocation2 + $0x28] sm:$0xff] }
 0x2cd   : > { %1496 = vst.msk [vmem:[#allocation2 + $0x3f] sm:$0xfe] %vm5854_vm7, %v1414_v60  ;;  %v1406_v34 = vpop.permute.xlu1 %1405  ;;  %v1519_v25 = vld [vmem:[#allocation2 + $0x8] sm:$0xff] }
 0x2ce   : > { %1492 = vst.msk [vmem:[#allocation2 + $0x1f] sm:$0xfe] %vm5854_vm7, %v1406_v34 }
 0x2d3   : > { %v1332_v62 = vpop.permute.xlu0 %1331  ;;  %v1420_v63 = vpop.permute.xlu2 %1419 }
 0x2d4   : > { %1394 = vst.msk [vmem:[#allocation2 + $0xd8] sm:$0xff] %vm439_vm10, %v1332_v62 }
 0x2d5   : > { %1499 = vst.msk [vmem:[#allocation2 + $0x57] sm:$0xff] %vm5855_vm11, %v1420_v63  ;;  %v1412_v39 = vpop.permute.xlu1 %1411  ;;  %v1522_v52 = vld [vmem:[#allocation2 + $0x20] sm:$0xff] }
 0x2d6   : > { %1495 = vst.msk [vmem:[#allocation2 + $0x37] sm:$0xff] %vm5855_vm11, %v1412_v39  ;;  %v1552_v55 = vpack.c.bf16 %v1523_v54, %v1522_v52 }
 0x2db   : > { %v1398_v32 = vpop.permute.xlu0 %1397  ;;  %v1426_v33 = vpop.permute.xlu2 %1425 }
 0x2dc   : > { %1488 = vst.msk [vmem:[#allocation2 - $0x1] sm:$0xfe] %vm5854_vm7, %v1398_v32 }
 0x2dd   : > { %1502 = vst.msk [vmem:[#allocation2 + $0x6f] sm:$0xfe] %vm5854_vm7, %v1426_v33  ;;  %v1418_v42 = vpop.permute.xlu1 %1417  ;;  %v1525_v32 = vld [vmem:[#allocation2 + $0x38] sm:$0xff] }
 0x2de   : > { %1498 = vst.msk [vmem:[#allocation2 + $0x4f] sm:$0xfe] %vm5854_vm7, %v1418_v42 }
 0x2e3   : > { %v1404_v38 = vpop.permute.xlu0 %1403  ;;  %v1518_v37 = vld [vmem:[#allocation2] sm:$0xff]  ;;  %v1432_v36 = vpop.permute.xlu2 %1431 }
 0x2e4   : > { %1491 = vst.msk [vmem:[#allocation2 + $0x17] sm:$0xff] %vm5855_vm11, %v1404_v38  ;;  %v1550_v35 = vpack.c.bf16 %v1519_v25, %v1518_v37 }
 0x2e5   : > { %1505 = vst.msk [vmem:[#allocation2 + $0x87] sm:$0xff] %vm5855_vm11, %v1432_v36  ;;  %v1424_v48 = vpop.permute.xlu1 %1423 }
 0x2e6   : > { %3361 = vmatmul.msk.bf16.vlgmr.msra.gmra.mxu0 %vm1586_vm5, %v1550_v35  ;;  %1501 = vst.msk [vmem:[#allocation2 + $0x67] sm:$0xff] %vm5855_vm11, %v1424_v48  ;;  %v1529_v48 = vld [vmem:[#allocation2 + $0x58] sm:$0xff] }
 0x2eb   : > { %v1410_v40 = vpop.permute.xlu0 %1409  ;;  %v1438_v41 = vpop.permute.xlu2 %1437  ;;  %v1520_v43 = vld [vmem:[#allocation2 + $0x10] sm:$0xff]  ;;  %v1521_v44 = vld [vmem:[#allocation2 + $0x18] sm:$0xff] }
 0x2ec   : > { %1494 = vst.msk [vmem:[#allocation2 + $0x2f] sm:$0xfe] %vm5854_vm7, %v1410_v40  ;;  %v1551_v46 = vpack.c.bf16 %v1521_v44, %v1520_v43  ;;  %v1535_v59 = vld [vmem:[#allocation2 + $0x88] sm:$0xff] }
 0x2ed   : > { %1508 = vst.msk [vmem:[#allocation2 + $0x9f] sm:$0xfe] %vm5854_vm7, %v1438_v41  ;;  %v1430_v51 = vpop.permute.xlu1 %1429  ;;  %v1531_v54 = vld [vmem:[#allocation2 + $0x68] sm:$0xff] }
 0x2ee   : > { %1504 = vst.msk [vmem:[#allocation2 + $0x7f] sm:$0xfe] %vm5854_vm7, %v1430_v51 }
 0x2f0   : > { %s3416_s10 = spop %3415 }
 0x2f3   : > { %v1416_v45 = vpop.permute.xlu0 %1415  ;;  %v1444_v47 = vpop.permute.xlu2 %1443  ;;  %v1524_v0 = vld [vmem:[#allocation2 + $0x30] sm:$0xff] }
 0x2f4   : > { %1497 = vst.msk [vmem:[#allocation2 + $0x47] sm:$0xff] %vm5855_vm11, %v1416_v45  ;;  %v1553_v34 = vpack.c.bf16 %v1525_v32, %v1524_v0  ;;  %v4669_v32 = vld [vmem:[%s5846_s2] ss:$0 sm:$0xff] }
 0x2f5   : > { %1511 = vst.msk [vmem:[#allocation2 + $0xb7] sm:$0xff] %vm5855_vm11, %v1444_v47  ;;  %v1436_v57 = vpop.permute.xlu1 %1435  ;;  %v1534_v58 = vld [vmem:[#allocation2 + $0x80] sm:$0xff]  ;;  %v1528_v47 = vld [vmem:[#allocation2 + $0x50] sm:$0xff] }
 0x2f6   : > { %3362 = vmatmul.msk.bf16.gmra.mxu0 %vm1586_vm5, %v1551_v46  ;;  %1507 = vst.msk [vmem:[#allocation2 + $0x97] sm:$0xff] %vm5855_vm11, %v1436_v57  ;;  %v1558_v60 = vpack.c.bf16 %v1535_v59, %v1534_v58 }
 0x2f8   : > { %3369 = vmatmul.msk.bf16.vlgmr.msra.gmra.mxu2 %vm1586_vm5, %v1558_v60 }
 0x2fb   : > { %v1422_v49 = vpop.permute.xlu0 %1421  ;;  %v1450_v50 = vpop.permute.xlu2 %1449  ;;  %v1526_v40 = vld [vmem:[#allocation2 + $0x40] sm:$0xff]  ;;  %v1527_v41 = vld [vmem:[#allocation2 + $0x48] sm:$0xff] }
 0x2fc   : > { %1500 = vst.msk [vmem:[#allocation2 + $0x5f] sm:$0xfe] %vm5854_vm7, %v1422_v49  ;;  %v1554_v43 = vpack.c.bf16 %v1527_v41, %v1526_v40  ;;  %v1555_v49 = vpack.c.bf16 %v1529_v48, %v1528_v47  ;;  %v1541_v51 = vld [vmem:[#allocation2 + $0xb8] sm:$0xff] }
 0x2fd   : > { %1514 = vst.msk [vmem:[#allocation2 + $0xcf] sm:$0xfe] %vm5854_vm7, %v1450_v50  ;;  %v1442_v63 = vpop.permute.xlu1 %1441  ;;  %v1537_v38 = vld [vmem:[#allocation2 + $0x98] sm:$0xff] }
 0x2fe   : > { %1510 = vst.msk [vmem:[#allocation2 + $0xaf] sm:$0xfe] %vm5854_vm7, %v1442_v63 }
 0x303   : > { %v1428_v53 = vpop.permute.xlu0 %1427  ;;  %v1456_v56 = vpop.permute.xlu2 %1455 }
 0x304   : > { %1503 = vst.msk [vmem:[#allocation2 + $0x77] sm:$0xff] %vm5855_vm11, %v1428_v53  ;;  %v1530_v53 = vld [vmem:[#allocation2 + $0x60] sm:$0xff] }
 0x305   : > { %1517 = vst.msk [vmem:[#allocation2 + $0xe7] sm:$0xff] %vm5855_vm11, %v1456_v56  ;;  %v1448_v37 = vpop.permute.xlu1 %1447  ;;  %v1540_v50 = vld [vmem:[#allocation2 + $0xb0] sm:$0xff] }
 0x306   : > { %3363 = vmatmul.msk.bf16.gmra.mxu0 %vm1586_vm5, %v1552_v55  ;;  %1513 = vst.msk [vmem:[#allocation2 + $0xc7] sm:$0xff] %vm5855_vm11, %v1448_v37  ;;  %v1561_v52 = vpack.c.bf16 %v1541_v51, %v1540_v50  ;;  %v1556_v55 = vpack.c.bf16 %v1531_v54, %v1530_v53  ;;  %v4677_v37 = vstv %s3416_s10  ;;  %v1549_v51 = vld [vmem:[#allocation2 + $0xf8] sm:$0xff] }
 0x30b   : > { %v1434_v62 = vpop.permute.xlu0 %1433  ;;  %v1532_v59 = vld [vmem:[#allocation2 + $0x70] sm:$0xff]  ;;  %v1533_v60 = vld [vmem:[#allocation2 + $0x78] sm:$0xff] }
 0x30c   : > { %1506 = vst.msk [vmem:[#allocation2 + $0x8f] sm:$0xfe] %vm5854_vm7, %v1434_v62  ;;  %v1557_v61 = vpack.c.bf16 %v1533_v60, %v1532_v59 }
 0x30d   : > { %v1454_v39 = vpop.permute.xlu1 %1453  ;;  %v1543_v57 = vld [vmem:[#allocation2 + $0xc8] sm:$0xff] }
 0x30e   : > { %1516 = vst.msk [vmem:[#allocation2 + $0xdf] sm:$0xfe] %vm5854_vm7, %v1454_v39 }
 0x313   : > { %v1440_v33 = vpop.permute.xlu0 %1439  ;;  %v1536_v25 = vld [vmem:[#allocation2 + $0x90] sm:$0xff] }
 0x314   : > { %1509 = vst.msk [vmem:[#allocation2 + $0xa7] sm:$0xff] %vm5855_vm11, %v1440_v33  ;;  %v1559_v35 = vpack.c.bf16 %v1537_v38, %v1536_v25  ;;  %v4674_v33 = vld [vmem:[%s5847_s3] ss:$0 sm:$0xff] }
 0x315   : > { %v1546_v38 = vld [vmem:[#allocation2 + $0xe0] sm:$0xff] }
 0x316   : > { %3364 = vmatmul.msk.bf16.gmra.mxu0 %vm1586_vm5, %v1553_v34  ;;  %3370 = vmatmul.msk.bf16.gmra.mxu2 %vm1586_vm5, %v1559_v35 }
 0x31b   : > { %v1446_v36 = vpop.permute.xlu0 %1445  ;;  %v1538_v44 = vld [vmem:[#allocation2 + $0xa0] sm:$0xff]  ;;  %v1539_v45 = vld [vmem:[#allocation2 + $0xa8] sm:$0xff] }
 0x31c   : > { %1512 = vst.msk [vmem:[#allocation2 + $0xbf] sm:$0xfe] %vm5854_vm7, %v1446_v36  ;;  %v1560_v46 = vpack.c.bf16 %v1539_v45, %v1538_v44  ;;  %v1547_v36 = vld [vmem:[#allocation2 + $0xe8] sm:$0xff] }
 0x31d   : > { %v1564_v39 = vpack.c.bf16 %v1547_v36, %v1546_v38 }
 0x323   : > { %v1452_v42 = vpop.permute.xlu0 %1451  ;;  %v1542_v56 = vld [vmem:[#allocation2 + $0xc0] sm:$0xff] }
 0x324   : > { %1515 = vst.msk [vmem:[#allocation2 + $0xd7] sm:$0xff] %vm5855_vm11, %v1452_v42  ;;  %v1562_v58 = vpack.c.bf16 %v1543_v57, %v1542_v56 }
 0x326   : > { %3365 = vmatmul.msk.bf16.gmra.mxu0 %vm1586_vm5, %v1554_v43  ;;  %3371 = vmatmul.msk.bf16.gmra.mxu2 %vm1586_vm5, %v1560_v46 }
 0x32b   : > { %v1544_v62 = vld [vmem:[#allocation2 + $0xd0] sm:$0xff]  ;;  %v1545_v63 = vld [vmem:[#allocation2 + $0xd8] sm:$0xff] }
 0x32c   : > { %v1563_v0 = vpack.c.bf16 %v1545_v63, %v1544_v62 }
 0x336   : > { %3366 = vmatmul.msk.bf16.gmra.mxu0 %vm1586_vm5, %v1555_v49  ;;  %3372 = vmatmul.msk.bf16.gmra.mxu2 %vm1586_vm5, %v1561_v52  ;;  %v1548_v49 = vld [vmem:[#allocation2 + $0xf0] sm:$0xff] }
 0x337   : > { %v1565_v52 = vpack.c.bf16 %v1549_v51, %v1548_v49 }
 0x346   : > { %3367 = vmatmul.msk.bf16.gmra.mxu0 %vm1586_vm5, %v1556_v55  ;;  %3373 = vmatmul.msk.bf16.gmra.mxu2 %vm1586_vm5, %v1562_v58 }
 0x356   : > { %3368 = vmatmul.msk.bf16.gmra.mxu0 %vm1586_vm5, %v1557_v61  ;;  %3374 = vmatmul.msk.bf16.gmra.mxu2 %vm1586_vm5, %v1563_v0 }
 0x363   : > { %v1648_v34 = vpop.f32.mrf.mxu0 }
 0x364   : > { %v1732_v25 = vmul.f32 %v4669_v32, %v1648_v34 }
 0x366   : > { %v1768_v35 = vadd.f32 %v4674_v33, %v1732_v25  ;;  %3375 = vmatmul.msk.bf16.gmra.mxu2 %vm1586_vm5, %v1564_v39 }
 0x368   : > { %vm1802_vm7 = vcmp.gt.f32.partialorder %v1768_v35, 0.0  ;;  %v1835_v40 = vmul.f32 %v4677_v37, %v1768_v35 }
 0x36a   : > { %v4682_v41 = vsel %vm1802_vm7, %v1768_v35, %v1835_v40 }
 0x36b   : > { %1959 = vrot.lane.b32.xlu0 %v4682_v41, %s3448_s12  ;;  %1899 = vst.msk [vmem:[#allocation2 + $0x11] sm:$0xff] %vm341_vm3, %v4682_v41  ;;  %v1650_v42 = vpop.f32.mrf.mxu0 }
 0x36c   : > { %v1733_v43 = vmul.f32 %v4669_v32, %v1650_v42 }
 0x36e   : > { %v1769_v44 = vadd.f32 %v4674_v33, %v1733_v43 }
 0x370   : > { %vm1803_vm11 = vcmp.gt.f32.partialorder %v1769_v44, 0.0  ;;  %v1836_v45 = vmul.f32 %v4677_v37, %v1769_v44 }
 0x372   : > { %v4691_v46 = vsel %vm1803_vm11, %v1769_v44, %v1836_v45 }
 0x373   : > { %1900 = vst.msk [vmem:[#allocation2 + $0x19] sm:$0x7f] %vm464_vm8, %v4691_v46  ;;  %1961 = vrot.lane.b32.xlu1 %v4691_v46, %s3448_s12  ;;  %v1653_v47 = vpop.f32.mrf.mxu0 }
 0x374   : > { %v1734_v48 = vmul.f32 %v4669_v32, %v1653_v47 }
 0x376   : > { %v1770_v50 = vadd.f32 %v4674_v33, %v1734_v48  ;;  %3376 = vmatmul.msk.bf16.gmra.mxu2 %vm1586_vm5, %v1565_v52 }
 0x378   : > { %vm1804_vm7 = vcmp.gt.f32.partialorder %v1770_v50, 0.0  ;;  %v1837_v53 = vmul.f32 %v4677_v37, %v1770_v50 }
 0x37a   : > { %v4701_v54 = vsel %vm1804_vm7, %v1770_v50, %v1837_v53 }
 0x37b   : > { %1901 = vst.msk [vmem:[#allocation2 + $0x21] sm:$0xff] %vm341_vm3, %v4701_v54  ;;  %1963 = vrot.lane.b32.xlu2 %v4701_v54, %s3448_s12  ;;  %v1655_v55 = vpop.f32.mrf.mxu0  ;;  %v1688_v38 = vpop.f32.mrf.mxu2 }
 0x37c   : > { %v1735_v56 = vmul.f32 %v4669_v32, %v1655_v55  ;;  %v1748_v35 = vmul.f32 %v4669_v32, %v1688_v38 }
 0x37e   : > { %v1771_v57 = vadd.f32 %v4674_v33, %v1735_v56  ;;  %v1784_v39 = vadd.f32 %v4674_v33, %v1748_v35 }
 0x380   : > { %vm1805_vm11 = vcmp.gt.f32.partialorder %v1771_v57, 0.0  ;;  %v1838_v58 = vmul.f32 %v4677_v37, %v1771_v57  ;;  %v1851_v42 = vmul.f32 %v4677_v37, %v1784_v39 }
 0x382   : > { %v4710_v59 = vsel %vm1805_vm11, %v1771_v57, %v1838_v58 }
 0x383   : > { %1902 = vst.msk [vmem:[#allocation2 + $0x29] sm:$0x7f] %vm464_vm8, %v4710_v59  ;;  %1965 = vrot.lane.b32.xlu0 %v4710_v59, %s3448_s12  ;;  %v1658_v60 = vpop.f32.mrf.mxu0  ;;  %v1690_v48 = vpop.f32.mrf.mxu2 }
 0x384   : > { %v1736_v61 = vmul.f32 %v4669_v32, %v1658_v60  ;;  %v1749_v49 = vmul.f32 %v4669_v32, %v1690_v48 }
 0x386   : > { %v1772_v62 = vadd.f32 %v4674_v33, %v1736_v61  ;;  %v1785_v51 = vadd.f32 %v4674_v33, %v1749_v49 }
 0x388   : > { %vm1806_vm7 = vcmp.gt.f32.partialorder %v1772_v62, 0.0  ;;  %v1839_v63 = vmul.f32 %v4677_v37, %v1772_v62  ;;  %v1852_v53 = vmul.f32 %v4677_v37, %v1785_v51 }
 0x38a   : > { %v4719_v0 = vsel %vm1806_vm7, %v1772_v62, %v1839_v63  ;;  %vm1818_vm7 = vcmp.gt.f32.partialorder %v1784_v39, 0.0 }
 0x38b   : > { %1903 = vst.msk [vmem:[#allocation2 + $0x31] sm:$0xff] %vm341_vm3, %v4719_v0  ;;  %1967 = vrot.lane.b32.xlu1 %v4719_v0, %s3448_s12  ;;  %v1660_v34 = vpop.f32.mrf.mxu0  ;;  %v4735_v44 = vsel %vm1818_vm7, %v1784_v39, %v1851_v42  ;;  %vm1819_vm7 = vcmp.gt.f32.partialorder %v1785_v51, 0.0 }
 0x38c   : > { %v1737_v25 = vmul.f32 %v4669_v32, %v1660_v34  ;;  %1915 = vst.msk [vmem:[#allocation2 + $0x91] sm:$0xff] %vm341_vm3, %v4735_v44  ;;  %v4751_v56 = vsel %vm1819_vm7, %v1785_v51, %v1852_v53 }
 0x38d   : > { %1916 = vst.msk [vmem:[#allocation2 + $0x99] sm:$0x7f] %vm464_vm8, %v4751_v56 }
 0x38e   : > { %v1773_v36 = vadd.f32 %v4674_v33, %v1737_v25 }
 0x390   : > { %vm1807_vm11 = vcmp.gt.f32.partialorder %v1773_v36, 0.0  ;;  %v1840_v40 = vmul.f32 %v4677_v37, %v1773_v36 }
 0x392   : > { %v4731_v43 = vsel %vm1807_vm11, %v1773_v36, %v1840_v40 }
 0x393   : > { %1904 = vst.msk [vmem:[#allocation2 + $0x39] sm:$0x7f] %vm464_vm8, %v4731_v43  ;;  %1969 = vrot.lane.b32.xlu2 %v4731_v43, %s3448_s12  ;;  %v1663_v45 = vpop.f32.mrf.mxu0 }
 0x394   : > { %v1738_v47 = vmul.f32 %v4669_v32, %v1663_v45 }
 0x396   : > { %v1774_v50 = vadd.f32 %v4674_v33, %v1738_v47 }
 0x398   : > { %vm1808_vm11 = vcmp.gt.f32.partialorder %v1774_v50, 0.0  ;;  %v1841_v52 = vmul.f32 %v4677_v37, %v1774_v50 }
 0x399   : > { %v1693_v60 = vpop.f32.mrf.mxu2 }
 0x39a   : > { %v4747_v55 = vsel %vm1808_vm11, %v1774_v50, %v1841_v52  ;;  %v1750_v61 = vmul.f32 %v4669_v32, %v1693_v60 }
 0x39b   : > { %1905 = vst.msk [vmem:[#allocation2 + $0x41] sm:$0xff] %vm341_vm3, %v4747_v55  ;;  %1971 = vrot.lane.b32.xlu0 %v4747_v55, %s3448_s12  ;;  %v1665_v57 = vpop.f32.mrf.mxu0 }
 0x39c   : > { %v1739_v58 = vmul.f32 %v4669_v32, %v1665_v57  ;;  %v1786_v63 = vadd.f32 %v4674_v33, %v1750_v61 }
 0x39e   : > { %v1775_v62 = vadd.f32 %v4674_v33, %v1739_v58  ;;  %vm1820_vm7 = vcmp.gt.f32.partialorder %v1786_v63, 0.0  ;;  %v1853_v25 = vmul.f32 %v4677_v37, %v1786_v63 }
 0x3a0   : > { %vm1809_vm11 = vcmp.gt.f32.partialorder %v1775_v62, 0.0  ;;  %v1842_v34 = vmul.f32 %v4677_v37, %v1775_v62  ;;  %v4767_v35 = vsel %vm1820_vm7, %v1786_v63, %v1853_v25 }
 0x3a1   : > { %1917 = vst.msk [vmem:[#allocation2 + $0xa1] sm:$0xff] %vm341_vm3, %v4767_v35  ;;  %v1695_v40 = vpop.f32.mrf.mxu2 }
 0x3a2   : > { %v4763_v38 = vsel %vm1809_vm11, %v1775_v62, %v1842_v34  ;;  %v1751_v42 = vmul.f32 %v4669_v32, %v1695_v40 }
 0x3a3   : > { %1906 = vst.msk [vmem:[#allocation2 + $0x49] sm:$0x7f] %vm464_vm8, %v4763_v38  ;;  %1973 = vrot.lane.b32.xlu1 %v4763_v38, %s3448_s12  ;;  %v1668_v36 = vpop.f32.mrf.mxu0 }
 0x3a4   : > { %v1740_v39 = vmul.f32 %v4669_v32, %v1668_v36  ;;  %v1787_v47 = vadd.f32 %v4674_v33, %v1751_v42 }
 0x3a6   : > { %v1776_v45 = vadd.f32 %v4674_v33, %v1740_v39  ;;  %vm1821_vm7 = vcmp.gt.f32.partialorder %v1787_v47, 0.0  ;;  %v1854_v49 = vmul.f32 %v4677_v37, %v1787_v47 }
 0x3a8   : > { %vm1810_vm11 = vcmp.gt.f32.partialorder %v1776_v45, 0.0  ;;  %v1843_v48 = vmul.f32 %v4677_v37, %v1776_v45  ;;  %v4783_v51 = vsel %vm1821_vm7, %v1787_v47, %v1854_v49 }
 0x3a9   : > { %1918 = vst.msk [vmem:[#allocation2 + $0xa9] sm:$0x7f] %vm464_vm8, %v4783_v51  ;;  %v1698_v57 = vpop.f32.mrf.mxu2 }
 0x3aa   : > { %v4779_v50 = vsel %vm1810_vm11, %v1776_v45, %v1843_v48  ;;  %v1752_v58 = vmul.f32 %v4669_v32, %v1698_v57 }
 0x3ab   : > { %1907 = vst.msk [vmem:[#allocation2 + $0x51] sm:$0xff] %vm341_vm3, %v4779_v50  ;;  %1975 = vrot.lane.b32.xlu2 %v4779_v50, %s3448_s12  ;;  %v1670_v52 = vpop.f32.mrf.mxu0 }
 0x3ac   : > { %v1741_v53 = vmul.f32 %v4669_v32, %v1670_v52  ;;  %v1788_v61 = vadd.f32 %v4674_v33, %v1752_v58 }
 0x3ae   : > { %v1777_v60 = vadd.f32 %v4674_v33, %v1741_v53  ;;  %vm1822_vm7 = vcmp.gt.f32.partialorder %v1788_v61, 0.0  ;;  %v1855_v63 = vmul.f32 %v4677_v37, %v1788_v61 }
 0x3b0   : > { %vm1811_vm11 = vcmp.gt.f32.partialorder %v1777_v60, 0.0  ;;  %v1844_v62 = vmul.f32 %v4677_v37, %v1777_v60  ;;  %v4799_v25 = vsel %vm1822_vm7, %v1788_v61, %v1855_v63 }
 0x3b1   : > { %1919 = vst.msk [vmem:[#allocation2 + $0xb1] sm:$0xff] %vm341_vm3, %v4799_v25  ;;  %v1700_v40 = vpop.f32.mrf.mxu2 }
 0x3b2   : > { %v4795_v34 = vsel %vm1811_vm11, %v1777_v60, %v1844_v62  ;;  %v1753_v42 = vmul.f32 %v4669_v32, %v1700_v40 }
 0x3b3   : > { %1908 = vst.msk [vmem:[#allocation2 + $0x59] sm:$0x7f] %vm464_vm8, %v4795_v34  ;;  %1977 = vrot.lane.b32.xlu0 %v4795_v34, %s3448_s12  ;;  %v1673_v36 = vpop.f32.mrf.mxu0 }
 0x3b4   : > { %v1742_v39 = vmul.f32 %v4669_v32, %v1673_v36  ;;  %v1789_v47 = vadd.f32 %v4674_v33, %v1753_v42 }
 0x3b6   : > { %v1778_v45 = vadd.f32 %v4674_v33, %v1742_v39  ;;  %vm1823_vm7 = vcmp.gt.f32.partialorder %v1789_v47, 0.0  ;;  %v1856_v49 = vmul.f32 %v4677_v37, %v1789_v47 }
 0x3b8   : > { %vm1812_vm11 = vcmp.gt.f32.partialorder %v1778_v45, 0.0  ;;  %v1845_v48 = vmul.f32 %v4677_v37, %v1778_v45  ;;  %v4815_v53 = vsel %vm1823_vm7, %v1789_v47, %v1856_v49 }
 0x3b9   : > { %1920 = vst.msk [vmem:[#allocation2 + $0xb9] sm:$0x7f] %vm464_vm8, %v4815_v53  ;;  %v1703_v60 = vpop.f32.mrf.mxu2 }
 0x3ba   : > { %v4811_v52 = vsel %vm1812_vm11, %v1778_v45, %v1845_v48  ;;  %v1754_v61 = vmul.f32 %v4669_v32, %v1703_v60 }
 0x3bb   : > { %1909 = vst.msk [vmem:[#allocation2 + $0x61] sm:$0xff] %vm341_vm3, %v4811_v52  ;;  %1979 = vrot.lane.b32.xlu1 %v4811_v52, %s3448_s12  ;;  %v1675_v57 = vpop.f32.mrf.mxu0 }
 0x3bc   : > { %v1743_v58 = vmul.f32 %v4669_v32, %v1675_v57  ;;  %v1790_v63 = vadd.f32 %v4674_v33, %v1754_v61 }
 0x3be   : > { %v1779_v62 = vadd.f32 %v4674_v33, %v1743_v58  ;;  %vm1824_vm7 = vcmp.gt.f32.partialorder %v1790_v63, 0.0  ;;  %v1857_v39 = vmul.f32 %v4677_v37, %v1790_v63 }
 0x3c0   : > { %vm1813_vm11 = vcmp.gt.f32.partialorder %v1779_v62, 0.0  ;;  %v1846_v36 = vmul.f32 %v4677_v37, %v1779_v62  ;;  %v4831_v42 = vsel %vm1824_vm7, %v1790_v63, %v1857_v39 }
 0x3c1   : > { %1921 = vst.msk [vmem:[#allocation2 + $0xc1] sm:$0xff] %vm341_vm3, %v4831_v42  ;;  %v1705_v48 = vpop.f32.mrf.mxu2 }
 0x3c2   : > { %v4827_v40 = vsel %vm1813_vm11, %v1779_v62, %v1846_v36  ;;  %v1755_v49 = vmul.f32 %v4669_v32, %v1705_v48 }
 0x3c3   : > { %1910 = vst.msk [vmem:[#allocation2 + $0x69] sm:$0x7f] %vm464_vm8, %v4827_v40  ;;  %1981 = vrot.lane.b32.xlu2 %v4827_v40, %s3448_s12  ;;  %v1678_v45 = vpop.f32.mrf.mxu0 }
 0x3c4   : > { %v1744_v47 = vmul.f32 %v4669_v32, %v1678_v45  ;;  %v1791_v58 = vadd.f32 %v4674_v33, %v1755_v49 }
 0x3c6   : > { %v1780_v57 = vadd.f32 %v4674_v33, %v1744_v47  ;;  %vm1825_vm7 = vcmp.gt.f32.partialorder %v1791_v58, 0.0  ;;  %v1858_v61 = vmul.f32 %v4677_v37, %v1791_v58 }
 0x3c8   : > { %vm1814_vm11 = vcmp.gt.f32.partialorder %v1780_v57, 0.0  ;;  %v1847_v60 = vmul.f32 %v4677_v37, %v1780_v57  ;;  %v4847_v63 = vsel %vm1825_vm7, %v1791_v58, %v1858_v61 }
 0x3c9   : > { %1922 = vst.msk [vmem:[#allocation2 + $0xc9] sm:$0x7f] %vm464_vm8, %v4847_v63  ;;  %v1708_v45 = vpop.f32.mrf.mxu2 }
 0x3ca   : > { %v4843_v62 = vsel %vm1814_vm11, %v1780_v57, %v1847_v60  ;;  %v1756_v47 = vmul.f32 %v4669_v32, %v1708_v45 }
 0x3cb   : > { %1911 = vst.msk [vmem:[#allocation2 + $0x71] sm:$0xff] %vm341_vm3, %v4843_v62  ;;  %1983 = vrot.lane.b32.xlu0 %v4843_v62, %s3448_s12  ;;  %v1680_v36 = vpop.f32.mrf.mxu0 }
 0x3cc   : > { %v1745_v39 = vmul.f32 %v4669_v32, %v1680_v36  ;;  %v1792_v49 = vadd.f32 %v4674_v33, %v1756_v47 }
 0x3ce   : > { %v1781_v48 = vadd.f32 %v4674_v33, %v1745_v39  ;;  %vm1826_vm7 = vcmp.gt.f32.partialorder %v1792_v49, 0.0  ;;  %v1859_v58 = vmul.f32 %v4677_v37, %v1792_v49 }
 0x3d0   : > { %vm1815_vm11 = vcmp.gt.f32.partialorder %v1781_v48, 0.0  ;;  %v1848_v57 = vmul.f32 %v4677_v37, %v1781_v48  ;;  %v4863_v61 = vsel %vm1826_vm7, %v1792_v49, %v1859_v58 }
 0x3d1   : > { %1923 = vst.msk [vmem:[#allocation2 + $0xd1] sm:$0xff] %vm341_vm3, %v4863_v61  ;;  %v1710_v45 = vpop.f32.mrf.mxu2 }
 0x3d2   : > { %v4859_v60 = vsel %vm1815_vm11, %v1781_v48, %v1848_v57  ;;  %v1757_v18 = vmul.f32 %v4669_v32, %v1710_v45 }
 0x3d3   : > { %1912 = vst.msk [vmem:[#allocation2 + $0x79] sm:$0x7f] %vm464_vm8, %v4859_v60  ;;  %1985 = vrot.lane.b32.xlu1 %v4859_v60, %s3448_s12  ;;  %v1683_v36 = vpop.f32.mrf.mxu0 }
 0x3d4   : > { %v1746_v39 = vmul.f32 %v4669_v32, %v1683_v36  ;;  %v1793_v49 = vadd.f32 %v4674_v33, %v1757_v18 }
 0x3d5   : > { %v1964_v47 = vpop.permute.xlu2 %1963 }
 0x3d6   : > { %v1782_v48 = vadd.f32 %v4674_v33, %v1746_v39  ;;  %2051 = vst.msk [vmem:[#allocation2 + $0x20] sm:$0xff] %vm361_vm4, %v1964_v47  ;;  %vm1827_vm7 = vcmp.gt.f32.partialorder %v1793_v49, 0.0  ;;  %v1860_v58 = vmul.f32 %v4677_v37, %v1793_v49 }
 0x3d8   : > { %vm1816_vm11 = vcmp.gt.f32.partialorder %v1782_v48, 0.0  ;;  %v1849_v57 = vmul.f32 %v4677_v37, %v1782_v48  ;;  %v4880_v36 = vsel %vm1827_vm7, %v1793_v49, %v1860_v58 }
 0x3d9   : > { %1924 = vst.msk [vmem:[#allocation2 + $0xd9] sm:$0x7f] %vm464_vm8, %v4880_v36  ;;  %v1713_v45 = vpop.f32.mrf.mxu2 }
 0x3da   : > { %v4876_v13 = vsel %vm1816_vm11, %v1782_v48, %v1849_v57  ;;  %v1758_v48 = vmul.f32 %v4669_v32, %v1713_v45 }
 0x3db   : > { %1913 = vst.msk [vmem:[#allocation2 + $0x81] sm:$0xff] %vm341_vm3, %v4876_v13  ;;  %1991 = vrot.lane.b32.xlu1 %v4735_v44, %s3448_s12  ;;  %1987 = vrot.lane.b32.xlu2 %v4876_v13, %s3448_s12  ;;  %v1685_v18 = vpop.f32.mrf.mxu0 }
 0x3dc   : > { %v1747_v39 = vmul.f32 %v4669_v32, %v1685_v18  ;;  %v1794_v49 = vadd.f32 %v4674_v33, %v1758_v48 }
 0x3dd   : > { %v1960_v47 = vpop.permute.xlu0 %1959 }
 0x3de   : > { %v1783_v57 = vadd.f32 %v4674_v33, %v1747_v39  ;;  %2049 = vst.msk [vmem:[#allocation2 + $0x10] sm:$0xff] %vm361_vm4, %v1960_v47  ;;  %vm1828_vm7 = vcmp.gt.f32.partialorder %v1794_v49, 0.0  ;;  %v1861_v14 = vmul.f32 %v4677_v37, %v1794_v49 }
 0x3e0   : > { %vm1817_vm11 = vcmp.gt.f32.partialorder %v1783_v57, 0.0  ;;  %v1850_v58 = vmul.f32 %v4677_v37, %v1783_v57  ;;  %v4899_v18 = vsel %vm1828_vm7, %v1794_v49, %v1861_v14 }
 0x3e1   : > { %1925 = vst.msk [vmem:[#allocation2 + $0xe1] sm:$0xff] %vm341_vm3, %v4899_v18  ;;  %v1715_v39 = vpop.f32.mrf.mxu2 }
 0x3e2   : > { %v4895_v15 = vsel %vm1817_vm11, %v1783_v57, %v1850_v58  ;;  %v1759_v47 = vmul.f32 %v4669_v32, %v1715_v39 }
 0x3e3   : > { %1914 = vst.msk [vmem:[#allocation2 + $0x89] sm:$0x7f] %vm464_vm8, %v4895_v15  ;;  %1997 = vrot.lane.b32.xlu1 %v4783_v51, %s3448_s12  ;;  %1993 = vrot.lane.b32.xlu2 %v4751_v56, %s3448_s12 }
 0x3e4   : > { %1989 = vrot.lane.b32.xlu0 %v4895_v15, %s3448_s12  ;;  %v1795_v14 = vadd.f32 %v4674_v33, %v1759_v47 }
 0x3e5   : > { %v1962_v45 = vpop.permute.xlu1 %1961 }
 0x3e6   : > { %2050 = vst.msk [vmem:[#allocation2 + $0x18] sm:$0xff] %vm361_vm4, %v1962_v45  ;;  %vm1829_vm11 = vcmp.gt.f32.partialorder %v1795_v14, 0.0  ;;  %v1862_v48 = vmul.f32 %v4677_v37, %v1795_v14 }
 0x3e8   : > { %v4913_v57 = vsel %vm1829_vm11, %v1795_v14, %v1862_v48 }
 0x3e9   : > { %1926 = vst.msk [vmem:[#allocation2 + $0xe9] sm:$0x7f] %vm464_vm8, %v4913_v57  ;;  %v1718_v49 = vpop.f32.mrf.mxu2 }
 0x3ea   : > { %v1760_v39 = vmul.f32 %v4669_v32, %v1718_v49 }
 0x3eb   : > { %2003 = vrot.lane.b32.xlu1 %v4831_v42, %s3448_s12  ;;  %1999 = vrot.lane.b32.xlu2 %v4799_v25, %s3448_s12 }
 0x3ec   : > { %1995 = vrot.lane.b32.xlu0 %v4767_v35, %s3448_s12  ;;  %v1796_v45 = vadd.f32 %v4674_v33, %v1760_v39 }
 0x3ed   : > { %v1970_v58 = vpop.permute.xlu2 %1969 }
 0x3ee   : > { %2054 = vst.msk [vmem:[#allocation2 + $0x38] sm:$0xff] %vm361_vm4, %v1970_v58  ;;  %vm1830_vm7 = vcmp.gt.f32.partialorder %v1796_v45, 0.0  ;;  %v1863_v47 = vmul.f32 %v4677_v37, %v1796_v45 }
 0x3f0   : > { %v4927_v14 = vsel %vm1830_vm7, %v1796_v45, %v1863_v47 }
 0x3f1   : > { %1927 = vst.msk [vmem:[#allocation2 + $0xf1] sm:$0xff] %vm341_vm3, %v4927_v14  ;;  %v1720_v48 = vpop.f32.mrf.mxu2 }
 0x3f2   : > { %v1761_v58 = vmul.f32 %v4669_v32, %v1720_v48 }
 0x3f3   : > { %2009 = vrot.lane.b32.xlu1 %v4880_v36, %s3448_s12  ;;  %2005 = vrot.lane.b32.xlu2 %v4847_v63, %s3448_s12 }
 0x3f4   : > { %2001 = vrot.lane.b32.xlu0 %v4815_v53, %s3448_s12  ;;  %v1797_v39 = vadd.f32 %v4674_v33, %v1761_v58 }
 0x3f5   : > { %v1966_v49 = vpop.permute.xlu0 %1965 }
 0x3f6   : > { %2052 = vst.msk [vmem:[#allocation2 + $0x28] sm:$0xff] %vm361_vm4, %v1966_v49  ;;  %vm1831_vm11 = vcmp.gt.f32.partialorder %v1797_v39, 0.0  ;;  %v1864_v45 = vmul.f32 %v4677_v37, %v1797_v39 }
 0x3f8   : > { %v4941_v47 = vsel %vm1831_vm11, %v1797_v39, %v1864_v45 }
 0x3f9   : > { %1928 = vst.msk [vmem:[#allocation2 + $0xf9] sm:$0x7f] %vm464_vm8, %v4941_v47 }
 0x3fb   : > { %2015 = vrot.lane.b32.xlu1 %v4927_v14, %s3448_s12  ;;  %2011 = vrot.lane.b32.xlu2 %v4899_v18, %s3448_s12 }
 0x3fc   : > { %2007 = vrot.lane.b32.xlu0 %v4863_v61, %s3448_s12 }
 0x3fd   : > { %v1968_v48 = vpop.permute.xlu1 %1967 }
 0x3fe   : > { %2053 = vst.msk [vmem:[#allocation2 + $0x30] sm:$0xff] %vm361_vm4, %v1968_v48 }
 0x403   : > { %2081 = vrot.lane.b32.xlu1 %v4691_v46, %s3450_s13  ;;  %2017 = vrot.lane.b32.xlu2 %v4941_v47, %s3448_s12 }
 0x404   : > { %2013 = vrot.lane.b32.xlu0 %v4913_v57, %s3448_s12 }
 0x405   : > { %v1976_v49 = vpop.permute.xlu2 %1975 }
 0x406   : > { %2057 = vst.msk [vmem:[#allocation2 + $0x50] sm:$0xff] %vm361_vm4, %v1976_v49 }
 0x40b   : > { %2087 = vrot.lane.b32.xlu1 %v4719_v0, %s3450_s13  ;;  %2083 = vrot.lane.b32.xlu2 %v4701_v54, %s3450_s13 }
 0x40c   : > { %2079 = vrot.lane.b32.xlu0 %v4682_v41, %s3450_s13 }
 0x40d   : > { %v1972_v58 = vpop.permute.xlu0 %1971 }
 0x40e   : > { %2055 = vst.msk [vmem:[#allocation2 + $0x40] sm:$0xff] %vm361_vm4, %v1972_v58 }
 0x413   : > { %2093 = vrot.lane.b32.xlu1 %v4763_v38, %s3450_s13  ;;  %2089 = vrot.lane.b32.xlu2 %v4731_v43, %s3450_s13 }
 0x414   : > { %2085 = vrot.lane.b32.xlu0 %v4710_v59, %s3450_s13 }
 0x415   : > { %v1974_v39 = vpop.permute.xlu1 %1973 }
 0x416   : > { %2056 = vst.msk [vmem:[#allocation2 + $0x48] sm:$0xff] %vm361_vm4, %v1974_v39 }
 0x41b   : > { %2099 = vrot.lane.b32.xlu1 %v4811_v52, %s3450_s13  ;;  %2095 = vrot.lane.b32.xlu2 %v4779_v50, %s3450_s13 }
 0x41c   : > { %2091 = vrot.lane.b32.xlu0 %v4747_v55, %s3450_s13 }
 0x41d   : > { %v1982_v45 = vpop.permute.xlu2 %1981 }
 0x41e   : > { %2060 = vst.msk [vmem:[#allocation2 + $0x68] sm:$0xff] %vm361_vm4, %v1982_v45 }
 0x423   : > { %2105 = vrot.lane.b32.xlu1 %v4859_v60, %s3450_s13  ;;  %2101 = vrot.lane.b32.xlu2 %v4827_v40, %s3450_s13 }
 0x424   : > { %2097 = vrot.lane.b32.xlu0 %v4795_v34, %s3450_s13 }
 0x425   : > { %v1978_v48 = vpop.permute.xlu0 %1977 }
 0x426   : > { %2058 = vst.msk [vmem:[#allocation2 + $0x58] sm:$0xff] %vm361_vm4, %v1978_v48 }
 0x42b   : > { %2111 = vrot.lane.b32.xlu1 %v4735_v44, %s3450_s13  ;;  %2107 = vrot.lane.b32.xlu2 %v4876_v13, %s3450_s13 }
 0x42c   : > { %2103 = vrot.lane.b32.xlu0 %v4843_v62, %s3450_s13 }
 0x42d   : > { %v1980_v49 = vpop.permute.xlu1 %1979 }
 0x42e   : > { %2059 = vst.msk [vmem:[#allocation2 + $0x60] sm:$0xff] %vm361_vm4, %v1980_v49 }
 0x433   : > { %2117 = vrot.lane.b32.xlu1 %v4783_v51, %s3450_s13  ;;  %2113 = vrot.lane.b32.xlu2 %v4751_v56, %s3450_s13 }
 0x434   : > { %2109 = vrot.lane.b32.xlu0 %v4895_v15, %s3450_s13 }
 0x435   : > { %v1988_v58 = vpop.permute.xlu2 %1987 }
 0x436   : > { %2063 = vst.msk [vmem:[#allocation2 + $0x80] sm:$0xff] %vm361_vm4, %v1988_v58 }
 0x43b   : > { %2123 = vrot.lane.b32.xlu1 %v4831_v42, %s3450_s13  ;;  %2119 = vrot.lane.b32.xlu2 %v4799_v25, %s3450_s13 }
 0x43c   : > { %2115 = vrot.lane.b32.xlu0 %v4767_v35, %s3450_s13 }
 0x43d   : > { %v1984_v39 = vpop.permute.xlu0 %1983  ;;  %v1994_v45 = vpop.permute.xlu2 %1993 }
 0x43e   : > { %2061 = vst.msk [vmem:[#allocation2 + $0x70] sm:$0xff] %vm361_vm4, %v1984_v39 }
 0x43f   : > { %2066 = vst.msk [vmem:[#allocation2 + $0x98] sm:$0xff] %vm361_vm4, %v1994_v45 }
 0x443   : > { %2129 = vrot.lane.b32.xlu1 %v4880_v36, %s3450_s13  ;;  %2125 = vrot.lane.b32.xlu2 %v4847_v63, %s3450_s13 }
 0x444   : > { %2121 = vrot.lane.b32.xlu0 %v4815_v53, %s3450_s13 }
 0x445   : > { %v1986_v48 = vpop.permute.xlu1 %1985  ;;  %v2000_v49 = vpop.permute.xlu2 %1999 }
 0x446   : > { %2062 = vst.msk [vmem:[#allocation2 + $0x78] sm:$0xff] %vm361_vm4, %v1986_v48 }
 0x447   : > { %2069 = vst.msk [vmem:[#allocation2 + $0xb0] sm:$0xff] %vm361_vm4, %v2000_v49 }
 0x44b   : > { %2135 = vrot.lane.b32.xlu1 %v4927_v14, %s3450_s13  ;;  %2131 = vrot.lane.b32.xlu2 %v4899_v18, %s3450_s13 }
 0x44c   : > { %2127 = vrot.lane.b32.xlu0 %v4863_v61, %s3450_s13 }
 0x44d   : > { %v1992_v58 = vpop.permute.xlu1 %1991  ;;  %v2006_v39 = vpop.permute.xlu2 %2005 }
 0x44e   : > { %2065 = vst.msk [vmem:[#allocation2 + $0x90] sm:$0xff] %vm361_vm4, %v1992_v58 }
 0x44f   : > { %2072 = vst.msk [vmem:[#allocation2 + $0xc8] sm:$0xff] %vm361_vm4, %v2006_v39 }
 0x453   : > { %2203 = vrot.lane.b32.xlu1 %v4691_v46, %s3451_s14  ;;  %2137 = vrot.lane.b32.xlu2 %v4941_v47, %s3450_s13 }
 0x454   : > { %2133 = vrot.lane.b32.xlu0 %v4913_v57, %s3450_s13 }
 0x455   : > { %v1998_v45 = vpop.permute.xlu1 %1997  ;;  %v2012_v48 = vpop.permute.xlu2 %2011 }
 0x456   : > { %2068 = vst.msk [vmem:[#allocation2 + $0xa8] sm:$0xff] %vm361_vm4, %v1998_v45  ;;  %v1990_v49 = vpop.permute.xlu0 %1989 }
 0x457   : > { %2075 = vst.msk [vmem:[#allocation2 + $0xe0] sm:$0xff] %vm361_vm4, %v2012_v48 }
 0x458   : > { %2064 = vst.msk [vmem:[#allocation2 + $0x88] sm:$0xff] %vm361_vm4, %v1990_v49 }
 0x45b   : > { %2209 = vrot.lane.b32.xlu1 %v4719_v0, %s3451_s14  ;;  %2205 = vrot.lane.b32.xlu2 %v4701_v54, %s3451_s14 }
 0x45c   : > { %2201 = vrot.lane.b32.xlu0 %v4682_v41, %s3451_s14 }
 0x45d   : > { %v2004_v58 = vpop.permute.xlu1 %2003  ;;  %v2018_v39 = vpop.permute.xlu2 %2017 }
 0x45e   : > { %2071 = vst.msk [vmem:[#allocation2 + $0xc0] sm:$0xff] %vm361_vm4, %v2004_v58  ;;  %v1996_v29 = vpop.permute.xlu0 %1995 }
 0x45f   : > { %2078 = vst.msk [vmem:[#allocation2 + $0xf8] sm:$0xff] %vm361_vm4, %v2018_v39 }
 0x460   : > { %2067 = vst.msk [vmem:[#allocation2 + $0xa0] sm:$0xff] %vm361_vm4, %v1996_v29 }
 0x463   : > { %2215 = vrot.lane.b32.xlu1 %v4763_v38, %s3451_s14  ;;  %2211 = vrot.lane.b32.xlu2 %v4731_v43, %s3451_s14 }
 0x464   : > { %2207 = vrot.lane.b32.xlu0 %v4710_v59, %s3451_s14 }
 0x465   : > { %v2010_v45 = vpop.permute.xlu1 %2009  ;;  %v2084_v48 = vpop.permute.xlu2 %2083 }
 0x466   : > { %2074 = vst.msk [vmem:[#allocation2 + $0xd8] sm:$0xff] %vm361_vm4, %v2010_v45  ;;  %v2002_v49 = vpop.permute.xlu0 %2001 }
 0x467   : > { %2171 = vst.msk [vmem:[#allocation2 + $0x1f] sm:$0xfe] %vm734_vm12, %v2084_v48 }
 0x468   : > { %2070 = vst.msk [vmem:[#allocation2 + $0xb8] sm:$0xff] %vm361_vm4, %v2002_v49 }
 0x46b   : > { %2221 = vrot.lane.b32.xlu1 %v4811_v52, %s3451_s14  ;;  %2217 = vrot.lane.b32.xlu2 %v4779_v50, %s3451_s14 }
 0x46c   : > { %2213 = vrot.lane.b32.xlu0 %v4747_v55, %s3451_s14 }
 0x46d   : > { %v2016_v29 = vpop.permute.xlu1 %2015  ;;  %v2090_v58 = vpop.permute.xlu2 %2089 }
 0x46e   : > { %2077 = vst.msk [vmem:[#allocation2 + $0xf0] sm:$0xff] %vm361_vm4, %v2016_v29  ;;  %v2008_v39 = vpop.permute.xlu0 %2007 }
 0x46f   : > { %2174 = vst.msk [vmem:[#allocation2 + $0x37] sm:$0xff] %vm364_vm13, %v2090_v58 }
 0x470   : > { %2073 = vst.msk [vmem:[#allocation2 + $0xd0] sm:$0xff] %vm361_vm4, %v2008_v39 }
 0x473   : > { %2227 = vrot.lane.b32.xlu1 %v4859_v60, %s3451_s14  ;;  %2223 = vrot.lane.b32.xlu2 %v4827_v40, %s3451_s14 }
 0x474   : > { %2219 = vrot.lane.b32.xlu0 %v4795_v34, %s3451_s14 }
 0x475   : > { %v2082_v45 = vpop.permute.xlu1 %2081  ;;  %v2096_v48 = vpop.permute.xlu2 %2095 }
 0x476   : > { %2170 = vst.msk [vmem:[#allocation2 + $0x17] sm:$0xff] %vm364_vm13, %v2082_v45  ;;  %v2014_v49 = vpop.permute.xlu0 %2013 }
 0x477   : > { %2177 = vst.msk [vmem:[#allocation2 + $0x4f] sm:$0xfe] %vm734_vm12, %v2096_v48 }
 0x478   : > { %2076 = vst.msk [vmem:[#allocation2 + $0xe8] sm:$0xff] %vm361_vm4, %v2014_v49 }
 0x47b   : > { %2233 = vrot.lane.b32.xlu1 %v4735_v44, %s3451_s14  ;;  %2229 = vrot.lane.b32.xlu2 %v4876_v13, %s3451_s14 }
 0x47c   : > { %2225 = vrot.lane.b32.xlu0 %v4843_v62, %s3451_s14 }
 0x47d   : > { %v2088_v29 = vpop.permute.xlu1 %2087  ;;  %v2102_v58 = vpop.permute.xlu2 %2101 }
 0x47e   : > { %2173 = vst.msk [vmem:[#allocation2 + $0x2f] sm:$0xfe] %vm734_vm12, %v2088_v29  ;;  %v2080_v39 = vpop.permute.xlu0 %2079  ;;  %v1723_v29 = vpop.f32.mrf.mxu2 }
 0x47f   : > { %2180 = vst.msk [vmem:[#allocation2 + $0x67] sm:$0xff] %vm364_vm13, %v2102_v58 }
 0x480   : > { %2169 = vst.msk [vmem:[#allocation2 + $0xf] sm:$0xfe] %vm734_vm12, %v2080_v39 }
 0x483   : > { %2239 = vrot.lane.b32.xlu1 %v4783_v51, %s3451_s14  ;;  %2235 = vrot.lane.b32.xlu2 %v4751_v56, %s3451_s14 }
 0x484   : > { %2231 = vrot.lane.b32.xlu0 %v4895_v15, %s3451_s14 }
 0x485   : > { %v2094_v45 = vpop.permute.xlu1 %2093  ;;  %v2108_v48 = vpop.permute.xlu2 %2107 }
 0x486   : > { %2176 = vst.msk [vmem:[#allocation2 + $0x47] sm:$0xff] %vm364_vm13, %v2094_v45  ;;  %v2086_v49 = vpop.permute.xlu0 %2085 }
 0x487   : > { %2183 = vst.msk [vmem:[#allocation2 + $0x7f] sm:$0xfe] %vm734_vm12, %v2108_v48  ;;  %v1725_v48 = vpop.f32.mrf.mxu2 }
 0x488   : > { %2172 = vst.msk [vmem:[#allocation2 + $0x27] sm:$0xff] %vm364_vm13, %v2086_v49  ;;  %v1763_v10 = vmul.f32 %v4669_v32, %v1725_v48 }
 0x48b   : > { %2245 = vrot.lane.b32.xlu1 %v4831_v42, %s3451_s14  ;;  %2241 = vrot.lane.b32.xlu2 %v4799_v25, %s3451_s14 }
 0x48c   : > { %2237 = vrot.lane.b32.xlu0 %v4767_v35, %s3451_s14 }
 0x48d   : > { %v2100_v58 = vpop.permute.xlu1 %2099  ;;  %v2114_v39 = vpop.permute.xlu2 %2113 }
 0x48e   : > { %2179 = vst.msk [vmem:[#allocation2 + $0x5f] sm:$0xfe] %vm734_vm12, %v2100_v58  ;;  %v2092_v45 = vpop.permute.xlu0 %2091 }
 0x48f   : > { %2186 = vst.msk [vmem:[#allocation2 + $0x97] sm:$0xff] %vm364_vm13, %v2114_v39  ;;  %v1799_v39 = vadd.f32 %v4674_v33, %v1763_v10 }
 0x490   : > { %2175 = vst.msk [vmem:[#allocation2 + $0x3f] sm:$0xfe] %vm734_vm12, %v2092_v45 }
 0x491   : > { %vm1833_vm4 = vcmp.gt.f32.partialorder %v1799_v39, 0.0 }
 0x493   : > { %2251 = vrot.lane.b32.xlu1 %v4880_v36, %s3451_s14  ;;  %2247 = vrot.lane.b32.xlu2 %v4847_v63, %s3451_s14 }
 0x494   : > { %2243 = vrot.lane.b32.xlu0 %v4815_v53, %s3451_s14 }
 0x495   : > { %v2106_v49 = vpop.permute.xlu1 %2105  ;;  %v2120_v30 = vpop.permute.xlu2 %2119 }
 0x496   : > { %2182 = vst.msk [vmem:[#allocation2 + $0x77] sm:$0xff] %vm364_vm13, %v2106_v49  ;;  %v2098_v58 = vpop.permute.xlu0 %2097  ;;  %v1866_v49 = vmul.f32 %v4677_v37, %v1799_v39 }
 0x497   : > { %2189 = vst.msk [vmem:[#allocation2 + $0xaf] sm:$0xfe] %vm734_vm12, %v2120_v30 }
 0x498   : > { %2178 = vst.msk [vmem:[#allocation2 + $0x57] sm:$0xff] %vm364_vm13, %v2098_v58  ;;  %v1762_v58 = vmul.f32 %v4669_v32, %v1723_v29  ;;  %v5119_v10 = vsel %vm1833_vm4, %v1799_v39, %v1866_v49 }
 0x49a   : > { %v1798_v11 = vadd.f32 %v4674_v33, %v1762_v58 }
 0x49b   : > { %2257 = vrot.lane.b32.xlu1 %v4927_v14, %s3451_s14  ;;  %2253 = vrot.lane.b32.xlu2 %v4899_v18, %s3451_s14 }
 0x49c   : > { %2249 = vrot.lane.b32.xlu0 %v4863_v61, %s3451_s14  ;;  %vm1832_vm8 = vcmp.gt.f32.partialorder %v1798_v11, 0.0 }
 0x49d   : > { %v2112_v45 = vpop.permute.xlu1 %2111  ;;  %v2126_v48 = vpop.permute.xlu2 %2125 }
 0x49e   : > { %2185 = vst.msk [vmem:[#allocation2 + $0x8f] sm:$0xfe] %vm734_vm12, %v2112_v45  ;;  %v2104_v30 = vpop.permute.xlu0 %2103 }
 0x49f   : > { %2192 = vst.msk [vmem:[#allocation2 + $0xc7] sm:$0xff] %vm364_vm13, %v2126_v48  ;;  %v1865_v48 = vmul.f32 %v4677_v37, %v1798_v11 }
 0x4a0   : > { %2181 = vst.msk [vmem:[#allocation2 + $0x6f] sm:$0xfe] %vm734_vm12, %v2104_v30 }
 0x4a1   : > { %v5132_v33 = vsel %vm1832_vm8, %v1798_v11, %v1865_v48 }
 0x4a3   : > { %2263 = vrot.lane.b32.xlu1 %v5119_v10, %s3451_s14  ;;  %2259 = vrot.lane.b32.xlu2 %v4941_v47, %s3451_s14 }
 0x4a4   : > { %2255 = vrot.lane.b32.xlu0 %v4913_v57, %s3451_s14 }
 0x4a5   : > { %v2118_v45 = vpop.permute.xlu1 %2117  ;;  %v2132_v32 = vpop.permute.xlu2 %2131 }
 0x4a6   : > { %2188 = vst.msk [vmem:[#allocation2 + $0xa7] sm:$0xff] %vm364_vm13, %v2118_v45  ;;  %v2110_v29 = vpop.permute.xlu0 %2109 }
 0x4a7   : > { %2195 = vst.msk [vmem:[#allocation2 + $0xdf] sm:$0xfe] %vm734_vm12, %v2132_v32 }
 0x4a8   : > { %2184 = vst.msk [vmem:[#allocation2 + $0x87] sm:$0xff] %vm364_vm13, %v2110_v29 }
 0x4ab   : > { %2333 = vrot.lane.b32.xlu1 %v4701_v54, %s3452_s15  ;;  %2329 = vrot.lane.b32.xlu2 %v4682_v41, %s3452_s15 }
 0x4ac   : > { %2261 = vrot.lane.b32.xlu0 %v5132_v33, %s3451_s14 }
 0x4ad   : > { %v2124_v39 = vpop.permute.xlu1 %2123  ;;  %v2138_v49 = vpop.permute.xlu2 %2137 }
 0x4ae   : > { %2191 = vst.msk [vmem:[#allocation2 + $0xbf] sm:$0xfe] %vm734_vm12, %v2124_v39  ;;  %v2116_v37 = vpop.permute.xlu0 %2115 }
 0x4af   : > { %2198 = vst.msk [vmem:[#allocation2 + $0xf7] sm:$0xff] %vm364_vm13, %v2138_v49 }
 0x4b0   : > { %2187 = vst.msk [vmem:[#allocation2 + $0x9f] sm:$0xfe] %vm734_vm12, %v2116_v37 }
 0x4b3   : > { %2339 = vrot.lane.b32.xlu1 %v4731_v43, %s3452_s15  ;;  %2335 = vrot.lane.b32.xlu2 %v4710_v59, %s3452_s15 }
 0x4b4   : > { %2331 = vrot.lane.b32.xlu0 %v4691_v46, %s3452_s15 }
 0x4b5   : > { %v2130_v11 = vpop.permute.xlu1 %2129  ;;  %v2206_v30 = vpop.permute.xlu2 %2205 }
 0x4b6   : > { %2194 = vst.msk [vmem:[#allocation2 + $0xd7] sm:$0xff] %vm364_vm13, %v2130_v11  ;;  %v2122_v58 = vpop.permute.xlu0 %2121 }
 0x4b7   : > { %2299 = vst.msk [vmem:[#allocation2 + $0x11] sm:$0xff] %vm863_vm14, %v2206_v30 }
 0x4b8   : > { %2190 = vst.msk [vmem:[#allocation2 + $0xb7] sm:$0xff] %vm364_vm13, %v2122_v58 }
 0x4bb   : > { %2345 = vrot.lane.b32.xlu1 %v4779_v50, %s3452_s15  ;;  %2341 = vrot.lane.b32.xlu2 %v4747_v55, %s3452_s15 }
 0x4bc   : > { %2337 = vrot.lane.b32.xlu0 %v4719_v0, %s3452_s15 }
 0x4bd   : > { %v2136_v45 = vpop.permute.xlu1 %2135  ;;  %v2212_v32 = vpop.permute.xlu2 %2211 }
 0x4be   : > { %2197 = vst.msk [vmem:[#allocation2 + $0xef] sm:$0xfe] %vm734_vm12, %v2136_v45  ;;  %v2128_v29 = vpop.permute.xlu0 %2127 }
 0x4bf   : > { %2302 = vst.msk [vmem:[#allocation2 + $0x29] sm:$0x7f] %vm865_vm15, %v2212_v32 }
 0x4c0   : > { %2193 = vst.msk [vmem:[#allocation2 + $0xcf] sm:$0xfe] %vm734_vm12, %v2128_v29  ;;  %vm5872_vm12 = vcmask 227520  }
 0x4c3   : > { %2351 = vrot.lane.b32.xlu1 %v4827_v40, %s3452_s15  ;;  %2347 = vrot.lane.b32.xlu2 %v4795_v34, %s3452_s15 }
 0x4c4   : > { %2343 = vrot.lane.b32.xlu0 %v4763_v38, %s3452_s15 }
 0x4c5   : > { %v2204_v48 = vpop.permute.xlu1 %2203  ;;  %v2218_v39 = vpop.permute.xlu2 %2217 }
 0x4c6   : > { %2298 = vst.msk [vmem:[#allocation2 + $0x9] sm:$0x7f] %vm865_vm15, %v2204_v48  ;;  %v2134_v49 = vpop.permute.xlu0 %2133 }
 0x4c7   : > { %2305 = vst.msk [vmem:[#allocation2 + $0x41] sm:$0xff] %vm863_vm14, %v2218_v39 }
 0x4c8   : > { %2196 = vst.msk [vmem:[#allocation2 + $0xe7] sm:$0xff] %vm364_vm13, %v2134_v49  ;;  %vm5873_vm13 = vcmask 294144  }
 0x4cb   : > { %2357 = vrot.lane.b32.xlu1 %v4876_v13, %s3452_s15  ;;  %2353 = vrot.lane.b32.xlu2 %v4843_v62, %s3452_s15 }
 0x4cc   : > { %2349 = vrot.lane.b32.xlu0 %v4811_v52, %s3452_s15 }
 0x4cd   : > { %v2210_v37 = vpop.permute.xlu1 %2209  ;;  %v2224_v11 = vpop.permute.xlu2 %2223 }
 0x4ce   : > { %2301 = vst.msk [vmem:[#allocation2 + $0x21] sm:$0xff] %vm863_vm14, %v2210_v37  ;;  %v2202_v30 = vpop.permute.xlu0 %2201 }
 0x4cf   : > { %2308 = vst.msk [vmem:[#allocation2 + $0x59] sm:$0x7f] %vm865_vm15, %v2224_v11 }
 0x4d0   : > { %2297 = vst.msk [vmem:[#allocation2 + $0x1] sm:$0xff] %vm863_vm14, %v2202_v30 }
 0x4d3   : > { %2363 = vrot.lane.b32.xlu1 %v4751_v56, %s3452_s15  ;;  %2359 = vrot.lane.b32.xlu2 %v4895_v15, %s3452_s15 }
 0x4d4   : > { %2355 = vrot.lane.b32.xlu0 %v4859_v60, %s3452_s15 }
 0x4d5   : > { %v2216_v58 = vpop.permute.xlu1 %2215  ;;  %v2230_v45 = vpop.permute.xlu2 %2229 }
 0x4d6   : > { %2304 = vst.msk [vmem:[#allocation2 + $0x39] sm:$0x7f] %vm865_vm15, %v2216_v58  ;;  %v2208_v32 = vpop.permute.xlu0 %2207 }
 0x4d7   : > { %2311 = vst.msk [vmem:[#allocation2 + $0x71] sm:$0xff] %vm863_vm14, %v2230_v45 }
 0x4d8   : > { %2300 = vst.msk [vmem:[#allocation2 + $0x19] sm:$0x7f] %vm865_vm15, %v2208_v32 }
 0x4db   : > { %2369 = vrot.lane.b32.xlu1 %v4799_v25, %s3452_s15  ;;  %2365 = vrot.lane.b32.xlu2 %v4767_v35, %s3452_s15 }
 0x4dc   : > { %2361 = vrot.lane.b32.xlu0 %v4735_v44, %s3452_s15 }
 0x4dd   : > { %v2222_v29 = vpop.permute.xlu1 %2221  ;;  %v2236_v48 = vpop.permute.xlu2 %2235 }
 0x4de   : > { %2307 = vst.msk [vmem:[#allocation2 + $0x51] sm:$0xff] %vm863_vm14, %v2222_v29  ;;  %v2214_v39 = vpop.permute.xlu0 %2213 }
 0x4df   : > { %2314 = vst.msk [vmem:[#allocation2 + $0x89] sm:$0x7f] %vm865_vm15, %v2236_v48 }
 0x4e0   : > { %2303 = vst.msk [vmem:[#allocation2 + $0x31] sm:$0xff] %vm863_vm14, %v2214_v39 }
 0x4e3   : > { %2375 = vrot.lane.b32.xlu1 %v4847_v63, %s3452_s15  ;;  %2371 = vrot.lane.b32.xlu2 %v4815_v53, %s3452_s15 }
 0x4e4   : > { %2367 = vrot.lane.b32.xlu0 %v4783_v51, %s3452_s15 }
 0x4e5   : > { %v2228_v49 = vpop.permute.xlu1 %2227  ;;  %v2242_v37 = vpop.permute.xlu2 %2241 }
 0x4e6   : > { %2310 = vst.msk [vmem:[#allocation2 + $0x69] sm:$0x7f] %vm865_vm15, %v2228_v49  ;;  %v2220_v11 = vpop.permute.xlu0 %2219 }
 0x4e7   : > { %2317 = vst.msk [vmem:[#allocation2 + $0xa1] sm:$0xff] %vm863_vm14, %v2242_v37 }
 0x4e8   : > { %2306 = vst.msk [vmem:[#allocation2 + $0x49] sm:$0x7f] %vm865_vm15, %v2220_v11 }
 0x4eb   : > { %2381 = vrot.lane.b32.xlu1 %v4899_v18, %s3452_s15  ;;  %2377 = vrot.lane.b32.xlu2 %v4863_v61, %s3452_s15 }
 0x4ec   : > { %2373 = vrot.lane.b32.xlu0 %v4831_v42, %s3452_s15 }
 0x4ed   : > { %v2234_v30 = vpop.permute.xlu1 %2233  ;;  %v2248_v58 = vpop.permute.xlu2 %2247 }
 0x4ee   : > { %2313 = vst.msk [vmem:[#allocation2 + $0x81] sm:$0xff] %vm863_vm14, %v2234_v30  ;;  %v2226_v45 = vpop.permute.xlu0 %2225 }
 0x4ef   : > { %2320 = vst.msk [vmem:[#allocation2 + $0xb9] sm:$0x7f] %vm865_vm15, %v2248_v58 }
 0x4f0   : > { %2309 = vst.msk [vmem:[#allocation2 + $0x61] sm:$0xff] %vm863_vm14, %v2226_v45 }
 0x4f3   : > { %2387 = vrot.lane.b32.xlu1 %v4941_v47, %s3452_s15  ;;  %2383 = vrot.lane.b32.xlu2 %v4913_v57, %s3452_s15 }
 0x4f4   : > { %2379 = vrot.lane.b32.xlu0 %v4880_v36, %s3452_s15 }
 0x4f5   : > { %v2240_v32 = vpop.permute.xlu1 %2239  ;;  %v2254_v29 = vpop.permute.xlu2 %2253 }
 0x4f6   : > { %2316 = vst.msk [vmem:[#allocation2 + $0x99] sm:$0x7f] %vm865_vm15, %v2240_v32  ;;  %v2232_v48 = vpop.permute.xlu0 %2231 }
 0x4f7   : > { %2323 = vst.msk [vmem:[#allocation2 + $0xd1] sm:$0xff] %vm863_vm14, %v2254_v29 }
 0x4f8   : > { %2312 = vst.msk [vmem:[#allocation2 + $0x79] sm:$0x7f] %vm865_vm15, %v2232_v48 }
 0x4fb   : > { %2457 = vrot.lane.b32.xlu1 %v4682_v41, %s3453_s16  ;;  %2389 = vrot.lane.b32.xlu2 %v5132_v33, %s3452_s15 }
 0x4fc   : > { %2385 = vrot.lane.b32.xlu0 %v4927_v14, %s3452_s15 }
 0x4fd   : > { %v2246_v39 = vpop.permute.xlu1 %2245  ;;  %v2260_v49 = vpop.permute.xlu2 %2259 }
 0x4fe   : > { %2319 = vst.msk [vmem:[#allocation2 + $0xb1] sm:$0xff] %vm863_vm14, %v2246_v39  ;;  %v2238_v37 = vpop.permute.xlu0 %2237 }
 0x4ff   : > { %2326 = vst.msk [vmem:[#allocation2 + $0xe9] sm:$0x7f] %vm865_vm15, %v2260_v49 }
 0x500   : > { %2315 = vst.msk [vmem:[#allocation2 + $0x91] sm:$0xff] %vm863_vm14, %v2238_v37 }
 0x503   : > { %2463 = vrot.lane.b32.xlu1 %v4710_v59, %s3453_s16  ;;  %2459 = vrot.lane.b32.xlu2 %v4691_v46, %s3453_s16 }
 0x504   : > { %2391 = vrot.lane.b32.xlu0 %v5119_v10, %s3452_s15 }
 0x505   : > { %v2252_v41 = vpop.permute.xlu1 %2251  ;;  %v2330_v11 = vpop.permute.xlu2 %2329 }
 0x506   : > { %2322 = vst.msk [vmem:[#allocation2 + $0xc9] sm:$0x7f] %vm865_vm15, %v2252_v41  ;;  %v2244_v30 = vpop.permute.xlu0 %2243 }
 0x507   : > { %2425 = vst.msk [vmem:[#allocation2] sm:$0xff] %vm993_vm0, %v2330_v11 }
 0x508   : > { %2318 = vst.msk [vmem:[#allocation2 + $0xa9] sm:$0x7f] %vm865_vm15, %v2244_v30 }
 0x50b   : > { %2469 = vrot.lane.b32.xlu1 %v4747_v55, %s3453_s16  ;;  %2465 = vrot.lane.b32.xlu2 %v4719_v0, %s3453_s16 }
 0x50c   : > { %2461 = vrot.lane.b32.xlu0 %v4701_v54, %s3453_s16 }
 0x50d   : > { %v2258_v46 = vpop.permute.xlu1 %2257  ;;  %v2336_v58 = vpop.permute.xlu2 %2335 }
 0x50e   : > { %2325 = vst.msk [vmem:[#allocation2 + $0xe1] sm:$0xff] %vm863_vm14, %v2258_v46  ;;  %v2250_v45 = vpop.permute.xlu0 %2249 }
 0x50f   : > { %2428 = vst.msk [vmem:[#allocation2 + $0x18] sm:$0xff] %vm993_vm0, %v2336_v58 }
 0x510   : > { %2321 = vst.msk [vmem:[#allocation2 + $0xc1] sm:$0xff] %vm863_vm14, %v2250_v45 }
 0x513   : > { %2475 = vrot.lane.b32.xlu1 %v4795_v34, %s3453_s16  ;;  %2471 = vrot.lane.b32.xlu2 %v4763_v38, %s3453_s16 }
 0x514   : > { %2467 = vrot.lane.b32.xlu0 %v4731_v43, %s3453_s16 }
 0x515   : > { %v2264_v32 = vpop.permute.xlu1 %2263  ;;  %v2342_v29 = vpop.permute.xlu2 %2341 }
 0x516   : > { %2328 = vst.msk [vmem:[#allocation2 + $0xf9] sm:$0x7f] %vm865_vm15, %v2264_v32  ;;  %v2256_v48 = vpop.permute.xlu0 %2255 }
 0x517   : > { %2431 = vst.msk [vmem:[#allocation2 + $0x30] sm:$0xff] %vm993_vm0, %v2342_v29 }
 0x518   : > { %2324 = vst.msk [vmem:[#allocation2 + $0xd9] sm:$0x7f] %vm865_vm15, %v2256_v48  ;;  %vm5875_vm15 = vmmov %vm5872_vm12 }
 0x51b   : > { %2481 = vrot.lane.b32.xlu1 %v4843_v62, %s3453_s16  ;;  %2477 = vrot.lane.b32.xlu2 %v4811_v52, %s3453_s16 }
 0x51c   : > { %2473 = vrot.lane.b32.xlu0 %v4779_v50, %s3453_s16 }
 0x51d   : > { %v2334_v39 = vpop.permute.xlu1 %2333  ;;  %v2348_v49 = vpop.permute.xlu2 %2347 }
 0x51e   : > { %2427 = vst.msk [vmem:[#allocation2 + $0x10] sm:$0xff] %vm993_vm0, %v2334_v39  ;;  %v2262_v37 = vpop.permute.xlu0 %2261 }
 0x51f   : > { %2434 = vst.msk [vmem:[#allocation2 + $0x48] sm:$0xff] %vm993_vm0, %v2348_v49 }
 0x520   : > { %2327 = vst.msk [vmem:[#allocation2 + $0xf1] sm:$0xff] %vm863_vm14, %v2262_v37  ;;  %vm5874_vm14 = vcmask 294145  }
 0x521   : > { %vm5878_vm7 = vmmov %vm5874_vm14 }
 0x522   : > { %vm5879_vm11 = vmmov %vm5878_vm7 }
 0x523   : > { %2487 = vrot.lane.b32.xlu1 %v4895_v15, %s3453_s16  ;;  %2483 = vrot.lane.b32.xlu2 %v4859_v60, %s3453_s16 }
 0x524   : > { %2479 = vrot.lane.b32.xlu0 %v4827_v40, %s3453_s16 }
 0x525   : > { %v2340_v41 = vpop.permute.xlu1 %2339  ;;  %v2354_v11 = vpop.permute.xlu2 %2353 }
 0x526   : > { %2430 = vst.msk [vmem:[#allocation2 + $0x28] sm:$0xff] %vm993_vm0, %v2340_v41  ;;  %v2332_v30 = vpop.permute.xlu0 %2331 }
 0x527   : > { %2437 = vst.msk [vmem:[#allocation2 + $0x60] sm:$0xff] %vm993_vm0, %v2354_v11 }
 0x528   : > { %2426 = vst.msk [vmem:[#allocation2 + $0x8] sm:$0xff] %vm993_vm0, %v2332_v30 }
 0x52b   : > { %2493 = vrot.lane.b32.xlu1 %v4767_v35, %s3453_s16  ;;  %2489 = vrot.lane.b32.xlu2 %v4735_v44, %s3453_s16 }
 0x52c   : > { %2485 = vrot.lane.b32.xlu0 %v4876_v13, %s3453_s16 }
 0x52d   : > { %v2346_v46 = vpop.permute.xlu1 %2345  ;;  %v2360_v58 = vpop.permute.xlu2 %2359 }
 0x52e   : > { %2433 = vst.msk [vmem:[#allocation2 + $0x40] sm:$0xff] %vm993_vm0, %v2346_v46  ;;  %v2338_v45 = vpop.permute.xlu0 %2337 }
 0x52f   : > { %2440 = vst.msk [vmem:[#allocation2 + $0x78] sm:$0xff] %vm993_vm0, %v2360_v58 }
 0x530   : > { %2429 = vst.msk [vmem:[#allocation2 + $0x20] sm:$0xff] %vm993_vm0, %v2338_v45 }
 0x533   : > { %2737 = vrot.lane.b32.xlu1 %v4767_v35, %s3455_s18  ;;  %2617 = vrot.lane.b32.xlu2 %v4767_v35, %s3454_s17 }
 0x534   : > { %2491 = vrot.lane.b32.xlu0 %v4751_v56, %s3453_s16 }
 0x535   : > { %v2352_v32 = vpop.permute.xlu1 %2351  ;;  %v2366_v29 = vpop.permute.xlu2 %2365 }
 0x536   : > { %2436 = vst.msk [vmem:[#allocation2 + $0x58] sm:$0xff] %vm993_vm0, %v2352_v32  ;;  %v2344_v48 = vpop.permute.xlu0 %2343 }
 0x537   : > { %2443 = vst.msk [vmem:[#allocation2 + $0x90] sm:$0xff] %vm993_vm0, %v2366_v29 }
 0x538   : > { %2432 = vst.msk [vmem:[#allocation2 + $0x38] sm:$0xff] %vm993_vm0, %v2344_v48 }
 0x53b   : > { %2859 = vrot.lane.b32.xlu1 %v4783_v51, %s3456_s19  ;;  %2739 = vrot.lane.b32.xlu2 %v4783_v51, %s3455_s18 }
 0x53c   : > { %2619 = vrot.lane.b32.xlu0 %v4783_v51, %s3454_s17 }
 0x53d   : > { %v2358_v39 = vpop.permute.xlu1 %2357  ;;  %v2372_v49 = vpop.permute.xlu2 %2371 }
 0x53e   : > { %2439 = vst.msk [vmem:[#allocation2 + $0x70] sm:$0xff] %vm993_vm0, %v2358_v39  ;;  %v2350_v37 = vpop.permute.xlu0 %2349 }
 0x53f   : > { %2446 = vst.msk [vmem:[#allocation2 + $0xa8] sm:$0xff] %vm993_vm0, %v2372_v49 }
 0x540   : > { %2435 = vst.msk [vmem:[#allocation2 + $0x50] sm:$0xff] %vm993_vm0, %v2350_v37 }
 0x543   : > { %2705 = vrot.lane.b32.xlu1 %v4701_v54, %s3455_s18  ;;  %2585 = vrot.lane.b32.xlu2 %v4701_v54, %s3454_s17 }
 0x544   : > { %2857 = vrot.lane.b32.xlu0 %v4767_v35, %s3456_s19 }
 0x545   : > { %v2364_v41 = vpop.permute.xlu1 %2363  ;;  %v2378_v11 = vpop.permute.xlu2 %2377 }
 0x546   : > { %2442 = vst.msk [vmem:[#allocation2 + $0x88] sm:$0xff] %vm993_vm0, %v2364_v41  ;;  %v2356_v30 = vpop.permute.xlu0 %2355 }
 0x547   : > { %2449 = vst.msk [vmem:[#allocation2 + $0xc0] sm:$0xff] %vm993_vm0, %v2378_v11 }
 0x548   : > { %2438 = vst.msk [vmem:[#allocation2 + $0x68] sm:$0xff] %vm993_vm0, %v2356_v30 }
 0x54b   : > { %2827 = vrot.lane.b32.xlu1 %v4710_v59, %s3456_s19  ;;  %2707 = vrot.lane.b32.xlu2 %v4710_v59, %s3455_s18 }
 0x54c   : > { %2587 = vrot.lane.b32.xlu0 %v4710_v59, %s3454_s17 }
 0x54d   : > { %v2370_v46 = vpop.permute.xlu1 %2369  ;;  %v2384_v35 = vpop.permute.xlu2 %2383 }
 0x54e   : > { %2445 = vst.msk [vmem:[#allocation2 + $0xa0] sm:$0xff] %vm993_vm0, %v2370_v46  ;;  %v2362_v58 = vpop.permute.xlu0 %2361 }
 0x54f   : > { %2452 = vst.msk [vmem:[#allocation2 + $0xd8] sm:$0xff] %vm993_vm0, %v2384_v35 }
 0x550   : > { %2441 = vst.msk [vmem:[#allocation2 + $0x80] sm:$0xff] %vm993_vm0, %v2362_v58 }
 0x553   : > { %2623 = vrot.lane.b32.xlu1 %v4815_v53, %s3454_s17  ;;  %2495 = vrot.lane.b32.xlu2 %v4783_v51, %s3453_s16 }
 0x554   : > { %2825 = vrot.lane.b32.xlu0 %v4701_v54, %s3456_s19 }
 0x555   : > { %v2376_v45 = vpop.permute.xlu1 %2375  ;;  %v2390_v59 = vpop.permute.xlu2 %2389 }
 0x556   : > { %2448 = vst.msk [vmem:[#allocation2 + $0xb8] sm:$0xff] %vm993_vm0, %v2376_v45  ;;  %v2368_v32 = vpop.permute.xlu0 %2367 }
 0x557   : > { %2455 = vst.msk [vmem:[#allocation2 + $0xf0] sm:$0xff] %vm993_vm0, %v2390_v59 }
 0x558   : > { %2444 = vst.msk [vmem:[#allocation2 + $0x98] sm:$0xff] %vm993_vm0, %v2368_v32 }
 0x55b   : > { %2861 = vrot.lane.b32.xlu1 %v4799_v25, %s3456_s19  ;;  %2741 = vrot.lane.b32.xlu2 %v4799_v25, %s3455_s18 }
 0x55c   : > { %2621 = vrot.lane.b32.xlu0 %v4799_v25, %s3454_s17 }
 0x55d   : > { %v2382_v51 = vpop.permute.xlu1 %2381  ;;  %v2460_v54 = vpop.permute.xlu2 %2459 }
 0x55e   : > { %2451 = vst.msk [vmem:[#allocation2 + $0xd0] sm:$0xff] %vm993_vm0, %v2382_v51  ;;  %v2374_v29 = vpop.permute.xlu0 %2373 }
 0x55f   : > { %2554 = vst.msk [vmem:[#allocation2 + $0x7] sm:$0xff] %vm1124_vm1, %v2460_v54  ;;  %v2997_v54 = vld [vmem:[%s5849_s5 + $0x10] sm:$0x3] }
 0x560   : > { %2447 = vst.msk [vmem:[#allocation2 + $0xb0] sm:$0xff] %vm993_vm0, %v2374_v29 }
 0x563   : > { %2591 = vrot.lane.b32.xlu1 %v4731_v43, %s3454_s17  ;;  %2863 = vrot.lane.b32.xlu2 %v4815_v53, %s3456_s19 }
 0x564   : > { %2743 = vrot.lane.b32.xlu0 %v4815_v53, %s3455_s18 }
 0x565   : > { %v2388_v48 = vpop.permute.xlu1 %2387  ;;  %v2466_v39 = vpop.permute.xlu2 %2465 }
 0x566   : > { %2454 = vst.msk [vmem:[#allocation2 + $0xe8] sm:$0xff] %vm993_vm0, %v2388_v48  ;;  %v2380_v49 = vpop.permute.xlu0 %2379 }
 0x567   : > { %2557 = vst.msk [vmem:[#allocation2 + $0x1f] sm:$0xfe] %vm1122_vm2, %v2466_v39  ;;  %v3007_v39 = vunpack.c.l.b16 %v2997_v54 }
 0x568   : > { %2450 = vst.msk [vmem:[#allocation2 + $0xc8] sm:$0xff] %vm993_vm0, %v2380_v49 }
 0x56b   : > { %2829 = vrot.lane.b32.xlu1 %v4719_v0, %s3456_s19  ;;  %2709 = vrot.lane.b32.xlu2 %v4719_v0, %s3455_s18 }
 0x56c   : > { %2589 = vrot.lane.b32.xlu0 %v4719_v0, %s3454_s17 }
 0x56d   : > { %v2458_v37 = vpop.permute.xlu1 %2457  ;;  %v2472_v41 = vpop.permute.xlu2 %2471 }
 0x56e   : > { %2553 = vst.msk [vmem:[#allocation2 - $0x1] sm:$0xfe] %vm1122_vm2, %v2458_v37  ;;  %v2386_v11 = vpop.permute.xlu0 %2385  ;;  %v3010_v37 = vpack.c.b16 %v3007_v39, %v3007_v39 }
 0x56f   : > { %2560 = vst.msk [vmem:[#allocation2 + $0x37] sm:$0xff] %vm1124_vm1, %v2472_v41 }
 0x570   : > { %2453 = vst.msk [vmem:[#allocation2 + $0xe0] sm:$0xff] %vm993_vm0, %v2386_v11  ;;  %v3062_v41 = vsel %vm1635_vm6, %v3010_v37, 0  ;;  %vm5877_vm6 = vmmov %vm5872_vm12 }
 0x571   : > { %3412 = vmatpush.bf16.msra.mxu3 %v3062_v41  ;;  %3069 = vmatpush.bf16.msra.mxu1 %v3062_v41  ;;  %vm5880_vm4 = vmmov %vm5877_vm6 }
 0x573   : > { %2499 = vrot.lane.b32.xlu1 %v4815_v53, %s3453_s16  ;;  %2831 = vrot.lane.b32.xlu2 %v4731_v43, %s3456_s19 }
 0x574   : > { %2711 = vrot.lane.b32.xlu0 %v4731_v43, %s3455_s18 }
 0x575   : > { %v2464_v30 = vpop.permute.xlu1 %2463  ;;  %v2478_v0 = vpop.permute.xlu2 %2477 }
 0x576   : > { %2556 = vst.msk [vmem:[#allocation2 + $0x17] sm:$0xff] %vm1124_vm1, %v2464_v30  ;;  %v2392_v46 = vpop.permute.xlu0 %2391 }
 0x577   : > { %2563 = vst.msk [vmem:[#allocation2 + $0x4f] sm:$0xfe] %vm1122_vm2, %v2478_v0 }
 0x578   : > { %2456 = vst.msk [vmem:[#allocation2 + $0xf8] sm:$0xff] %vm993_vm0, %v2392_v46  ;;  %v3407_v46 = vld [vmem:[%s5849_s5] sm:$0xff]  ;;  %vm5876_vm0 = vmmov %vm5873_vm13 }
 0x579   : > { %vm5881_vm8 = vmmov %vm5876_vm0 }
 0x57b   : > { %2745 = vrot.lane.b32.xlu1 %v4831_v42, %s3455_s18  ;;  %2625 = vrot.lane.b32.xlu2 %v4831_v42, %s3454_s17 }
 0x57c   : > { %2497 = vrot.lane.b32.xlu0 %v4799_v25, %s3453_s16 }
 0x57d   : > { %v2470_v53 = vpop.permute.xlu1 %2469  ;;  %v2484_v43 = vpop.permute.xlu2 %2483 }
 0x57e   : > { %2559 = vst.msk [vmem:[#allocation2 + $0x2f] sm:$0xfe] %vm1122_vm2, %v2470_v53  ;;  %v2462_v35 = vpop.permute.xlu0 %2461 }
 0x57f   : > { %2566 = vst.msk [vmem:[#allocation2 + $0x67] sm:$0xff] %vm1124_vm1, %v2484_v43 }
 0x580   : > { %2555 = vst.msk [vmem:[#allocation2 + $0xf] sm:$0xfe] %vm1122_vm2, %v2462_v35 }
 0x583   : > { %2867 = vrot.lane.b32.xlu1 %v4847_v63, %s3456_s19  ;;  %2747 = vrot.lane.b32.xlu2 %v4847_v63, %s3455_s18 }
 0x584   : > { %2627 = vrot.lane.b32.xlu0 %v4847_v63, %s3454_s17 }
 0x585   : > { %v2476_v58 = vpop.permute.xlu1 %2475  ;;  %v2490_v25 = vpop.permute.xlu2 %2489 }
 0x586   : > { %2562 = vst.msk [vmem:[#allocation2 + $0x47] sm:$0xff] %vm1124_vm1, %v2476_v58  ;;  %v2468_v45 = vpop.permute.xlu0 %2467 }
 0x587   : > { %2569 = vst.msk [vmem:[#allocation2 + $0x7f] sm:$0xfe] %vm1122_vm2, %v2490_v25 }
 0x588   : > { %2558 = vst.msk [vmem:[#allocation2 + $0x27] sm:$0xff] %vm1124_vm1, %v2468_v45 }
 0x58b   : > { %2713 = vrot.lane.b32.xlu1 %v4747_v55, %s3455_s18  ;;  %2593 = vrot.lane.b32.xlu2 %v4747_v55, %s3454_s17 }
 0x58c   : > { %2865 = vrot.lane.b32.xlu0 %v4831_v42, %s3456_s19 }
 0x58d   : > { %v2482_v59 = vpop.permute.xlu1 %2481  ;;  %v2618_v32 = vpop.permute.xlu2 %2617 }
 0x58e   : > { %2565 = vst.msk [vmem:[#allocation2 + $0x5f] sm:$0xfe] %vm1122_vm2, %v2482_v59  ;;  %v2474_v51 = vpop.permute.xlu0 %2473 }
 0x58f   : > { %2561 = vst.msk [vmem:[#allocation2 + $0x3f] sm:$0xfe] %vm1122_vm2, %v2474_v51 }
 0x593   : > { %2835 = vrot.lane.b32.xlu1 %v4763_v38, %s3456_s19  ;;  %2715 = vrot.lane.b32.xlu2 %v4763_v38, %s3455_s18 }
 0x594   : > { %2595 = vrot.lane.b32.xlu0 %v4763_v38, %s3454_s17  ;;  %v3408_v38 = vld [vmem:[%s5849_s5 + $0x8] sm:$0xff] }
 0x595   : > { %v2488_v29 = vpop.permute.xlu1 %2487  ;;  %v2740_v48 = vpop.permute.xlu2 %2739  ;;  %3413 = vmatpush.bf16.msra.mxu3 %v3408_v38  ;;  %3070 = vmatpush.bf16.msra.mxu1 %v3408_v38 }
 0x596   : > { %2568 = vst.msk [vmem:[#allocation2 + $0x77] sm:$0xff] %vm1124_vm1, %v2488_v29  ;;  %v2480_v49 = vpop.permute.xlu0 %2479 }
 0x597   : > { %2564 = vst.msk [vmem:[#allocation2 + $0x57] sm:$0xff] %vm1124_vm1, %v2480_v49 }
 0x599   : > { %3414 = vmatpush.bf16.msra.mxu3 %v3407_v46  ;;  %3071 = vmatpush.bf16.msra.mxu1 %v3407_v46 }
 0x59b   : > { %2629 = vrot.lane.b32.xlu1 %v4863_v61, %s3454_s17  ;;  %2501 = vrot.lane.b32.xlu2 %v4831_v42, %s3453_s16 }
 0x59c   : > { %2833 = vrot.lane.b32.xlu0 %v4747_v55, %s3456_s19 }
 0x59d   : > { %v2494_v11 = vpop.permute.xlu1 %2493  ;;  %v2586_v30 = vpop.permute.xlu2 %2585 }
 0x59e   : > { %2571 = vst.msk [vmem:[#allocation2 + $0x8f] sm:$0xfe] %vm1122_vm2, %v2494_v11  ;;  %v2486_v0 = vpop.permute.xlu0 %2485 }
 0x59f   : > { %2675 = vst.msk [vmem:[#allocation2 + $0x1] sm:$0xff] %vm419_vm9, %v2586_v30 }
 0x5a0   : > { %2567 = vst.msk [vmem:[#allocation2 + $0x6f] sm:$0xfe] %vm1122_vm2, %v2486_v0 }
 0x5a3   : > { %2751 = vrot.lane.b32.xlu1 %v4880_v36, %s3455_s18  ;;  %2631 = vrot.lane.b32.xlu2 %v4880_v36, %s3454_s17 }
 0x5a4   : > { %2503 = vrot.lane.b32.xlu0 %v4847_v63, %s3453_s16 }
 0x5a5   : > { %v2738_v55 = vpop.permute.xlu1 %2737  ;;  %v2708_v42 = vpop.permute.xlu2 %2707 }
 0x5a6   : > { %v2492_v53 = vpop.permute.xlu0 %2491 }
 0x5a7   : > { %2570 = vst.msk [vmem:[#allocation2 + $0x87] sm:$0xff] %vm1124_vm1, %v2492_v53 }
 0x5a8   : > { %2691 = vst.msk [vmem:[#allocation2 + $0x81] sm:$0xff] %vm419_vm9, %v2618_v32 }
 0x5a9   : > { %2811 = vst.msk [vmem:[#allocation2 + $0x80] sm:$0xff] %vm439_vm10, %v2738_v55 }
 0x5ab   : > { %2597 = vrot.lane.b32.xlu1 %v4779_v50, %s3454_s17  ;;  %2869 = vrot.lane.b32.xlu2 %v4863_v61, %s3456_s19 }
 0x5ac   : > { %2749 = vrot.lane.b32.xlu0 %v4863_v61, %s3455_s18 }
 0x5ad   : > { %v2860_v43 = vpop.permute.xlu1 %2859  ;;  %v2496_v63 = vpop.permute.xlu2 %2495 }
 0x5ae   : > { %2572 = vst.msk [vmem:[#allocation2 + $0x97] sm:$0xff] %vm1124_vm1, %v2496_v63  ;;  %v2620_v35 = vpop.permute.xlu0 %2619 }
 0x5af   : > { %2692 = vst.msk [vmem:[#allocation2 + $0x89] sm:$0x7f] %vm5872_vm12, %v2620_v35  ;;  %vm5882_vm12 = vmmov %vm5878_vm7 }
 0x5b0   : > { %2812 = vst.msk [vmem:[#allocation2 + $0x88] sm:$0xff] %vm439_vm10, %v2740_v48 }
 0x5b1   : > { %2932 = vst.msk [vmem:[#allocation2 + $0x87] sm:$0xff] %vm5873_vm13, %v2860_v43  ;;  %vm5883_vm13 = vmmov %vm5876_vm0 }
 0x5b3   : > { %2719 = vrot.lane.b32.xlu1 %v4795_v34, %s3455_s18  ;;  %2599 = vrot.lane.b32.xlu2 %v4795_v34, %s3454_s17 }
 0x5b4   : > { %2871 = vrot.lane.b32.xlu0 %v4880_v36, %s3456_s19 }
 0x5b5   : > { %v2706_v58 = vpop.permute.xlu1 %2705  ;;  %v2742_v25 = vpop.permute.xlu2 %2741 }
 0x5b6   : > { %2795 = vst.msk [vmem:[#allocation2] sm:$0xff] %vm439_vm10, %v2706_v58  ;;  %v2858_v45 = vpop.permute.xlu0 %2857 }
 0x5b7   : > { %2931 = vst.msk [vmem:[#allocation2 + $0x7f] sm:$0xfe] %vm5874_vm14, %v2858_v45  ;;  %vm5884_vm14 = vmmov %vm5880_vm4 }
 0x5b8   : > { %v2962_v29 = vld [vmem:[#allocation2 + $0x88] sm:$0xff] }
 0x5bb   : > { %2505 = vrot.lane.b32.xlu1 %v4863_v61, %s3453_s16  ;;  %2837 = vrot.lane.b32.xlu2 %v4779_v50, %s3456_s19 }
 0x5bc   : > { %2717 = vrot.lane.b32.xlu0 %v4779_v50, %s3455_s18 }
 0x5bd   : > { %v2828_v59 = vpop.permute.xlu1 %2827  ;;  %v2864_v32 = vpop.permute.xlu2 %2863 }
 0x5be   : > { %v2588_v51 = vpop.permute.xlu0 %2587  ;;  %v2961_v54 = vld [vmem:[#allocation2 + $0x80] sm:$0xff] }
 0x5bf   : > { %2676 = vst.msk [vmem:[#allocation2 + $0x9] sm:$0x7f] %vm5875_vm15, %v2588_v51  ;;  %v2985_v48 = vpack.c.bf16 %v2962_v29, %v2961_v54  ;;  %vm5885_vm15 = vmmov %vm5876_vm0 }
 0x5c0   : > { %2796 = vst.msk [vmem:[#allocation2 + $0x8] sm:$0xff] %vm439_vm10, %v2708_v42 }
 0x5c1   : > { %2916 = vst.msk [vmem:[#allocation2 + $0x7] sm:$0xff] %vm5876_vm0, %v2828_v59  ;;  %3393 = vmatmul.msk.bf16.vlgmr.msra.gmra.mxu3 %vm1586_vm5, %v2985_v48  ;;  %vm5886_vm0 = vmmov %vm5878_vm7 }
 0x5c3   : > { %2635 = vrot.lane.b32.xlu1 %v4913_v57, %s3454_s17  ;;  %2507 = vrot.lane.b32.xlu2 %v4880_v36, %s3453_s16 }
 0x5c4   : > { %2839 = vrot.lane.b32.xlu0 %v4795_v34, %s3456_s19 }
 0x5c5   : > { %v2624_v50 = vpop.permute.xlu1 %2623  ;;  %v2710_v61 = vpop.permute.xlu2 %2709 }
 0x5c6   : > { %2694 = vst.msk [vmem:[#allocation2 + $0x99] sm:$0x7f] %vm5877_vm6, %v2624_v50  ;;  %v2826_v39 = vpop.permute.xlu0 %2825  ;;  %vm5887_vm6 = vmmov %vm5880_vm4 }
 0x5c7   : > { %2915 = vst.msk [vmem:[#allocation2 - $0x1] sm:$0xfe] %vm5878_vm7, %v2826_v39  ;;  %vm5888_vm7 = vmmov %vm5881_vm8 }
 0x5c8   : > { %v2946_v41 = vld [vmem:[#allocation2 + $0x8] sm:$0xff] }
 0x5cb   : > { %2873 = vrot.lane.b32.xlu1 %v4899_v18, %s3456_s19  ;;  %2753 = vrot.lane.b32.xlu2 %v4899_v18, %s3455_s18 }
 0x5cc   : > { %2633 = vrot.lane.b32.xlu0 %v4899_v18, %s3454_s17 }
 0x5cd   : > { %v2862_v36 = vpop.permute.xlu1 %2861  ;;  %v2832_v49 = vpop.permute.xlu2 %2831 }
 0x5ce   : > { %v2622_v37 = vpop.permute.xlu0 %2621  ;;  %v2945_v34 = vld [vmem:[#allocation2] sm:$0xff] }
 0x5cf   : > { %2693 = vst.msk [vmem:[#allocation2 + $0x91] sm:$0xff] %vm419_vm9, %v2622_v37  ;;  %v2977_v38 = vpack.c.bf16 %v2946_v41, %v2945_v34 }
 0x5d0   : > { %2813 = vst.msk [vmem:[#allocation2 + $0x90] sm:$0xff] %vm439_vm10, %v2742_v25 }
 0x5d1   : > { %2933 = vst.msk [vmem:[#allocation2 + $0x8f] sm:$0xfe] %vm5879_vm11, %v2862_v36  ;;  %3385 = vmatmul.msk.bf16.vlgmr.msra.gmra.mxu1 %vm1586_vm5, %v2977_v38  ;;  %vm5889_vm11 = vmmov %vm5880_vm4 }
 0x5d3   : > { %2603 = vrot.lane.b32.xlu1 %v4827_v40, %s3454_s17  ;;  %2875 = vrot.lane.b32.xlu2 %v4913_v57, %s3456_s19 }
 0x5d4   : > { %2755 = vrot.lane.b32.xlu0 %v4913_v57, %s3455_s18 }
 0x5d5   : > { %v2592_v11 = vpop.permute.xlu1 %2591  ;;  %v2626_v30 = vpop.permute.xlu2 %2625 }
 0x5d6   : > { %2678 = vst.msk [vmem:[#allocation2 + $0x19] sm:$0x7f] %vm5880_vm4, %v2592_v11  ;;  %v2744_v0 = vpop.permute.xlu0 %2743  ;;  %vm5890_vm4 = vmmov %vm5886_vm0 }
 0x5d7   : > { %2814 = vst.msk [vmem:[#allocation2 + $0x98] sm:$0xff] %vm439_vm10, %v2744_v0 }
 0x5d8   : > { %2934 = vst.msk [vmem:[#allocation2 + $0x97] sm:$0xff] %vm5881_vm8, %v2864_v32  ;;  %vm5891_vm8 = vmmov %vm5887_vm6 }
 0x5db   : > { %2841 = vrot.lane.b32.xlu1 %v4811_v52, %s3456_s19  ;;  %2721 = vrot.lane.b32.xlu2 %v4811_v52, %s3455_s18 }
 0x5dc   : > { %2601 = vrot.lane.b32.xlu0 %v4811_v52, %s3454_s17 }
 0x5dd   : > { %v2830_v46 = vpop.permute.xlu1 %2829  ;;  %v2748_v55 = vpop.permute.xlu2 %2747 }
 0x5de   : > { %v2590_v42 = vpop.permute.xlu0 %2589 }
 0x5df   : > { %2677 = vst.msk [vmem:[#allocation2 + $0x11] sm:$0xff] %vm419_vm9, %v2590_v42  ;;  %v2963_v53 = vld [vmem:[#allocation2 + $0x90] sm:$0xff]  ;;  %v2964_v43 = vld [vmem:[#allocation2 + $0x98] sm:$0xff] }
 0x5e0   : > { %2797 = vst.msk [vmem:[#allocation2 + $0x10] sm:$0xff] %vm439_vm10, %v2710_v61  ;;  %v2986_v63 = vpack.c.bf16 %v2964_v43, %v2963_v53 }
 0x5e1   : > { %2917 = vst.msk [vmem:[#allocation2 + $0xf] sm:$0xfe] %vm5882_vm12, %v2830_v46  ;;  %vm5892_vm12 = vmmov %vm5886_vm0 }
 0x5e2   : > { %3394 = vmatmul.msk.bf16.gmra.mxu3 %vm1586_vm5, %v2986_v63 }
 0x5e3   : > { %2511 = vrot.lane.b32.xlu1 %v4913_v57, %s3453_s16  ;;  %2843 = vrot.lane.b32.xlu2 %v4827_v40, %s3456_s19 }
 0x5e4   : > { %2723 = vrot.lane.b32.xlu0 %v4827_v40, %s3455_s18 }
 0x5e5   : > { %v2500_v52 = vpop.permute.xlu1 %2499  ;;  %v2594_v35 = vpop.permute.xlu2 %2593 }
 0x5e6   : > { %2574 = vst.msk [vmem:[#allocation2 + $0xa7] sm:$0xff] %vm1124_vm1, %v2500_v52  ;;  %v2712_v58 = vpop.permute.xlu0 %2711 }
 0x5e7   : > { %2679 = vst.msk [vmem:[#allocation2 + $0x21] sm:$0xff] %vm419_vm9, %v2594_v35 }
 0x5e8   : > { %2798 = vst.msk [vmem:[#allocation2 + $0x18] sm:$0xff] %vm439_vm10, %v2712_v58 }
 0x5e9   : > { %2918 = vst.msk [vmem:[#allocation2 + $0x17] sm:$0xff] %vm5883_vm13, %v2832_v49  ;;  %vm5893_vm13 = vmmov %vm5888_vm7 }
 0x5eb   : > { %2757 = vrot.lane.b32.xlu1 %v4927_v14, %s3455_s18  ;;  %2637 = vrot.lane.b32.xlu2 %v4927_v14, %s3454_s17 }
 0x5ec   : > { %2509 = vrot.lane.b32.xlu0 %v4899_v18, %s3453_s16 }
 0x5ed   : > { %v2746_v40 = vpop.permute.xlu1 %2745  ;;  %v2716_v57 = vpop.permute.xlu2 %2715 }
 0x5ee   : > { %v2498_v25 = vpop.permute.xlu0 %2497 }
 0x5ef   : > { %2573 = vst.msk [vmem:[#allocation2 + $0x9f] sm:$0xfe] %vm1122_vm2, %v2498_v25 }
 0x5f0   : > { %2695 = vst.msk [vmem:[#allocation2 + $0xa1] sm:$0xff] %vm419_vm9, %v2626_v30  ;;  %v2947_v45 = vld [vmem:[#allocation2 + $0x10] sm:$0xff]  ;;  %v2948_v59 = vld [vmem:[#allocation2 + $0x18] sm:$0xff] }
 0x5f1   : > { %2815 = vst.msk [vmem:[#allocation2 + $0xa0] sm:$0xff] %vm439_vm10, %v2746_v40  ;;  %v2978_v32 = vpack.c.bf16 %v2948_v59, %v2947_v45 }
 0x5f3   : > { %3386 = vmatmul.msk.bf16.gmra.mxu1 %vm1586_vm5, %v2978_v32  ;;  %2879 = vrot.lane.b32.xlu1 %v4941_v47, %s3456_s19 }
 0x5f4   : > { %2759 = vrot.lane.b32.xlu2 %v4941_v47, %s3455_s18  ;;  %2639 = vrot.lane.b32.xlu0 %v4941_v47, %s3454_s17 }
 0x5f5   : > { %v2868_v18 = vpop.permute.xlu1 %2867  ;;  %v2502_v51 = vpop.permute.xlu2 %2501 }
 0x5f6   : > { %2575 = vst.msk [vmem:[#allocation2 + $0xaf] sm:$0xfe] %vm1122_vm2, %v2502_v51  ;;  %v2628_v54 = vpop.permute.xlu0 %2627 }
 0x5f7   : > { %2696 = vst.msk [vmem:[#allocation2 + $0xa9] sm:$0x7f] %vm5884_vm14, %v2628_v54  ;;  %vm5894_vm14 = vmmov %vm5886_vm0  ;;  %v5611_v54 = vld [vmem:[%s5850_s6] ss:$0 sm:$0xff] }
 0x5f8   : > { %2816 = vst.msk [vmem:[#allocation2 + $0xa8] sm:$0xff] %vm439_vm10, %v2748_v55 }
 0x5f9   : > { %2936 = vst.msk [vmem:[#allocation2 + $0xa7] sm:$0xff] %vm5885_vm15, %v2868_v18  ;;  %vm5895_vm15 = vmmov %vm5887_vm6 }
 0x5fb   : > { %2725 = vrot.lane.b32.xlu1 %v4843_v62, %s3455_s18 }
 0x5fc   : > { %2605 = vrot.lane.b32.xlu2 %v4843_v62, %s3454_s17  ;;  %2877 = vrot.lane.b32.xlu0 %v4927_v14, %s3456_s19 }
 0x5fd   : > { %v2714_v29 = vpop.permute.xlu1 %2713  ;;  %v2632_v48 = vpop.permute.xlu2 %2631 }
 0x5fe   : > { %2799 = vst.msk [vmem:[#allocation2 + $0x20] sm:$0xff] %vm439_vm10, %v2714_v29  ;;  %v2866_v50 = vpop.permute.xlu0 %2865 }
 0x5ff   : > { %2935 = vst.msk [vmem:[#allocation2 + $0x9f] sm:$0xfe] %vm5886_vm0, %v2866_v50  ;;  %vm5896_vm0 = vmmov %vm5888_vm7 }
 0x600   : > { %v2966_v37 = vld [vmem:[#allocation2 + $0xa8] sm:$0xff] }
 0x603   : > { %2847 = vrot.lane.b32.xlu1 %v4859_v60, %s3456_s19 }
 0x604   : > { %2727 = vrot.lane.b32.xlu2 %v4859_v60, %s3455_s18  ;;  %2607 = vrot.lane.b32.xlu0 %v4859_v60, %s3454_s17 }
 0x605   : > { %v2836_v61 = vpop.permute.xlu1 %2835  ;;  %v2870_v39 = vpop.permute.xlu2 %2869 }
 0x606   : > { %v2596_v36 = vpop.permute.xlu0 %2595  ;;  %v2965_v49 = vld [vmem:[#allocation2 + $0xa0] sm:$0xff] }
 0x607   : > { %2680 = vst.msk [vmem:[#allocation2 + $0x29] sm:$0x7f] %vm5887_vm6, %v2596_v36  ;;  %v2987_v34 = vpack.c.bf16 %v2966_v37, %v2965_v49  ;;  %vm5897_vm6 = vmmov %vm5890_vm4 }
 0x608   : > { %2800 = vst.msk [vmem:[#allocation2 + $0x28] sm:$0xff] %vm439_vm10, %v2716_v57 }
 0x609   : > { %2920 = vst.msk [vmem:[#allocation2 + $0x27] sm:$0xff] %vm5888_vm7, %v2836_v61  ;;  %3395 = vmatmul.msk.bf16.gmra.mxu3 %vm1586_vm5, %v2987_v34  ;;  %vm5898_vm7 = vmmov %vm5891_vm8 }
 0x60b   : > { %2641 = vrot.lane.b32.xlu1 %v5132_v33, %s3454_s17 }
 0x60c   : > { %2513 = vrot.lane.b32.xlu2 %v4927_v14, %s3453_s16  ;;  %2845 = vrot.lane.b32.xlu0 %v4843_v62, %s3456_s19 }
 0x60d   : > { %v2630_v60 = vpop.permute.xlu1 %2629  ;;  %v2600_v41 = vpop.permute.xlu2 %2599 }
 0x60e   : > { %2682 = vst.msk [vmem:[#allocation2 + $0x39] sm:$0x7f] %vm5889_vm11, %v2600_v41  ;;  %v2834_v38 = vpop.permute.xlu0 %2833  ;;  %vm5899_vm11 = vmmov %vm5896_vm0 }
 0x60f   : > { %2919 = vst.msk [vmem:[#allocation2 + $0x1f] sm:$0xfe] %vm5890_vm4, %v2834_v38 }
 0x610   : > { %v2950_v0 = vld [vmem:[#allocation2 + $0x28] sm:$0xff] }
 0x613   : > { %2763 = vrot.lane.b32.xlu1 %v5119_v10, %s3455_s18 }
 0x614   : > { %2643 = vrot.lane.b32.xlu2 %v5119_v10, %s3454_s17  ;;  %2515 = vrot.lane.b32.xlu0 %v4941_v47, %s3453_s16 }
 0x615   : > { %v2752_v14 = vpop.permute.xlu1 %2751  ;;  %v2838_v11 = vpop.permute.xlu2 %2837 }
 0x616   : > { %v2504_v30 = vpop.permute.xlu0 %2503  ;;  %v2949_v62 = vld [vmem:[#allocation2 + $0x20] sm:$0xff] }
 0x617   : > { %2576 = vst.msk [vmem:[#allocation2 + $0xb7] sm:$0xff] %vm1124_vm1, %v2504_v30  ;;  %v2979_v46 = vpack.c.bf16 %v2950_v0, %v2949_v62 }
 0x618   : > { %2698 = vst.msk [vmem:[#allocation2 + $0xb9] sm:$0x7f] %vm5891_vm8, %v2632_v48  ;;  %vm5900_vm8 = vmmov %vm5896_vm0 }
 0x619   : > { %2697 = vst.msk [vmem:[#allocation2 + $0xb1] sm:$0xff] %vm419_vm9, %v2630_v60  ;;  %3387 = vmatmul.msk.bf16.gmra.mxu1 %vm1586_vm5, %v2979_v46 }
 0x61a   : > { %2818 = vst.msk [vmem:[#allocation2 + $0xb8] sm:$0xff] %vm439_vm10, %v2752_v14 }
 0x61b   : > { %2609 = vrot.lane.b32.xlu1 %v4876_v13, %s3454_s17 }
 0x61c   : > { %2881 = vrot.lane.b32.xlu2 %v5132_v33, %s3456_s19  ;;  %2761 = vrot.lane.b32.xlu0 %v5132_v33, %s3455_s18 }
 0x61d   : > { %v2598_v47 = vpop.permute.xlu1 %2597  ;;  %v2508_v55 = vpop.permute.xlu2 %2507 }
 0x61e   : > { %2681 = vst.msk [vmem:[#allocation2 + $0x31] sm:$0xff] %vm419_vm9, %v2598_v47  ;;  %v2750_v42 = vpop.permute.xlu0 %2749 }
 0x61f   : > { %2578 = vst.msk [vmem:[#allocation2 + $0xc7] sm:$0xff] %vm1124_vm1, %v2508_v55 }
 0x620   : > { %2817 = vst.msk [vmem:[#allocation2 + $0xb0] sm:$0xff] %vm439_vm10, %v2750_v42 }
 0x621   : > { %2937 = vst.msk [vmem:[#allocation2 + $0xaf] sm:$0xfe] %vm5892_vm12, %v2870_v39  ;;  %vm5901_vm12 = vmmov %vm5898_vm7 }
 0x623   : > { %2731 = vrot.lane.b32.xlu1 %v4895_v15, %s3455_s18 }
 0x624   : > { %2611 = vrot.lane.b32.xlu2 %v4895_v15, %s3454_s17  ;;  %2883 = vrot.lane.b32.xlu0 %v5119_v10, %s3456_s19 }
 0x625   : > { %v2720_v53 = vpop.permute.xlu1 %2719  ;;  %v2754_v43 = vpop.permute.xlu2 %2753 }
 0x626   : > { %2802 = vst.msk [vmem:[#allocation2 + $0x38] sm:$0xff] %vm439_vm10, %v2720_v53  ;;  %v2872_v63 = vpop.permute.xlu0 %2871 }
 0x627   : > { %2938 = vst.msk [vmem:[#allocation2 + $0xb7] sm:$0xff] %vm5893_vm13, %v2872_v63  ;;  %vm5902_vm13 = vmmov %vm5896_vm0 }
 0x62b   : > { %2517 = vrot.lane.b32.xlu1 %v5132_v33, %s3453_s16 }
 0x62c   : > { %2849 = vrot.lane.b32.xlu2 %v4876_v13, %s3456_s19  ;;  %2729 = vrot.lane.b32.xlu0 %v4876_v13, %s3455_s18 }
 0x62d   : > { %v2506_v52 = vpop.permute.xlu1 %2505  ;;  %v2876_v35 = vpop.permute.xlu2 %2875 }
 0x62e   : > { %2577 = vst.msk [vmem:[#allocation2 + $0xbf] sm:$0xfe] %vm1122_vm2, %v2506_v52  ;;  %v2718_v58 = vpop.permute.xlu0 %2717  ;;  %v2967_v40 = vld [vmem:[#allocation2 + $0xb0] sm:$0xff]  ;;  %v2968_v57 = vld [vmem:[#allocation2 + $0xb8] sm:$0xff] }
 0x62f   : > { %2801 = vst.msk [vmem:[#allocation2 + $0x30] sm:$0xff] %vm439_vm10, %v2718_v58  ;;  %v2988_v25 = vpack.c.bf16 %v2968_v57, %v2967_v40 }
 0x630   : > { %2921 = vst.msk [vmem:[#allocation2 + $0x2f] sm:$0xfe] %vm5894_vm14, %v2838_v11  ;;  %vm5903_vm14 = vmmov %vm5890_vm4 }
 0x631   : > { %3396 = vmatmul.msk.bf16.gmra.mxu3 %vm1586_vm5, %v2988_v25 }
 0x633   : > { %2615 = vrot.lane.b32.xlu1 %v4751_v56, %s3454_s17 }
 0x634   : > { %2519 = vrot.lane.b32.xlu2 %v5119_v10, %s3453_s16  ;;  %2851 = vrot.lane.b32.xlu0 %v4895_v15, %s3456_s19 }
 0x635   : > { %v2636_v13 = vpop.permute.xlu1 %2635  ;;  %v2722_v33 = vpop.permute.xlu2 %2721 }
 0x636   : > { %2700 = vst.msk [vmem:[#allocation2 + $0xc9] sm:$0x7f] %vm5895_vm15, %v2636_v13  ;;  %v2840_v45 = vpop.permute.xlu0 %2839  ;;  %vm5904_vm15 = vmmov %vm5898_vm7 }
 0x637   : > { %2922 = vst.msk [vmem:[#allocation2 + $0x37] sm:$0xff] %vm5896_vm0, %v2840_v45 }
 0x63b   : > { %2853 = vrot.lane.b32.xlu1 %v4735_v44, %s3456_s19 }
 0x63c   : > { %2733 = vrot.lane.b32.xlu2 %v4735_v44, %s3455_s18  ;;  %2613 = vrot.lane.b32.xlu0 %v4735_v44, %s3454_s17  ;;  %v5616_v44 = vld [vmem:[%s5851_s7] ss:$0 sm:$0xff] }
 0x63d   : > { %v2874_v10 = vpop.permute.xlu1 %2873  ;;  %v2844_v59 = vpop.permute.xlu2 %2843 }
 0x63e   : > { %v2634_v32 = vpop.permute.xlu0 %2633  ;;  %v2951_v15 = vld [vmem:[#allocation2 + $0x30] sm:$0xff]  ;;  %v2952_v18 = vld [vmem:[#allocation2 + $0x38] sm:$0xff] }
 0x63f   : > { %2699 = vst.msk [vmem:[#allocation2 + $0xc1] sm:$0xff] %vm419_vm9, %v2634_v32  ;;  %v2980_v51 = vpack.c.bf16 %v2952_v18, %v2951_v15 }
 0x640   : > { %2819 = vst.msk [vmem:[#allocation2 + $0xc0] sm:$0xff] %vm439_vm10, %v2754_v43 }
 0x641   : > { %2939 = vst.msk [vmem:[#allocation2 + $0xbf] sm:$0xfe] %vm5897_vm6, %v2874_v10  ;;  %3388 = vmatmul.msk.bf16.gmra.mxu1 %vm1586_vm5, %v2980_v51  ;;  %vm5905_vm6 = vmmov %vm5898_vm7 }
 0x644   : > { %2855 = vrot.lane.b32.xlu2 %v4751_v56, %s3456_s19  ;;  %2735 = vrot.lane.b32.xlu0 %v4751_v56, %s3455_s18  ;;  %v3113_v29 = vpop.f32.mrf.mxu3  ;;  %s5631_s19 = scalar_lea.vmem %s5852_s8, %s3403_s4 }
 0x645   : > { %v3173_v48 = vmul.f32 %v5611_v54, %v3113_v29  ;;  %v2604_v50 = vpop.permute.xlu1 %2603  ;;  %v2638_v61 = vpop.permute.xlu2 %2637 }
 0x646   : > { %2684 = vst.msk [vmem:[#allocation2 + $0x49] sm:$0x7f] %vm5898_vm7, %v2604_v50  ;;  %v2756_v39 = vpop.permute.xlu0 %2755  ;;  %vm5906_vm7 = vmmov %vm5890_vm4 }
 0x647   : > { %v3209_v36 = vadd.f32 %v5616_v44, %v3173_v48  ;;  %2820 = vst.msk [vmem:[#allocation2 + $0xc8] sm:$0xff] %vm439_vm10, %v2756_v39 }
 0x648   : > { %2940 = vst.msk [vmem:[#allocation2 + $0xc7] sm:$0xff] %vm5899_vm11, %v2876_v35  ;;  %vm5907_vm11 = vmmov %vm5905_vm6 }
 0x649   : > { %v3241_v56 = vadd.f32 %v3209_v36, %v3602_v17 }
 0x64b   : > { %3273 = vst.msk [vmem:[%s5631_s19 + $0x80] sm:$0xff] %vm341_vm3, %v3241_v56 }
 0x64c   : > { %v3115_v49 = vpop.f32.mrf.mxu3 }
 0x64d   : > { %v3174_v37 = vmul.f32 %v5611_v54, %v3115_v49  ;;  %v2842_v34 = vpop.permute.xlu1 %2841 }
 0x64e   : > { %v2760_v60 = vpop.permute.xlu2 %2759  ;;  %v3073_v41 = vpop.f32.mrf.mxu1 }
 0x64f   : > { %v3210_v38 = vadd.f32 %v5616_v44, %v3174_v37  ;;  %v3157_v14 = vmul.f32 %v5611_v54, %v3073_v41  ;;  %v2602_v11 = vpop.permute.xlu0 %2601  ;;  %v2969_v30 = vld [vmem:[#allocation2 + $0xc0] sm:$0xff]  ;;  %v2970_v62 = vld [vmem:[#allocation2 + $0xc8] sm:$0xff] }
 0x650   : > { %2683 = vst.msk [vmem:[#allocation2 + $0x41] sm:$0xff] %vm419_vm9, %v2602_v11  ;;  %v2989_v17 = vpack.c.bf16 %v2970_v62, %v2969_v30 }
 0x651   : > { %v3242_v0 = vadd.f32 %v3210_v38, %v3599_v16  ;;  %v3193_v46 = vadd.f32 %v5616_v44, %v3157_v14  ;;  %2803 = vst.msk [vmem:[#allocation2 + $0x40] sm:$0xff] %vm439_vm10, %v2722_v33 }
 0x652   : > { %2923 = vst.msk [vmem:[#allocation2 + $0x3f] sm:$0xfe] %vm5890_vm4, %v2842_v34  ;;  %3397 = vmatmul.msk.bf16.gmra.mxu3 %vm1586_vm5, %v2989_v17 }
 0x653   : > { %3274 = vst.msk [vmem:[%s5631_s19 + $0x88] sm:$0xff] %vm341_vm3, %v3242_v0  ;;  %v3225_v47 = vadd.f32 %v3193_v46, %v3530_v3 }
 0x655   : > { %3257 = vst.msk [vmem:[%s5631_s19] sm:$0xff] %vm341_vm3, %v3225_v47  ;;  %v2512_v55 = vpop.permute.xlu1 %2511 }
 0x656   : > { %2580 = vst.msk [vmem:[#allocation2 + $0xd7] sm:$0xff] %vm1124_vm1, %v2512_v55  ;;  %v2606_v42 = vpop.permute.xlu2 %2605  ;;  %v3075_v16 = vpop.f32.mrf.mxu1 }
 0x657   : > { %2685 = vst.msk [vmem:[#allocation2 + $0x51] sm:$0xff] %vm419_vm9, %v2606_v42  ;;  %v3158_v53 = vmul.f32 %v5611_v54, %v3075_v16  ;;  %v2724_v43 = vpop.permute.xlu0 %2723 }
 0x658   : > { %2804 = vst.msk [vmem:[#allocation2 + $0x48] sm:$0xff] %vm439_vm10, %v2724_v43 }
 0x659   : > { %v3194_v63 = vadd.f32 %v5616_v44, %v3158_v53  ;;  %2924 = vst.msk [vmem:[#allocation2 + $0x47] sm:$0xff] %vm5900_vm8, %v2844_v59  ;;  %vm5909_vm8 = vmmov %vm5890_vm4 }
 0x65b   : > { %v3226_v3 = vadd.f32 %v3194_v63, %v3545_v6 }
 0x65d   : > { %3258 = vst.msk [vmem:[%s5631_s19 + $0x8] sm:$0xff] %vm341_vm3, %v3226_v3  ;;  %v2758_v52 = vpop.permute.xlu1 %2757 }
 0x65e   : > { %v2728_v35 = vpop.permute.xlu2 %2727 }
 0x65f   : > { %v2510_v58 = vpop.permute.xlu0 %2509 }
 0x660   : > { %2579 = vst.msk [vmem:[#allocation2 + $0xcf] sm:$0xfe] %vm1122_vm2, %v2510_v58  ;;  %v2953_v40 = vld [vmem:[#allocation2 + $0x40] sm:$0xff]  ;;  %v2954_v57 = vld [vmem:[#allocation2 + $0x48] sm:$0xff] }
 0x661   : > { %2701 = vst.msk [vmem:[#allocation2 + $0xd1] sm:$0xff] %vm419_vm9, %v2638_v61  ;;  %v2981_v25 = vpack.c.bf16 %v2954_v57, %v2953_v40 }
 0x662   : > { %2821 = vst.msk [vmem:[#allocation2 + $0xd0] sm:$0xff] %vm439_vm10, %v2758_v52 }
 0x663   : > { %3389 = vmatmul.msk.bf16.gmra.mxu1 %vm1586_vm5, %v2981_v25 }
 0x665   : > { %v3118_v13 = vpop.f32.mrf.mxu3  ;;  %v2880_v33 = vpop.permute.xlu1 %2879 }
 0x666   : > { %v3175_v6 = vmul.f32 %v5611_v54, %v3118_v13  ;;  %v2514_v45 = vpop.permute.xlu2 %2513 }
 0x667   : > { %2581 = vst.msk [vmem:[#allocation2 + $0xdf] sm:$0xfe] %vm1122_vm2, %v2514_v45  ;;  %v2640_v10 = vpop.permute.xlu0 %2639 }
 0x668   : > { %v3211_v59 = vadd.f32 %v5616_v44, %v3175_v6  ;;  %2702 = vst.msk [vmem:[#allocation2 + $0xd9] sm:$0x7f] %vm5901_vm12, %v2640_v10  ;;  %vm5911_vm12 = vmmov %vm5896_vm0 }
 0x669   : > { %2822 = vst.msk [vmem:[#allocation2 + $0xd8] sm:$0xff] %vm439_vm10, %v2760_v60 }
 0x66a   : > { %v3243_v32 = vadd.f32 %v3211_v59, %v3620_v21  ;;  %2942 = vst.msk [vmem:[#allocation2 + $0xd7] sm:$0xff] %vm5902_vm13, %v2880_v33  ;;  %vm5912_vm13 = vmmov %vm5890_vm4 }
 0x66c   : > { %3275 = vst.msk [vmem:[%s5631_s19 + $0x90] sm:$0xff] %vm341_vm3, %v3243_v32 }
 0x66d   : > { %v3120_v15 = vpop.f32.mrf.mxu3  ;;  %v2726_v18 = vpop.permute.xlu1 %2725 }
 0x66e   : > { %v3176_v51 = vmul.f32 %v5611_v54, %v3120_v15  ;;  %2805 = vst.msk [vmem:[#allocation2 + $0x50] sm:$0xff] %vm439_vm10, %v2726_v18  ;;  %v2644_v29 = vpop.permute.xlu2 %2643 }
 0x66f   : > { %v2878_v48 = vpop.permute.xlu0 %2877 }
 0x670   : > { %v3212_v50 = vadd.f32 %v5616_v44, %v3176_v51  ;;  %2941 = vst.msk [vmem:[#allocation2 + $0xcf] sm:$0xfe] %vm5903_vm14, %v2878_v48  ;;  %v3078_v61 = vpop.f32.mrf.mxu1 }
 0x671   : > { %v3159_v21 = vmul.f32 %v5611_v54, %v3078_v61  ;;  %v2972_v41 = vld [vmem:[#allocation2 + $0xd8] sm:$0xff] }
 0x672   : > { %v3244_v39 = vadd.f32 %v3212_v50, %v3617_v20 }
 0x673   : > { %v3195_v36 = vadd.f32 %v5616_v44, %v3159_v21 }
 0x674   : > { %3276 = vst.msk [vmem:[%s5631_s19 + $0x98] sm:$0xff] %vm341_vm3, %v3244_v39 }
 0x675   : > { %v3227_v56 = vadd.f32 %v3195_v36, %v3527_v2  ;;  %v2848_v49 = vpop.permute.xlu1 %2847 }
 0x676   : > { %v2882_v37 = vpop.permute.xlu2 %2881 }
 0x677   : > { %3259 = vst.msk [vmem:[%s5631_s19 + $0x10] sm:$0xff] %vm341_vm3, %v3227_v56  ;;  %v2608_v34 = vpop.permute.xlu0 %2607  ;;  %v2971_v60 = vld [vmem:[#allocation2 + $0xd0] sm:$0xff] }
 0x678   : > { %2686 = vst.msk [vmem:[#allocation2 + $0x59] sm:$0x7f] %vm5904_vm15, %v2608_v34  ;;  %v3080_v38 = vpop.f32.mrf.mxu1  ;;  %v2990_v14 = vpack.c.bf16 %v2972_v41, %v2971_v60 }
 0x679   : > { %2806 = vst.msk [vmem:[#allocation2 + $0x58] sm:$0xff] %vm439_vm10, %v2728_v35  ;;  %v3160_v20 = vmul.f32 %v5611_v54, %v3080_v38 }
 0x67a   : > { %2926 = vst.msk [vmem:[#allocation2 + $0x57] sm:$0xff] %vm5896_vm0, %v2848_v49  ;;  %3398 = vmatmul.msk.bf16.gmra.mxu3 %vm1586_vm5, %v2990_v14 }
 0x67b   : > { %v3196_v2 = vadd.f32 %v5616_v44, %v3160_v20 }
 0x67d   : > { %v3228_v11 = vadd.f32 %v3196_v2, %v3542_v5  ;;  %v2642_v30 = vpop.permute.xlu1 %2641 }
 0x67e   : > { %v2612_v62 = vpop.permute.xlu2 %2611 }
 0x67f   : > { %3260 = vst.msk [vmem:[%s5631_s19 + $0x18] sm:$0xff] %vm341_vm3, %v3228_v11  ;;  %v2846_v17 = vpop.permute.xlu0 %2845 }
 0x680   : > { %2688 = vst.msk [vmem:[#allocation2 + $0x69] sm:$0x7f] %vm5905_vm6, %v2612_v62 }
 0x681   : > { %2925 = vst.msk [vmem:[#allocation2 + $0x4f] sm:$0xfe] %vm5906_vm7, %v2846_v17  ;;  %v2956_v42 = vld [vmem:[#allocation2 + $0x58] sm:$0xff] }
 0x685   : > { %v2764_v0 = vpop.permute.xlu1 %2763 }
 0x686   : > { %v2850_v46 = vpop.permute.xlu2 %2849 }
 0x687   : > { %v2516_v47 = vpop.permute.xlu0 %2515 }
 0x688   : > { %2582 = vst.msk [vmem:[#allocation2 + $0xe7] sm:$0xff] %vm1124_vm1, %v2516_v47  ;;  %v2955_v55 = vld [vmem:[#allocation2 + $0x50] sm:$0xff] }
 0x689   : > { %2704 = vst.msk [vmem:[#allocation2 + $0xe9] sm:$0x7f] %vm5907_vm11, %v2644_v29  ;;  %v2982_v5 = vpack.c.bf16 %v2956_v42, %v2955_v55 }
 0x68a   : > { %2703 = vst.msk [vmem:[#allocation2 + $0xe1] sm:$0xff] %vm419_vm9, %v2642_v30 }
 0x68b   : > { %3390 = vmatmul.msk.bf16.gmra.mxu1 %vm1586_vm5, %v2982_v5  ;;  %2824 = vst.msk [vmem:[#allocation2 + $0xe8] sm:$0xff] %vm439_vm10, %v2764_v0 }
 0x68c   : > { %v3123_v16 = vpop.f32.mrf.mxu3 }
 0x68d   : > { %v3177_v53 = vmul.f32 %v5611_v54, %v3123_v16  ;;  %v2610_v43 = vpop.permute.xlu1 %2609 }
 0x68e   : > { %2687 = vst.msk [vmem:[#allocation2 + $0x61] sm:$0xff] %vm419_vm9, %v2610_v43  ;;  %v2520_v63 = vpop.permute.xlu2 %2519 }
 0x68f   : > { %v3213_v3 = vadd.f32 %v5616_v44, %v3177_v53  ;;  %2584 = vst.msk [vmem:[#allocation2 + $0xf7] sm:$0xff] %vm1124_vm1, %v2520_v63  ;;  %v2762_v52 = vpop.permute.xlu0 %2761  ;;  %vm5908_vm1 = vmmov %vm5896_vm0 }
 0x690   : > { %2823 = vst.msk [vmem:[#allocation2 + $0xe0] sm:$0xff] %vm439_vm10, %v2762_v52 }
 0x691   : > { %v3245_v35 = vadd.f32 %v3213_v3, %v3614_v19  ;;  %2943 = vst.msk [vmem:[#allocation2 + $0xdf] sm:$0xfe] %vm5890_vm4, %v2882_v37 }
 0x693   : > { %3277 = vst.msk [vmem:[%s5631_s19 + $0xa0] sm:$0xff] %vm341_vm3, %v3245_v35 }
 0x694   : > { %v3125_v58 = vpop.f32.mrf.mxu3 }
 0x695   : > { %v3178_v40 = vmul.f32 %v5611_v54, %v3125_v58  ;;  %v2732_v57 = vpop.permute.xlu1 %2731 }
 0x696   : > { %2808 = vst.msk [vmem:[#allocation2 + $0x68] sm:$0xff] %vm439_vm10, %v2732_v57  ;;  %v3083_v25 = vpop.f32.mrf.mxu1  ;;  %v2734_v39 = vpop.permute.xlu2 %2733  ;;  %v2976_v37 = vld [vmem:[#allocation2 + $0xf8] sm:$0xff] }
 0x697   : > { %v3214_v13 = vadd.f32 %v5616_v44, %v3178_v40  ;;  %v3161_v33 = vmul.f32 %v5611_v54, %v3083_v25  ;;  %v2884_v6 = vpop.permute.xlu0 %2883 }
 0x698   : > { %2944 = vst.msk [vmem:[#allocation2 + $0xe7] sm:$0xff] %vm5908_vm1, %v2884_v6 }
 0x699   : > { %v3246_v19 = vadd.f32 %v3214_v13, %v3635_v24  ;;  %v3197_v45 = vadd.f32 %v5616_v44, %v3161_v33 }
 0x69b   : > { %3278 = vst.msk [vmem:[%s5631_s19 + $0xa8] sm:$0xff] %vm341_vm3, %v3246_v19  ;;  %v3229_v10 = vadd.f32 %v3197_v45, %v3524_v1 }
 0x69d   : > { %3261 = vst.msk [vmem:[%s5631_s19 + $0x20] sm:$0xff] %vm341_vm3, %v3229_v10  ;;  %v2518_v59 = vpop.permute.xlu1 %2517 }
 0x69e   : > { %2583 = vst.msk [vmem:[#allocation2 + $0xef] sm:$0xfe] %vm1122_vm2, %v2518_v59  ;;  %v3085_v32 = vpop.f32.mrf.mxu1  ;;  %vm5910_vm2 = vmmov %vm5905_vm6  ;;  %v2856_v2 = vpop.permute.xlu2 %2855 }
 0x69f   : > { %v3162_v15 = vmul.f32 %v5611_v54, %v3085_v32  ;;  %v2730_v18 = vpop.permute.xlu0 %2729  ;;  %v2973_v51 = vld [vmem:[#allocation2 + $0xe0] sm:$0xff]  ;;  %v2974_v29 = vld [vmem:[#allocation2 + $0xe8] sm:$0xff] }
 0x6a0   : > { %2807 = vst.msk [vmem:[#allocation2 + $0x60] sm:$0xff] %vm439_vm10, %v2730_v18  ;;  %v2991_v24 = vpack.c.bf16 %v2974_v29, %v2973_v51 }
 0x6a1   : > { %v3198_v48 = vadd.f32 %v5616_v44, %v3162_v15  ;;  %2927 = vst.msk [vmem:[#allocation2 + $0x5f] sm:$0xfe] %vm5909_vm8, %v2850_v46 }
 0x6a2   : > { %3399 = vmatmul.msk.bf16.gmra.mxu3 %vm1586_vm5, %v2991_v24 }
 0x6a3   : > { %v3230_v1 = vadd.f32 %v3198_v48, %v3539_v4 }
 0x6a5   : > { %3262 = vst.msk [vmem:[%s5631_s19 + $0x28] sm:$0xff] %vm341_vm3, %v3230_v1  ;;  %v2616_v50 = vpop.permute.xlu1 %2615  ;;  %v2975_v21 = vld [vmem:[#allocation2 + $0xf0] sm:$0xff] }
 0x6a6   : > { %2690 = vst.msk [vmem:[#allocation2 + $0x79] sm:$0x7f] %vm5910_vm2, %v2616_v50  ;;  %v2992_v60 = vpack.c.bf16 %v2976_v37, %v2975_v21  ;;  %v5914_v1 = vld [vmem:[#allocation5_spill] sm:$0xff]  ;;  %v5916_v37 = vld [vmem:[#allocation11_spill] sm:$0xff] }
 0x6a7   : > { %v2852_v61 = vpop.permute.xlu0 %2851 }
 0x6a8   : > { %2928 = vst.msk [vmem:[#allocation2 + $0x67] sm:$0xff] %vm5911_vm12, %v2852_v61 }
 0x6ad   : > { %v2854_v4 = vpop.permute.xlu1 %2853 }
 0x6af   : > { %v2614_v36 = vpop.permute.xlu0 %2613  ;;  %v2957_v56 = vld [vmem:[#allocation2 + $0x60] sm:$0xff]  ;;  %v2958_v49 = vld [vmem:[#allocation2 + $0x68] sm:$0xff] }
 0x6b0   : > { %2689 = vst.msk [vmem:[#allocation2 + $0x71] sm:$0xff] %vm419_vm9, %v2614_v36  ;;  %v2983_v34 = vpack.c.bf16 %v2958_v49, %v2957_v56  ;;  %vm5913_vm9 = vmmov %vm5896_vm0 }
 0x6b1   : > { %2809 = vst.msk [vmem:[#allocation2 + $0x70] sm:$0xff] %vm439_vm10, %v2734_v39  ;;  %v5915_v39 = vld [vmem:[#allocation4_spill] sm:$0xff] }
 0x6b2   : > { %2929 = vst.msk [vmem:[#allocation2 + $0x6f] sm:$0xfe] %vm5912_vm13, %v2854_v4  ;;  %3391 = vmatmul.msk.bf16.gmra.mxu1 %vm1586_vm5, %v2983_v34  ;;  %3400 = vmatmul.msk.bf16.gmra.mxu3 %vm1586_vm5, %v2992_v60 }
 0x6b4   : > { %v3128_v41 = vpop.f32.mrf.mxu3 }
 0x6b5   : > { %v3179_v38 = vmul.f32 %v5611_v54, %v3128_v41 }
 0x6b7   : > { %v3215_v14 = vadd.f32 %v5616_v44, %v3179_v38  ;;  %v2736_v20 = vpop.permute.xlu0 %2735 }
 0x6b8   : > { %2810 = vst.msk [vmem:[#allocation2 + $0x78] sm:$0xff] %vm439_vm10, %v2736_v20  ;;  %v5917_v20 = vld [vmem:[#allocation10_spill] sm:$0xff] }
 0x6b9   : > { %v3247_v11 = vadd.f32 %v3215_v14, %v3632_v23  ;;  %2930 = vst.msk [vmem:[#allocation2 + $0x77] sm:$0xff] %vm5913_vm9, %v2856_v2 }
 0x6bb   : > { %3279 = vst.msk [vmem:[%s5631_s19 + $0xb0] sm:$0xff] %vm341_vm3, %v3247_v11 }
 0x6bc   : > { %v3130_v30 = vpop.f32.mrf.mxu3 }
 0x6bd   : > { %v3180_v62 = vmul.f32 %v5611_v54, %v3130_v30  ;;  %v5918_v30 = vld [vmem:[#allocation8_spill] sm:$0xff] }
 0x6be   : > { %v3088_v17 = vpop.f32.mrf.mxu1 }
 0x6bf   : > { %v3216_v0 = vadd.f32 %v5616_v44, %v3180_v62  ;;  %v3163_v46 = vmul.f32 %v5611_v54, %v3088_v17 }
 0x6c0   : > { %v2959_v47 = vld [vmem:[#allocation2 + $0x70] sm:$0xff]  ;;  %v2960_v55 = vld [vmem:[#allocation2 + $0x78] sm:$0xff] }
 0x6c1   : > { %v3248_v42 = vadd.f32 %v3216_v0, %v3629_v22  ;;  %v3199_v23 = vadd.f32 %v5616_v44, %v3163_v46  ;;  %v2984_v5 = vpack.c.bf16 %v2960_v55, %v2959_v47 }
 0x6c3   : > { %3280 = vst.msk [vmem:[%s5631_s19 + $0xb8] sm:$0xff] %vm341_vm3, %v3248_v42  ;;  %v3231_v16 = vadd.f32 %v3199_v23, %v3560_v9  ;;  %3392 = vmatmul.msk.bf16.gmra.mxu1 %vm1586_vm5, %v2984_v5  ;;  %v3438_v42 = vld [vmem:[%s3521_s11 + $0xf0] sm:$0xff] }
 0x6c5   : > { %3263 = vst.msk [vmem:[%s5631_s19 + $0x30] sm:$0xff] %vm341_vm3, %v3231_v16  ;;  %v5919_v16 = vld [vmem:[#allocation7_spill] sm:$0xff] }
 0x6c6   : > { %v3090_v53 = vpop.f32.mrf.mxu1 }
 0x6c7   : > { %v3164_v43 = vmul.f32 %v5611_v54, %v3090_v53 }
 0x6c9   : > { %v3200_v63 = vadd.f32 %v5616_v44, %v3164_v43 }
 0x6cb   : > { %v3232_v22 = vadd.f32 %v3200_v63, %v3557_v8 }
 0x6cd   : > { %3264 = vst.msk [vmem:[%s5631_s19 + $0x38] sm:$0xff] %vm341_vm3, %v3232_v22 }
 0x6d5   : > { %v3133_v3 = vpop.f32.mrf.mxu3 }
 0x6d6   : > { %v3181_v52 = vmul.f32 %v5611_v54, %v3133_v3 }
 0x6d8   : > { %v3217_v9 = vadd.f32 %v5616_v44, %v3181_v52 }
 0x6da   : > { %v3249_v35 = vadd.f32 %v3217_v9, %v3658_v28  ;;  %v3439_v9 = vld [vmem:[%s3521_s11 + $0xf8] sm:$0xff] }
 0x6dc   : > { %3281 = vst.msk [vmem:[%s5631_s19 + $0xc0] sm:$0xff] %vm341_vm3, %v3249_v35 }
 0x6dd   : > { %v3135_v58 = vpop.f32.mrf.mxu3 }
 0x6de   : > { %v3182_v40 = vmul.f32 %v5611_v54, %v3135_v58 }
 0x6e0   : > { %v3218_v57 = vadd.f32 %v5616_v44, %v3182_v40  ;;  %v3093_v25 = vpop.f32.mrf.mxu1  ;;  %v5920_v40 = vld [vmem:[#allocation6_spill] sm:$0xff] }
 0x6e1   : > { %v3165_v8 = vmul.f32 %v5611_v54, %v3093_v25 }
 0x6e2   : > { %v3250_v13 = vadd.f32 %v3218_v57, %v3653_v27 }
 0x6e3   : > { %v3201_v33 = vadd.f32 %v5616_v44, %v3165_v8 }
 0x6e4   : > { %3282 = vst.msk [vmem:[%s5631_s19 + $0xc8] sm:$0xff] %vm341_vm3, %v3250_v13 }
 0x6e5   : > { %v3233_v28 = vadd.f32 %v3201_v33, %v3554_v7  ;;  %v5921_v33 = vld [vmem:[#allocation9_spill] sm:$0xff] }
 0x6e7   : > { %3265 = vst.msk [vmem:[%s5631_s19 + $0x40] sm:$0xff] %vm341_vm3, %v3233_v28 }
 0x6e8   : > { %v3095_v6 = vpop.f32.mrf.mxu1 }
 0x6e9   : > { %v3166_v19 = vmul.f32 %v5611_v54, %v3095_v6 }
 0x6eb   : > { %v3202_v45 = vadd.f32 %v5616_v44, %v3166_v19 }
 0x6ed   : > { %v3234_v10 = vadd.f32 %v3202_v45, %v3575_v12 }
 0x6ef   : > { %3266 = vst.msk [vmem:[%s5631_s19 + $0x48] sm:$0xff] %vm341_vm3, %v3234_v10 }
 0x6fd   : > { %v3138_v27 = vpop.f32.mrf.mxu3 }
 0x6fe   : > { %v3183_v59 = vmul.f32 %v5611_v54, %v3138_v27 }
 0x700   : > { %v3219_v32 = vadd.f32 %v5616_v44, %v3183_v59 }
 0x702   : > { %v3251_v7 = vadd.f32 %v3219_v32, %v3650_v26 }
 0x704   : > { %3283 = vst.msk [vmem:[%s5631_s19 + $0xd0] sm:$0xff] %vm341_vm3, %v3251_v7 }
 0x705   : > { %v3140_v15 = vpop.f32.mrf.mxu3 }
 0x706   : > { %v3184_v18 = vmul.f32 %v5611_v54, %v3140_v15 }
 0x708   : > { %v3220_v51 = vadd.f32 %v5616_v44, %v3184_v18  ;;  %v3098_v29 = vpop.f32.mrf.mxu1 }
 0x709   : > { %v3167_v12 = vmul.f32 %v5611_v54, %v3098_v29 }
 0x70a   : > { %v3252_v24 = vadd.f32 %v3220_v51, %v3689_v31 }
 0x70b   : > { %v3203_v48 = vadd.f32 %v5616_v44, %v3167_v12 }
 0x70c   : > { %3284 = vst.msk [vmem:[%s5631_s19 + $0xd8] sm:$0xff] %vm341_vm3, %v3252_v24 }
 0x70d   : > { %v3235_v26 = vadd.f32 %v3203_v48, %v5914_v1 }
 0x70f   : > { %3267 = vst.msk [vmem:[%s5631_s19 + $0x50] sm:$0xff] %vm341_vm3, %v3235_v26 }
 0x710   : > { %v3100_v50 = vpop.f32.mrf.mxu1 }
 0x711   : > { %v3168_v61 = vmul.f32 %v5611_v54, %v3100_v50 }
 0x713   : > { %v3204_v21 = vadd.f32 %v5616_v44, %v3168_v61 }
 0x715   : > { %v3236_v36 = vadd.f32 %v3204_v21, %v5915_v39 }
 0x717   : > { %3268 = vst.msk [vmem:[%s5631_s19 + $0x58] sm:$0xff] %vm341_vm3, %v3236_v36 }
 0x725   : > { %v3143_v31 = vpop.f32.mrf.mxu3 }
 0x726   : > { %v3185_v56 = vmul.f32 %v5611_v54, %v3143_v31 }
 0x728   : > { %v3221_v49 = vadd.f32 %v5616_v44, %v3185_v56 }
 0x72a   : > { %v3253_v34 = vadd.f32 %v3221_v49, %v5916_v37 }
 0x72c   : > { %3285 = vst.msk [vmem:[%s5631_s19 + $0xe0] sm:$0xff] %vm341_vm3, %v3253_v34 }
 0x72d   : > { %v3145_v60 = vpop.f32.mrf.mxu3 }
 0x72e   : > { %v3186_v4 = vmul.f32 %v5611_v54, %v3145_v60 }
 0x72f   : > { %v3103_v41 = vpop.f32.mrf.mxu1 }
 0x730   : > { %v3222_v38 = vadd.f32 %v5616_v44, %v3186_v4  ;;  %v3169_v14 = vmul.f32 %v5611_v54, %v3103_v41 }
 0x732   : > { %v3254_v2 = vadd.f32 %v3222_v38, %v5917_v20  ;;  %v3205_v11 = vadd.f32 %v5616_v44, %v3169_v14 }
 0x734   : > { %3286 = vst.msk [vmem:[%s5631_s19 + $0xe8] sm:$0xff] %vm341_vm3, %v3254_v2  ;;  %v3237_v62 = vadd.f32 %v3205_v11, %v5918_v30 }
 0x735   : > { %v3148_v17 = vpop.f32.mrf.mxu3 }
 0x736   : > { %3269 = vst.msk [vmem:[%s5631_s19 + $0x60] sm:$0xff] %vm341_vm3, %v3237_v62  ;;  %v3187_v0 = vmul.f32 %v5611_v54, %v3148_v17 }
 0x737   : > { %v3105_v46 = vpop.f32.mrf.mxu1 }
 0x738   : > { %v3223_v47 = vadd.f32 %v5616_v44, %v3187_v0  ;;  %v3170_v55 = vmul.f32 %v5611_v54, %v3105_v46 }
 0x73a   : > { %v3255_v23 = vadd.f32 %v3438_v42, %v3223_v47  ;;  %v3206_v5 = vadd.f32 %v5616_v44, %v3170_v55 }
 0x73c   : > { %3287 = vst.msk [vmem:[%s5631_s19 + $0xf0] sm:$0xff] %vm341_vm3, %v3255_v23  ;;  %v3238_v53 = vadd.f32 %v3206_v5, %v5919_v16 }
 0x73d   : > { %v3150_v43 = vpop.f32.mrf.mxu3 }
 0x73e   : > { %3270 = vst.msk [vmem:[%s5631_s19 + $0x68] sm:$0xff] %vm341_vm3, %v3238_v53  ;;  %v3188_v63 = vmul.f32 %v5611_v54, %v3150_v43 }
 0x740   : > { %v3224_v22 = vadd.f32 %v5616_v44, %v3188_v63  ;;  %v3108_v3 = vpop.f32.mrf.mxu1 }
 0x741   : > { %v3171_v52 = vmul.f32 %v5611_v54, %v3108_v3 }
 0x742   : > { %v3256_v35 = vadd.f32 %v3439_v9, %v3224_v22 }
 0x743   : > { %v3207_v58 = vadd.f32 %v5616_v44, %v3171_v52 }
 0x744   : > { %3288 = vst.msk [vmem:[%s5631_s19 + $0xf8] sm:$0xff] %vm341_vm3, %v3256_v35 }
 0x745   : > { %v3239_v57 = vadd.f32 %v3207_v58, %v5920_v40 }
 0x747   : > { %3271 = vst.msk [vmem:[%s5631_s19 + $0x70] sm:$0xff] %vm341_vm3, %v3239_v57 }
 0x748   : > { %v3110_v25 = vpop.f32.mrf.mxu1 }
 0x749   : > { %v3172_v8 = vmul.f32 %v5611_v54, %v3110_v25 }
 0x74b   : > { %v3208_v13 = vadd.f32 %v5616_v44, %v3172_v8 }
 0x74d   : > { %v3240_v28 = vadd.f32 %v3208_v13, %v5921_v33 }
 0x74f   : > { %3272 = vst.msk [vmem:[%s5631_s19 + $0x78] sm:$0xff] %vm341_vm3, %v3240_v28 }
 0x750 PF: > { %s20_s29 = sadd.s32 1, %s3446_s29  }
 0x751   : > { %p17_p4 = scmp.ge.s32.totalorder %s20_s29, 4  }
 0x753   :  { %19 = sbr.rel (!%p17_p4) target bundleno = 3 (0x3), region = 84 }

</bundles_post_ra>
